<compile_context>
chip_gen: v7x
topology: tpu7x:2x2x1
jax: 0.10.0
libtpu: 0.0.40
codegen_flags: <defaults>
</compile_context>

<pallas_src>
import functools

import numpy as np

import jax
import jax.numpy as jnp
from jax.experimental import pallas as pl
from jax.experimental.pallas import tpu as pltpu


def _round_up(x, m):
    return ((x + m - 1) // m) * m


def _pick_pixel_tile(p, cap=512):
    """Pixel-tile size (lane axis): full extent if small, else a multiple of 128."""
    if p <= cap:
        return p
    t = cap - (cap % 128)
    while t >= 128:
        if p % t == 0:
            return t
        t -= 128
    # TODO(synk): pad the pixel axis to a multiple of 128 (masked last tile)
    # instead of falling back to one huge full-extent block.
    return p


# ----------------------------------------------------------------------------
# Bilinear upsample operator (align_corners=False / half-pixel), built on host.
# ----------------------------------------------------------------------------
def _interp_matrix(out_size, in_size):
    # TODO(synk): ancient PyTorch (<0.4) F.upsample defaulted to
    # align_corners=True; swap the coordinate formula if parity with such a
    # checkpoint is required.
    src = (np.arange(out_size, dtype=np.float64) + 0.5) * (in_size / out_size) - 0.5
    src = np.clip(src, 0.0, in_size - 1)
    lo = np.floor(src).astype(np.int64)
    hi = np.minimum(lo + 1, in_size - 1)
    t = src - lo
    m = np.zeros((out_size, in_size), dtype=np.float64)
    m[np.arange(out_size), lo] += 1.0 - t
    m[np.arange(out_size), hi] += t
    return m


def _upsample_operator(ht, wt, h, w):
    a_h = _interp_matrix(h, ht)          # (h, ht)
    a_w = _interp_matrix(w, wt)          # (w, wt)
    # U[a*wt + b, i*w + j] = a_h[i, a] * a_w[j, b]
    u = np.einsum("ia,jb->abij", a_h, a_w).reshape(ht * wt, h * w)
    return jnp.asarray(u, dtype=jnp.bfloat16)


# ----------------------------------------------------------------------------
# Kernel 1 (head, low resolution):
#   partial = W3a_top_folded @ relu(W1_folded @ xt + b1)
# ----------------------------------------------------------------------------
def _head_kernel(xt_ref, w1_ref, b1_ref, w3at_ref, out_ref):
    f32 = jnp.float32
    xt = xt_ref[0]                                             # (512, tp_lo) bf16
    y1 = jnp.dot(w1_ref[...], xt, preferred_element_type=f32)  # (256, tp_lo)
    y1 = jnp.maximum(y1 + b1_ref[...], 0.0)
    part = jnp.dot(w3at_ref[...], y1.astype(jnp.bfloat16),
                   preferred_element_type=f32)                 # (256, tp_lo)
    out_ref[0] = part.astype(out_ref.dtype)


def _head_call(xt3, w1f, b1, w3a_top):
    n, cin, p_lo = xt3.shape
    cout = w1f.shape[0]          # 256
    c3 = w3a_top.shape[0]        # 256
    tp = _pick_pixel_tile(p_lo)
    return pl.pallas_call(
        _head_kernel,
        out_shape=jax.ShapeDtypeStruct((n, c3, p_lo), jnp.bfloat16),
        grid_spec=pltpu.PrefetchScalarGridSpec(
            num_scalar_prefetch=0,
            grid=(n, p_lo // tp),
            in_specs=[
                pl.BlockSpec((1, cin, tp), lambda i, j: (i, 0, j)),
                pl.BlockSpec((cout, cin), lambda i, j: (0, 0)),
                pl.BlockSpec((cout, 1), lambda i, j: (0, 0)),
                pl.BlockSpec((c3, cout), lambda i, j: (0, 0)),
            ],
            out_specs=pl.BlockSpec((1, c3, tp), lambda i, j: (i, 0, j)),
        ),
        compiler_params=pltpu.CompilerParams(
            dimension_semantics=("parallel", "parallel")),
    )(xt3, w1f, b1, w3a_top)


# ----------------------------------------------------------------------------
# Kernel 2 (tail, high resolution):
#   top  = partial @ U[:, tile]                      (in-kernel 2x upsample)
#   y2   = relu(W2 @ xl + b2)
#   a3   = relu(top + W3a_bot @ y2 + b3a)
#   x    = relu(W3b @ a3 + b3b)        -> stored (default bf16)
#   seg  = W4 @ x + b4                 -> stored f32 (sublane-padded rows)
# ----------------------------------------------------------------------------
def _tail_kernel(part_ref, u_ref, xl_ref,
                 w2_ref, w3ab_ref, w3b_ref, w4_ref,
                 b2_ref, b3a_ref, b3b_ref, b4_ref,
                 x_ref, seg_ref):
    f32 = jnp.float32
    bf16 = jnp.bfloat16

    # Upsampled conv3a "top" contribution (commuted through the linear upsample).
    top = jnp.dot(part_ref[0], u_ref[...], preferred_element_type=f32)   # (256, tp)

    # conv2 (+BN folded, ReLU): 48 channels on sublanes, no lane padding needed.
    y2 = jnp.dot(w2_ref[...], xl_ref[0], preferred_element_type=f32)     # (48, tp)
    y2 = jnp.maximum(y2 + b2_ref[...], 0.0)

    # conv3a: split-K accumulation replaces the channel concat.
    a3 = top + jnp.dot(w3ab_ref[...], y2.astype(bf16),
                       preferred_element_type=f32)                       # (256, tp)
    a3 = jnp.maximum(a3 + b3a_ref[...], 0.0)

    # conv3b: 256 -> 1024 (+BN folded, ReLU).  This is the returned feature x.
    x = jnp.dot(w3b_ref[...], a3.astype(bf16), preferred_element_type=f32)
    x = jnp.maximum(x + b3b_ref[...], 0.0)                               # (1024, tp)
    x_store = x.astype(x_ref.dtype)
    x_ref[0] = x_store
    x_mxu = x_store if x_store.dtype == jnp.bfloat16 else x.astype(bf16)

    # conv4: 1024 -> num_classes (sublane-padded), bias only.
    seg = jnp.dot(w4_ref[...], x_mxu, preferred_element_type=f32)
    seg_ref[0] = (seg + b4_ref[...]).astype(seg_ref.dtype)


def _tail_call(part, u, xl3, p, x_dtype):
    n, c_part, p_lo = part.shape
    _, c_xl, p_hi = xl3.shape
    c2 = p["w2f"].shape[0]        # 48
    c3 = p["w3a_bot"].shape[0]    # 256
    c3b = p["w3bf"].shape[0]      # 1024
    ncp = p["w4f"].shape[0]       # num_classes padded to multiple of 8
    tp = _pick_pixel_tile(p_hi)

    return pl.pallas_call(
        _tail_kernel,
        out_shape=(jax.ShapeDtypeStruct((n, c3b, p_hi), x_dtype),
                   jax.ShapeDtypeStruct((n, ncp, p_hi), jnp.float32)),
        grid_spec=pltpu.PrefetchScalarGridSpec(
            num_scalar_prefetch=0,
            grid=(n, p_hi // tp),
            in_specs=[
                pl.BlockSpec((1, c_part, p_lo), lambda i, j: (i, 0, 0)),  # partial
                pl.BlockSpec((p_lo, tp),        lambda i, j: (0, j)),     # U
                pl.BlockSpec((1, c_xl, tp),     lambda i, j: (i, 0, j)),  # xl
                pl.BlockSpec((c2, c_xl),        lambda i, j: (0, 0)),     # W2
                pl.BlockSpec((c3, c2),          lambda i, j: (0, 0)),     # W3a_bot
                pl.BlockSpec((c3b, c3),         lambda i, j: (0, 0)),     # W3b
                pl.BlockSpec((ncp, c3b),        lambda i, j: (0, 0)),     # W4
                pl.BlockSpec((c2, 1),           lambda i, j: (0, 0)),     # b2
                pl.BlockSpec((c3, 1),           lambda i, j: (0, 0)),     # b3a
                pl.BlockSpec((c3b, 1),          lambda i, j: (0, 0)),     # b3b
                pl.BlockSpec((ncp, 1),          lambda i, j: (0, 0)),     # b4
            ],
            out_specs=[
                pl.BlockSpec((1, c3b, tp), lambda i, j: (i, 0, j)),       # x
                pl.BlockSpec((1, ncp, tp), lambda i, j: (i, 0, j)),       # seg
            ],
        ),
        compiler_params=pltpu.CompilerParams(
            dimension_semantics=("parallel", "parallel")),
    )(part, u, xl3, p["w2f"], p["w3a_bot"], p["w3bf"], p["w4f"],
      p["b2"], p["b3a"], p["b3b"], p["b4"])


# ----------------------------------------------------------------------------
# Deterministic parameters (channel-major weights, inference BN folded, bf16).
# ----------------------------------------------------------------------------
def init_decoder_params(key, num_classes):
    ks = jax.random.split(key, 10)
    bf16 = jnp.bfloat16

    def conv_w(k, cout, cin):
        return jax.random.normal(k, (cout, cin), jnp.float32) / jnp.sqrt(jnp.float32(cin))

    def bn_fold(k, c, eps=1e-5):
        k1, k2, k3, k4 = jax.random.split(k, 4)
        gamma = 1.0 + 0.1 * jax.random.normal(k1, (c,), jnp.float32)
        beta = 0.1 * jax.random.normal(k2, (c,), jnp.float32)
        mean = 0.1 * jax.random.normal(k3, (c,), jnp.float32)
        var = jax.random.uniform(k4, (c,), jnp.float32, minval=0.5, maxval=1.5)
        scale = gamma * jax.lax.rsqrt(var + eps)
        return scale, beta - mean * scale

    w1 = conv_w(ks[0], 256, 512); s1, b1 = bn_fold(ks[1], 256)
    w2 = conv_w(ks[2], 48, 256); s2, b2 = bn_fold(ks[3], 48)
    w3a = conv_w(ks[4], 256, 304); s3a, b3a = bn_fold(ks[5], 256)
    w3b = conv_w(ks[6], 1024, 256); s3b, b3b = bn_fold(ks[7], 1024)
    w4 = conv_w(ks[8], num_classes, 1024)
    bias4 = 0.01 * jax.random.normal(ks[9], (num_classes,), jnp.float32)

    ncp = _round_up(num_classes, 8)     # sublane padding for seg rows
    w3a_f = w3a * s3a[:, None]
    return {
        "w1f": (w1 * s1[:, None]).astype(bf16),
        "b1": b1.reshape(-1, 1),
        "w2f": (w2 * s2[:, None]).astype(bf16),
        "b2": b2.reshape(-1, 1),
        "w3a_top": w3a_f[:, :256].astype(bf16),
        "w3a_bot": w3a_f[:, 256:].astype(bf16),
        "b3a": b3a.reshape(-1, 1),
        "w3bf": (w3b * s3b[:, None]).astype(bf16),
        "b3b": b3b.reshape(-1, 1),
        "w4f": jnp.zeros((ncp, 1024), jnp.float32).at[:num_classes].set(w4).astype(bf16),
        "b4": jnp.zeros((ncp, 1), jnp.float32).at[:num_classes, 0].set(bias4),
    }


# ----------------------------------------------------------------------------
# Forward pass (matches Decoder_Module.forward; returns (seg, x)).
# ----------------------------------------------------------------------------
@functools.partial(jax.jit, static_argnames=("num_classes", "x_dtype"))
def decoder_forward(params, xt_nchw, xl_nchw, *, num_classes, x_dtype=jnp.bfloat16):
    n, ct, ht, wt = xt_nchw.shape
    _, cl, h, w = xl_nchw.shape
    assert ct == 512 and cl == 256, (ct, cl)
    p_lo, p_hi = ht * wt, h * w

    # Channel-major flattening is a free reshape on NCHW (no transpose).
    xt3 = xt_nchw.reshape(n, ct, p_lo).astype(jnp.bfloat16)
    xl3 = xl_nchw.reshape(n, cl, p_hi).astype(jnp.bfloat16)

    # Head kernel at low resolution: conv1 (+BN+ReLU) fused with the conv3a
    # top-block matmul (upsample/matmul commutation -> 4x fewer MACs).
    part = _head_call(xt3, params["w1f"], params["b1"], params["w3a_top"])

    # Exact bilinear operator (compile-time constant); applied inside the tail.
    u = _upsample_operator(ht, wt, h, w)

    # Fused tail: upsample + conv2 + concat(conv3a split-K) + conv3b + conv4.
    x3, seg3 = _tail_call(part, u, xl3, params, x_dtype)

    x_out = x3.reshape(n, x3.shape[1], h, w)
    seg = seg3[:, :num_classes, :].reshape(n, num_classes, h, w)
    return seg, x_out


# ----------------------------------------------------------------------------
# Pure-JAX reference (f32 math, independent gather-based bilinear upsample).
# ----------------------------------------------------------------------------
def _bilinear_ref_nchw(x, out_h, out_w):
    n, c, in_h, in_w = x.shape
    ys = jnp.clip((jnp.arange(out_h, dtype=jnp.float32) + 0.5) * (in_h / out_h) - 0.5,
                  0.0, in_h - 1)
    xs = jnp.clip((jnp.arange(out_w, dtype=jnp.float32) + 0.5) * (in_w / out_w) - 0.5,
                  0.0, in_w - 1)
    y0 = jnp.floor(ys).astype(jnp.int32); y1 = jnp.minimum(y0 + 1, in_h - 1)
    x0 = jnp.floor(xs).astype(jnp.int32); x1 = jnp.minimum(x0 + 1, in_w - 1)
    wy = (ys - y0.astype(jnp.float32))[None, None, :, None]
    wx = (xs - x0.astype(jnp.float32))[None, None, None, :]
    g = lambda yi, xi: x[:, :, yi][:, :, :, xi]
    top = g(y0, x0) * (1 - wx) + g(y0, x1) * wx
    bot = g(y1, x0) * (1 - wx) + g(y1, x1) * wx
    return top * (1 - wy) + bot * wy


def _reference_forward(p, xt, xl, num_classes):
    f = lambda a: a.astype(jnp.float32)
    conv = lambda wm, x: jnp.einsum("oi,nipq->nopq", f(wm), x)
    bias = lambda b: b.reshape(1, -1, 1, 1)
    n, _, h, w = xl.shape
    y1 = jax.nn.relu(conv(p["w1f"], xt) + bias(p["b1"]))
    xt_up = _bilinear_ref_nchw(y1, h, w)
    y2 = jax.nn.relu(conv(p["w2f"], xl) + bias(p["b2"]))
    cat = jnp.concatenate([xt_up, y2], axis=1)
    w3a = jnp.concatenate([f(p["w3a_top"]), f(p["w3a_bot"])], axis=1)
    a3 = jax.nn.relu(jnp.einsum("oi,nipq->nopq", w3a, cat) + bias(p["b3a"]))
    x = jax.nn.relu(conv(p["w3bf"], a3) + bias(p["b3b"]))
    seg = conv(p["w4f"], x) + bias(p["b4"])
    return seg[:, :num_classes], x


# ----------------------------------------------------------------------------
if __name__ == "__main__":
    num_classes = 8
    key = jax.random.PRNGKey(0)
    kp, kt, kl = jax.random.split(key, 3)

    params = init_decoder_params(kp, num_classes)

    # xt: low-res high-level features; xl: high-res low-level features.
    xt = jax.random.normal(kt, (2, 512, 8, 8), jnp.float32)
    xl = jax.random.normal(kl, (2, 256, 16, 16), jnp.float32)

    seg, x_feat = decoder_forward(params, xt, xl, num_classes=num_classes)
    seg = jax.block_until_ready(seg)
    x_feat = jax.block_until_ready(x_feat)

    assert seg.shape == (2, num_classes, 16, 16), seg.shape
    assert x_feat.shape == (2, 1024, 16, 16), x_feat.shape
    assert bool(jnp.all(jnp.isfinite(seg.astype(jnp.float32))))
    assert bool(jnp.all(jnp.isfinite(x_feat.astype(jnp.float32))))

    # Tolerance check against the f32 reference (kernel uses bf16 MXU inputs
    # and a bf16 feature-map store, so expect ~1e-2-level relative deviation).
    seg_gold, x_gold = _reference_forward(params, xt, xl, num_classes)

    def _check(a, b, name):
        a = a.astype(jnp.float32); b = b.astype(jnp.float32)
        err = float(jnp.max(jnp.abs(a - b)))
        tol = 0.08 * float(jnp.max(jnp.abs(b))) + 0.1
        assert err <= tol, (name, err, tol)

    _check(x_feat, x_gold, "x")
    _check(seg, seg_gold, "seg")

    print("KERNEL_OK")
</pallas_src>

<mosaic_0001>
module attributes {stable_mosaic.version = 11 : i64} {
  func.func @_head_kernel(%arg0: i32, %arg1: i32, %arg2: memref<1x512x64xbf16, #tpu.memory_space<vmem>>, %arg3: memref<256x512xbf16, #tpu.memory_space<vmem>>, %arg4: memref<256x1xf32, #tpu.memory_space<vmem>>, %arg5: memref<256x256xbf16, #tpu.memory_space<vmem>>, %arg6: memref<1x256x64xbf16, #tpu.memory_space<vmem>>) attributes {dimension_semantics = [#tpu.dimension_semantics<parallel>, #tpu.dimension_semantics<parallel>], iteration_bounds = array<i64: 2, 1>, scalar_prefetch = 0 : i64, scratch_operands = 0 : i64, tpu.core_type = #tpu.core_type<tc>, window_params = [{transform_indices = @transform_0, window_bounds = array<i64: 1, 512, 64>}, {pipeline_mode = #tpu.pipeline_mode<synchronous>, transform_indices = @transform_1, window_bounds = array<i64: 256, 512>}, {pipeline_mode = #tpu.pipeline_mode<synchronous>, transform_indices = @transform_2, window_bounds = array<i64: 256, 1>}, {pipeline_mode = #tpu.pipeline_mode<synchronous>, transform_indices = @transform_3, window_bounds = array<i64: 256, 256>}, {transform_indices = @transform_4, window_bounds = array<i64: 1, 256, 64>}]} {
    %c0 = arith.constant 0 : index
    %c0_0 = arith.constant 0 : index
    %c0_1 = arith.constant 0 : index
    %0 = vector.load %arg2[%c0, %c0_0, %c0_1] : memref<1x512x64xbf16, #tpu.memory_space<vmem>>, vector<1x512x64xbf16>
    %1 = vector.shape_cast %0 : vector<1x512x64xbf16> to vector<512x64xbf16>
    %c0_2 = arith.constant 0 : index
    %c0_3 = arith.constant 0 : index
    %2 = vector.load %arg3[%c0_2, %c0_3] : memref<256x512xbf16, #tpu.memory_space<vmem>>, vector<256x512xbf16>
    %cst = arith.constant dense<0.000000e+00> : vector<256x64xf32>
    %3 = tpu.matmul %2, %1, %cst {dimension_numbers = #tpu.dot_dimension_numbers<[1], [0], [0], [1], [0, 0, 1, 1], [], []>} : vector<256x512xbf16>, vector<512x64xbf16>, vector<256x64xf32> -> vector<256x64xf32>
    %c0_4 = arith.constant 0 : index
    %c0_5 = arith.constant 0 : index
    %4 = vector.load %arg4[%c0_4, %c0_5] : memref<256x1xf32, #tpu.memory_space<vmem>>, vector<256x1xf32>
    %5 = vector.broadcast %4 : vector<256x1xf32> to vector<256x64xf32>
    %6 = arith.addf %3, %5 : vector<256x64xf32>
    %cst_6 = arith.constant 0.000000e+00 : f32
    %7 = vector.broadcast %cst_6 : f32 to vector<256x64xf32>
    %8 = arith.maximumf %6, %7 : vector<256x64xf32>
    %c0_7 = arith.constant 0 : index
    %c0_8 = arith.constant 0 : index
    %9 = vector.load %arg5[%c0_7, %c0_8] : memref<256x256xbf16, #tpu.memory_space<vmem>>, vector<256x256xbf16>
    %10 = arith.truncf %8 : vector<256x64xf32> to vector<256x64xbf16>
    %cst_9 = arith.constant dense<0.000000e+00> : vector<256x64xf32>
    %11 = tpu.matmul %9, %10, %cst_9 {dimension_numbers = #tpu.dot_dimension_numbers<[1], [0], [0], [1], [0, 0, 1, 1], [], []>} : vector<256x256xbf16>, vector<256x64xbf16>, vector<256x64xf32> -> vector<256x64xf32>
    %12 = arith.truncf %11 : vector<256x64xf32> to vector<256x64xbf16>
    %c0_10 = arith.constant 0 : index
    %c0_11 = arith.constant 0 : index
    %c0_12 = arith.constant 0 : index
    %13 = vector.load %arg6[%c0_10, %c0_11, %c0_12] : memref<1x256x64xbf16, #tpu.memory_space<vmem>>, vector<1x256x64xbf16>
    %14 = vector.shape_cast %13 : vector<1x256x64xbf16> to vector<256x64xbf16>
    %15 = vector.shape_cast %12 : vector<256x64xbf16> to vector<1x256x64xbf16>
    tpu.vector_store %arg6[%c0_10, %c0_11, %c0_12], %15 {strides = array<i32>} : memref<1x256x64xbf16, #tpu.memory_space<vmem>>, vector<1x256x64xbf16>,
    return
  }
  func.func @transform_0(%arg0: i32, %arg1: i32) -> (i32, i32, i32) {
    %c0_i32 = arith.constant 0 : i32
    %c0_i32_0 = arith.constant 0 : i32
    return %arg0, %c0_i32, %arg1 : i32, i32, i32
  }
  func.func @transform_1(%arg0: i32, %arg1: i32) -> (i32, i32) {
    %c0_i32 = arith.constant 0 : i32
    %c0_i32_0 = arith.constant 0 : i32
    %c0_i32_1 = arith.constant 0 : i32
    return %c0_i32, %c0_i32_0 : i32, i32
  }
  func.func @transform_2(%arg0: i32, %arg1: i32) -> (i32, i32) {
    %c0_i32 = arith.constant 0 : i32
    %c0_i32_0 = arith.constant 0 : i32
    %c0_i32_1 = arith.constant 0 : i32
    return %c0_i32, %c0_i32_0 : i32, i32
  }
  func.func @transform_3(%arg0: i32, %arg1: i32) -> (i32, i32) {
    %c0_i32 = arith.constant 0 : i32
    %c0_i32_0 = arith.constant 0 : i32
    %c0_i32_1 = arith.constant 0 : i32
    return %c0_i32, %c0_i32_0 : i32, i32
  }
  func.func @transform_4(%arg0: i32, %arg1: i32) -> (i32, i32, i32) {
    %c0_i32 = arith.constant 0 : i32
    %c0_i32_0 = arith.constant 0 : i32
    return %arg0, %c0_i32, %arg1 : i32, i32, i32
  }
}

module attributes {stable_mosaic.version = 11 : i64} {
  func.func @_tail_kernel(%arg0: i32, %arg1: i32, %arg2: memref<1x256x64xbf16, #tpu.memory_space<vmem>>, %arg3: memref<64x256xbf16, #tpu.memory_space<vmem>>, %arg4: memref<1x256x256xbf16, #tpu.memory_space<vmem>>, %arg5: memref<48x256xbf16, #tpu.memory_space<vmem>>, %arg6: memref<256x48xbf16, #tpu.memory_space<vmem>>, %arg7: memref<1024x256xbf16, #tpu.memory_space<vmem>>, %arg8: memref<8x1024xbf16, #tpu.memory_space<vmem>>, %arg9: memref<48x1xf32, #tpu.memory_space<vmem>>, %arg10: memref<256x1xf32, #tpu.memory_space<vmem>>, %arg11: memref<1024x1xf32, #tpu.memory_space<vmem>>, %arg12: memref<8x1xf32, #tpu.memory_space<vmem>>, %arg13: memref<1x1024x256xbf16, #tpu.memory_space<vmem>>, %arg14: memref<1x8x256xf32, #tpu.memory_space<vmem>>) attributes {dimension_semantics = [#tpu.dimension_semantics<parallel>, #tpu.dimension_semantics<parallel>], iteration_bounds = array<i64: 2, 1>, scalar_prefetch = 0 : i64, scratch_operands = 0 : i64, tpu.core_type = #tpu.core_type<tc>, window_params = [{transform_indices = @transform_0, window_bounds = array<i64: 1, 256, 64>}, {transform_indices = @transform_1, window_bounds = array<i64: 64, 256>}, {transform_indices = @transform_2, window_bounds = array<i64: 1, 256, 256>}, {pipeline_mode = #tpu.pipeline_mode<synchronous>, transform_indices = @transform_3, window_bounds = array<i64: 48, 256>}, {pipeline_mode = #tpu.pipeline_mode<synchronous>, transform_indices = @transform_4, window_bounds = array<i64: 256, 48>}, {pipeline_mode = #tpu.pipeline_mode<synchronous>, transform_indices = @transform_5, window_bounds = array<i64: 1024, 256>}, {pipeline_mode = #tpu.pipeline_mode<synchronous>, transform_indices = @transform_6, window_bounds = array<i64: 8, 1024>}, {pipeline_mode = #tpu.pipeline_mode<synchronous>, transform_indices = @transform_7, window_bounds = array<i64: 48, 1>}, {pipeline_mode = #tpu.pipeline_mode<synchronous>, transform_indices = @transform_8, window_bounds = array<i64: 256, 1>}, {pipeline_mode = #tpu.pipeline_mode<synchronous>, transform_indices = @transform_9, window_bounds = array<i64: 1024, 1>}, {pipeline_mode = #tpu.pipeline_mode<synchronous>, transform_indices = @transform_10, window_bounds = array<i64: 8, 1>}, {transform_indices = @transform_11, window_bounds = array<i64: 1, 1024, 256>}, {transform_indices = @transform_12, window_bounds = array<i64: 1, 8, 256>}]} {
    %c0 = arith.constant 0 : index
    %c0_0 = arith.constant 0 : index
    %c0_1 = arith.constant 0 : index
    %0 = vector.load %arg2[%c0, %c0_0, %c0_1] : memref<1x256x64xbf16, #tpu.memory_space<vmem>>, vector<1x256x64xbf16>
    %1 = vector.shape_cast %0 : vector<1x256x64xbf16> to vector<256x64xbf16>
    %c0_2 = arith.constant 0 : index
    %c0_3 = arith.constant 0 : index
    %2 = vector.load %arg3[%c0_2, %c0_3] : memref<64x256xbf16, #tpu.memory_space<vmem>>, vector<64x256xbf16>
    %cst = arith.constant dense<0.000000e+00> : vector<256x256xf32>
    %3 = tpu.matmul %1, %2, %cst {dimension_numbers = #tpu.dot_dimension_numbers<[1], [0], [0], [1], [0, 0, 1, 1], [], []>} : vector<256x64xbf16>, vector<64x256xbf16>, vector<256x256xf32> -> vector<256x256xf32>
    %c0_4 = arith.constant 0 : index
    %c0_5 = arith.constant 0 : index
    %4 = vector.load %arg5[%c0_4, %c0_5] : memref<48x256xbf16, #tpu.memory_space<vmem>>, vector<48x256xbf16>
    %c0_6 = arith.constant 0 : index
    %c0_7 = arith.constant 0 : index
    %c0_8 = arith.constant 0 : index
    %5 = vector.load %arg4[%c0_6, %c0_7, %c0_8] : memref<1x256x256xbf16, #tpu.memory_space<vmem>>, vector<1x256x256xbf16>
    %6 = vector.shape_cast %5 : vector<1x256x256xbf16> to vector<256x256xbf16>
    %cst_9 = arith.constant dense<0.000000e+00> : vector<48x256xf32>
    %7 = tpu.matmul %4, %6, %cst_9 {dimension_numbers = #tpu.dot_dimension_numbers<[1], [0], [0], [1], [0, 0, 1, 1], [], []>} : vector<48x256xbf16>, vector<256x256xbf16>, vector<48x256xf32> -> vector<48x256xf32>
    %c0_10 = arith.constant 0 : index
    %c0_11 = arith.constant 0 : index
    %8 = vector.load %arg9[%c0_10, %c0_11] : memref<48x1xf32, #tpu.memory_space<vmem>>, vector<48x1xf32>
    %9 = vector.broadcast %8 : vector<48x1xf32> to vector<48x256xf32>
    %10 = arith.addf %7, %9 : vector<48x256xf32>
    %cst_12 = arith.constant 0.000000e+00 : f32
    %11 = vector.broadcast %cst_12 : f32 to vector<48x256xf32>
    %12 = arith.maximumf %10, %11 : vector<48x256xf32>
    %c0_13 = arith.constant 0 : index
    %c0_14 = arith.constant 0 : index
    %13 = vector.load %arg6[%c0_13, %c0_14] : memref<256x48xbf16, #tpu.memory_space<vmem>>, vector<256x48xbf16>
    %14 = arith.truncf %12 : vector<48x256xf32> to vector<48x256xbf16>
    %cst_15 = arith.constant dense<0.000000e+00> : vector<256x256xf32>
    %15 = tpu.matmul %13, %14, %cst_15 {dimension_numbers = #tpu.dot_dimension_numbers<[1], [0], [0], [1], [0, 0, 1, 1], [], []>} : vector<256x48xbf16>, vector<48x256xbf16>, vector<256x256xf32> -> vector<256x256xf32>
    %16 = arith.addf %3, %15 : vector<256x256xf32>
    %c0_16 = arith.constant 0 : index
    %c0_17 = arith.constant 0 : index
    %17 = vector.load %arg10[%c0_16, %c0_17] : memref<256x1xf32, #tpu.memory_space<vmem>>, vector<256x1xf32>
    %18 = vector.broadcast %17 : vector<256x1xf32> to vector<256x256xf32>
    %19 = arith.addf %16, %18 : vector<256x256xf32>
    %cst_18 = arith.constant 0.000000e+00 : f32
    %20 = vector.broadcast %cst_18 : f32 to vector<256x256xf32>
    %21 = arith.maximumf %19, %20 : vector<256x256xf32>
    %c0_19 = arith.constant 0 : index
    %c0_20 = arith.constant 0 : index
    %22 = vector.load %arg7[%c0_19, %c0_20] : memref<1024x256xbf16, #tpu.memory_space<vmem>>, vector<1024x256xbf16>
    %23 = arith.truncf %21 : vector<256x256xf32> to vector<256x256xbf16>
    %cst_21 = arith.constant dense<0.000000e+00> : vector<1024x256xf32>
    %24 = tpu.matmul %22, %23, %cst_21 {dimension_numbers = #tpu.dot_dimension_numbers<[1], [0], [0], [1], [0, 0, 1, 1], [], []>} : vector<1024x256xbf16>, vector<256x256xbf16>, vector<1024x256xf32> -> vector<1024x256xf32>
    %c0_22 = arith.constant 0 : index
    %c0_23 = arith.constant 0 : index
    %25 = vector.load %arg11[%c0_22, %c0_23] : memref<1024x1xf32, #tpu.memory_space<vmem>>, vector<1024x1xf32>
    %26 = vector.broadcast %25 : vector<1024x1xf32> to vector<1024x256xf32>
    %27 = arith.addf %24, %26 : vector<1024x256xf32>
    %cst_24 = arith.constant 0.000000e+00 : f32
    %28 = vector.broadcast %cst_24 : f32 to vector<1024x256xf32>
    %29 = arith.maximumf %27, %28 : vector<1024x256xf32>
    %30 = arith.truncf %29 : vector<1024x256xf32> to vector<1024x256xbf16>
    %c0_25 = arith.constant 0 : index
    %c0_26 = arith.constant 0 : index
    %c0_27 = arith.constant 0 : index
    %31 = vector.load %arg13[%c0_25, %c0_26, %c0_27] : memref<1x1024x256xbf16, #tpu.memory_space<vmem>>, vector<1x1024x256xbf16>
    %32 = vector.shape_cast %31 : vector<1x1024x256xbf16> to vector<1024x256xbf16>
    %33 = vector.shape_cast %30 : vector<1024x256xbf16> to vector<1x1024x256xbf16>
    tpu.vector_store %arg13[%c0_25, %c0_26, %c0_27], %33 {strides = array<i32>} : memref<1x1024x256xbf16, #tpu.memory_space<vmem>>, vector<1x1024x256xbf16>,
    %c0_28 = arith.constant 0 : index
    %c0_29 = arith.constant 0 : index
    %34 = vector.load %arg8[%c0_28, %c0_29] : memref<8x1024xbf16, #tpu.memory_space<vmem>>, vector<8x1024xbf16>
    %cst_30 = arith.constant dense<0.000000e+00> : vector<8x256xf32>
    %35 = tpu.matmul %34, %30, %cst_30 {dimension_numbers = #tpu.dot_dimension_numbers<[1], [0], [0], [1], [0, 0, 1, 1], [], []>} : vector<8x1024xbf16>, vector<1024x256xbf16>, vector<8x256xf32> -> vector<8x256xf32>
    %c0_31 = arith.constant 0 : index
    %c0_32 = arith.constant 0 : index
    %36 = vector.load %arg12[%c0_31, %c0_32] : memref<8x1xf32, #tpu.memory_space<vmem>>, vector<8x1xf32>
    %37 = vector.broadcast %36 : vector<8x1xf32> to vector<8x256xf32>
    %38 = arith.addf %35, %37 : vector<8x256xf32>
    %c0_33 = arith.constant 0 : index
    %c0_34 = arith.constant 0 : index
    %c0_35 = arith.constant 0 : index
    %39 = vector.load %arg14[%c0_33, %c0_34, %c0_35] : memref<1x8x256xf32, #tpu.memory_space<vmem>>, vector<1x8x256xf32>
    %40 = vector.shape_cast %39 : vector<1x8x256xf32> to vector<8x256xf32>
    %41 = vector.shape_cast %38 : vector<8x256xf32> to vector<1x8x256xf32>
    tpu.vector_store %arg14[%c0_33, %c0_34, %c0_35], %41 {strides = array<i32>} : memref<1x8x256xf32, #tpu.memory_space<vmem>>, vector<1x8x256xf32>,
    return
  }
  func.func @transform_0(%arg0: i32, %arg1: i32) -> (i32, i32, i32) {
    %c0_i32 = arith.constant 0 : i32
    %c0_i32_0 = arith.constant 0 : i32
    %c0_i32_1 = arith.constant 0 : i32
    return %arg0, %c0_i32, %c0_i32_0 : i32, i32, i32
  }
  func.func @transform_1(%arg0: i32, %arg1: i32) -> (i32, i32) {
    %c0_i32 = arith.constant 0 : i32
    %c0_i32_0 = arith.constant 0 : i32
    return %c0_i32, %arg1 : i32, i32
  }
  func.func @transform_2(%arg0: i32, %arg1: i32) -> (i32, i32, i32) {
    %c0_i32 = arith.constant 0 : i32
    %c0_i32_0 = arith.constant 0 : i32
    return %arg0, %c0_i32, %arg1 : i32, i32, i32
  }
  func.func @transform_3(%arg0: i32, %arg1: i32) -> (i32, i32) {
    %c0_i32 = arith.constant 0 : i32
    %c0_i32_0 = arith.constant 0 : i32
    %c0_i32_1 = arith.constant 0 : i32
    return %c0_i32, %c0_i32_0 : i32, i32
  }
  func.func @transform_4(%arg0: i32, %arg1: i32) -> (i32, i32) {
    %c0_i32 = arith.constant 0 : i32
    %c0_i32_0 = arith.constant 0 : i32
    %c0_i32_1 = arith.constant 0 : i32
    return %c0_i32, %c0_i32_0 : i32, i32
  }
  func.func @transform_5(%arg0: i32, %arg1: i32) -> (i32, i32) {
    %c0_i32 = arith.constant 0 : i32
    %c0_i32_0 = arith.constant 0 : i32
    %c0_i32_1 = arith.constant 0 : i32
    return %c0_i32, %c0_i32_0 : i32, i32
  }
  func.func @transform_6(%arg0: i32, %arg1: i32) -> (i32, i32) {
    %c0_i32 = arith.constant 0 : i32
    %c0_i32_0 = arith.constant 0 : i32
    %c0_i32_1 = arith.constant 0 : i32
    return %c0_i32, %c0_i32_0 : i32, i32
  }
  func.func @transform_7(%arg0: i32, %arg1: i32) -> (i32, i32) {
    %c0_i32 = arith.constant 0 : i32
    %c0_i32_0 = arith.constant 0 : i32
    %c0_i32_1 = arith.constant 0 : i32
    return %c0_i32, %c0_i32_0 : i32, i32
  }
  func.func @transform_8(%arg0: i32, %arg1: i32) -> (i32, i32) {
    %c0_i32 = arith.constant 0 : i32
    %c0_i32_0 = arith.constant 0 : i32
    %c0_i32_1 = arith.constant 0 : i32
    return %c0_i32, %c0_i32_0 : i32, i32
  }
  func.func @transform_9(%arg0: i32, %arg1: i32) -> (i32, i32) {
    %c0_i32 = arith.constant 0 : i32
    %c0_i32_0 = arith.constant 0 : i32
    %c0_i32_1 = arith.constant 0 : i32
    return %c0_i32, %c0_i32_0 : i32, i32
  }
  func.func @transform_10(%arg0: i32, %arg1: i32) -> (i32, i32) {
    %c0_i32 = arith.constant 0 : i32
    %c0_i32_0 = arith.constant 0 : i32
    %c0_i32_1 = arith.constant 0 : i32
    return %c0_i32, %c0_i32_0 : i32, i32
  }
  func.func @transform_11(%arg0: i32, %arg1: i32) -> (i32, i32, i32) {
    %c0_i32 = arith.constant 0 : i32
    %c0_i32_0 = arith.constant 0 : i32
    return %arg0, %c0_i32, %arg1 : i32, i32, i32
  }
  func.func @transform_12(%arg0: i32, %arg1: i32) -> (i32, i32, i32) {
    %c0_i32 = arith.constant 0 : i32
    %c0_i32_0 = arith.constant 0 : i32
    return %arg0, %c0_i32, %arg1 : i32, i32, i32
  }
}

</mosaic_0001>

<bundles_post_ra>
// kernel: decoder_forward.2
= control target key start
LH: loop header
LB: loop body
LE: loop exit
PB: predicated region body
PF: predicated region fallthrough
CT: control target
= control target key end

     0   :  { %s2839_s15 = smov 0   ;;  %s2841_s16 = smov 0   ;;  %s3528_s0 = inlined_call_operand.vmem [shape: bf16[2,512,64], index: 0, kind: input, shape index: {}]   ;;  %s3529_s1 = inlined_call_operand.vmem [shape: bf16[256,512], index: 1, kind: input, shape index: {}]   ;;  %s3530_s2 = inlined_call_operand.vmem [shape: f32[256,1], index: 2, kind: input, shape index: {}]   ;;  %s3531_s3 = inlined_call_operand.vmem [shape: bf16[256,256], index: 3, kind: input, shape index: {}]   ;;  %s3532_s4 = inlined_call_operand.vmem [shape: bf16[2,256,64], index: 4, kind: output, shape index: {}]  }
   0x1   :  { %s2843_s17 = smov 0  }
   0x2 LB: > { %s26_s18 = sadd.s32 1, %s2807_s16  ;;  %p2033_p0 = scmp.ge.s32.totalorder %s2811_s17, 1  ;;  %s2811_s17 = sphi %s2843_s17, %s14_s17   ;;  %s2807_s16 = sphi %s2841_s16, %s3534_s16   ;;  %s2803_s15 = sphi %s2839_s15, %s3533_s15  }
   0x3   : > { %p28_p1 = scmp.ge.s32.totalorder %s26_s18, 2  ;;  %p181_p2 = scmp.lt.s32.totalorder %s2811_s17, 3 }
   0x5   : > { %s3536_s18 = smov (%p28_p1, %s26_s18), 0  ;;  %p182_p3 = pnand %p2033_p0, %p181_p2 }
   0x6   : > { %p213_p4 = scmp.lt.s32.totalorder (!%p182_p3), %s2803_s15, 1  ;;  %v2631_v0 = vld [vmem:[%s3529_s1 + $0x104] ss:$16 sps:$4 sm:$0xff] (!%p182_p3)   ;;  %v2813_v1 = vmov (!%p182_p3), 0   ;;  %v2629_v19 = vld [vmem:[%s3529_s1 + $0x100] ss:$16 sps:$4 sm:$0xff] (!%p182_p3)  }
   0x7   : > { %185 = sbr.rel (%p182_p3) target bundleno = 801 (0x321), region = 36  ;;  %2611 = vset.pattern.permute.xlu0 (!%p182_p3), %v2813_v1  ;;  %2612 = vset.pattern.permute.xlu1 (!%p182_p3), %v2813_v1  ;;  %v2634_v20 = vld [vmem:[%s3529_s1 + $0x124] ss:$16 sps:$4 sm:$0xff] (!%p182_p3)   ;;  %v2668_v25 = vld [vmem:[%s3529_s1] ss:$16 sps:$4 sm:$0xff] (!%p182_p3)   ;;  %v375_v40 = vld [vmem:[%s3530_s2 + $0x88] sm:$0xff] (!%p182_p3) }
   0x8   : > { %1158 = vmatprep.mubr.bf16.mxu1 (!%p182_p3), %v2631_v0  ;;  %v2670_v26 = vld [vmem:[%s3529_s1 + $0x4] ss:$16 sps:$4 sm:$0xff] (!%p182_p3)   ;;  %v2636_v27 = vld [vmem:[%s3529_s1 + $0x120] ss:$16 sps:$4 sm:$0xff] (!%p182_p3)   ;;  %v359_v43 = vld [vmem:[%s3530_s2 + $0x8] sm:$0xff] (!%p182_p3)  ;;  %vm1913_vm0 = vcmask (!%p182_p3), 519168  }
   0x9   : > { %v2639_v28 = vld [vmem:[%s3529_s1 + $0x144] ss:$16 sps:$4 sm:$0xff] (!%p182_p3)   ;;  %1094 = vmatprep.mubr.bf16.mxu0 (!%p182_p3), %v2670_v26  ;;  %v2677_v33 = vld [vmem:[%s3529_s1 + $0x20] ss:$16 sps:$4 sm:$0xff] (!%p182_p3)   ;;  %v377_v50 = vld [vmem:[%s3530_s2 + $0x98] sm:$0xff] (!%p182_p3) }
   0xa   : > { %v2675_v31 = vld [vmem:[%s3529_s1 + $0x24] ss:$16 sps:$4 sm:$0xff] (!%p182_p3)   ;;  %v2641_v37 = vld [vmem:[%s3529_s1 + $0x140] ss:$16 sps:$4 sm:$0xff] (!%p182_p3)   ;;  %v361_v55 = vld [vmem:[%s3530_s2 + $0x18] sm:$0xff] (!%p182_p3) }
   0xb   : > { %v2681_v35 = vld [vmem:[%s3529_s1 + $0x44] ss:$16 sps:$4 sm:$0xff] (!%p182_p3)   ;;  %v2683_v46 = vld [vmem:[%s3529_s1 + $0x40] ss:$16 sps:$4 sm:$0xff] (!%p182_p3)   ;;  %v379_v61 = vld [vmem:[%s3530_s2 + $0xa8] sm:$0xff] (!%p182_p3) }
   0xc   : > { %v374_v36 = vld [vmem:[%s3530_s2 + $0x80] sm:$0xff] (!%p182_p3)  ;;  %v376_v44 = vld [vmem:[%s3530_s2 + $0x90] sm:$0xff] (!%p182_p3)  ;;  %v363_v0 = vld [vmem:[%s3530_s2 + $0x28] sm:$0xff] (!%p182_p3) }
   0xd   : > { %472 = vperm.xlu0 (!%p182_p3), %2611, %v374_v36   ;;  %v2644_v38 = vld [vmem:[%s3529_s1 + $0x164] ss:$16 sps:$4 sm:$0xff] (!%p182_p3)   ;;  %v2646_v49 = vld [vmem:[%s3529_s1 + $0x160] ss:$16 sps:$4 sm:$0xff] (!%p182_p3)   ;;  %v2684_v36 = vld [vmem:[%s3529_s1 + $0x4c] ss:$16 sps:$4 sm:$0xff] (!%p182_p3)  }
   0xe   : > { %s3538_s15 = smov (!%p213_p4, %s2803_s15), 1  ;;  %v358_v42 = vld [vmem:[%s3530_s2] sm:$0xff]  ;;  %v360_v51 = vld [vmem:[%s3530_s2 + $0x10] sm:$0xff] }
   0xf   : > { %s2200_s21 = sshll.u32 %s3538_s15, 8  ;;  %392 = vperm.xlu1 %2612, %v358_v42   ;;  %v2687_v48 = vld [vmem:[%s3529_s1 + $0x64] ss:$16 sps:$4 sm:$0xff]   ;;  %v2689_v58 = vld [vmem:[%s3529_s1 + $0x60] ss:$16 sps:$4 sm:$0xff]  }
  0x10   : > { %s2866_s24 = scalar_lea.vmem %s3528_s0, %s2200_s21  ;;  %v2649_v52 = vld [vmem:[%s3529_s1 + $0x184] ss:$16 sps:$4 sm:$0xff]   ;;  %v2651_v60 = vld [vmem:[%s3529_s1 + $0x180] ss:$16 sps:$4 sm:$0xff]   ;;  %v2698_v42 = vld [vmem:[%s3529_s1 + $0x88] ss:$16 sps:$4 sm:$0xff]  }
  0x11   : > { %v2613_v2 = vld [vmem:[%s2866_s24 + $0x40] sm:$0xff]   ;;  %v2615_v4 = vld [vmem:[%s2866_s24 + $0x48] sm:$0xff]   ;;  %v2617_v6 = vld [vmem:[%s2866_s24 + $0x50] sm:$0xff]   ;;  %477 = vperm.xlu0 %2611, %v375_v40  }
  0x12   : > { %v2614_v3 = vld [vmem:[%s2866_s24] sm:$0xff]   ;;  %2570 = vmatprep.subr.bf16.mxu1 %v2613_v2  ;;  %2234 = vmatprep.subr.bf16.mxu0 %v2613_v2  ;;  %v2616_v5 = vld [vmem:[%s2866_s24 + $0x8] sm:$0xff]   ;;  %v2618_v7 = vld [vmem:[%s2866_s24 + $0x10] sm:$0xff]  }
  0x13   : > { %2578 = vmatpush3.bf16.msra.mxu1 %v2614_v3  ;;  %2235 = vmatpush3.bf16.msra.mxu0 %v2614_v3  ;;  %v2619_v8 = vld [vmem:[%s2866_s24 + $0x58] sm:$0xff]   ;;  %v2621_v10 = vld [vmem:[%s2866_s24 + $0x60] sm:$0xff]   ;;  %v2623_v12 = vld [vmem:[%s2866_s24 + $0x68] sm:$0xff]  }
  0x14   : > { %2571 = vmatprep.subr.bf16.mxu1 %v2615_v4  ;;  %2236 = vmatprep.subr.bf16.mxu0 %v2615_v4  ;;  %v2620_v9 = vld [vmem:[%s2866_s24 + $0x18] sm:$0xff]   ;;  %v2622_v11 = vld [vmem:[%s2866_s24 + $0x20] sm:$0xff]   ;;  %v2624_v13 = vld [vmem:[%s2866_s24 + $0x28] sm:$0xff]  }
  0x15   : > { %v2625_v14 = vld [vmem:[%s2866_s24 + $0x70] sm:$0xff]   ;;  %v2627_v16 = vld [vmem:[%s2866_s24 + $0x78] sm:$0xff]   ;;  %v2632_v18 = vld [vmem:[%s2866_s24 + $0xc0] sm:$0xff]   ;;  %397 = vperm.xlu1 %2612, %v359_v43   ;;  %482 = vperm.xlu0 %2611, %v376_v44  }
  0x16   : > { %v2626_v15 = vld [vmem:[%s2866_s24 + $0x30] sm:$0xff]   ;;  %v2628_v17 = vld [vmem:[%s2866_s24 + $0x38] sm:$0xff]   ;;  %v2633_v21 = vld [vmem:[%s2866_s24 + $0x80] sm:$0xff]  }
  0x17   : > { %2579 = vmatpush3.bf16.msra.mxu1 %v2616_v5  ;;  %2237 = vmatpush3.bf16.msra.mxu0 %v2616_v5  ;;  %v2637_v22 = vld [vmem:[%s2866_s24 + $0xc8] sm:$0xff]   ;;  %v2642_v24 = vld [vmem:[%s2866_s24 + $0xd0] sm:$0xff]   ;;  %v2647_v30 = vld [vmem:[%s2866_s24 + $0xd8] sm:$0xff]  }
  0x18   : > { %2572 = vmatprep.subr.bf16.mxu1 %v2617_v6  ;;  %2238 = vmatprep.subr.bf16.mxu0 %v2617_v6  ;;  %v2638_v23 = vld [vmem:[%s2866_s24 + $0x88] sm:$0xff]   ;;  %v2643_v29 = vld [vmem:[%s2866_s24 + $0x90] sm:$0xff]   ;;  %v2648_v32 = vld [vmem:[%s2866_s24 + $0x98] sm:$0xff]  }
  0x19   : > { %v2652_v34 = vld [vmem:[%s2866_s24 + $0xe0] sm:$0xff]   ;;  %v2657_v41 = vld [vmem:[%s2866_s24 + $0xe8] sm:$0xff]   ;;  %v2662_v47 = vld [vmem:[%s2866_s24 + $0xf0] sm:$0xff]   ;;  %487 = vperm.xlu1 %2612, %v377_v50   ;;  %402 = vperm.xlu0 %2611, %v360_v51  }
  0x1a   : > { %v2653_v39 = vld [vmem:[%s2866_s24 + $0xa0] sm:$0xff]   ;;  %v2658_v45 = vld [vmem:[%s2866_s24 + $0xa8] sm:$0xff]   ;;  %v2663_v53 = vld [vmem:[%s2866_s24 + $0xb0] sm:$0xff]  }
  0x1b   : > { %2580 = vmatpush3.bf16.msra.mxu1 %v2618_v7  ;;  %2239 = vmatpush3.bf16.msra.mxu0 %v2618_v7  ;;  %v2667_v54 = vld [vmem:[%s2866_s24 + $0xf8] sm:$0xff]   ;;  %v378_v56 = vld [vmem:[%s3530_s2 + $0xa0] sm:$0xff]  ;;  %v380_v1 = vld [vmem:[%s3530_s2 + $0xb0] sm:$0xff] }
  0x1c   : > { %2573 = vmatprep.subr.bf16.mxu1 %v2619_v8  ;;  %2240 = vmatprep.subr.bf16.mxu0 %v2619_v8  ;;  %v2671_v57 = vld [vmem:[%s2866_s24 + $0xb8] sm:$0xff]   ;;  %v2693_v59 = vld [vmem:[%s3529_s1 + $0x84] ss:$16 sps:$4 sm:$0xff]   ;;  %v2695_v2 = vld [vmem:[%s3529_s1 + $0x80] ss:$16 sps:$4 sm:$0xff]   ;;  %s2201_s24 = sshll.u32 %s3538_s15, 7 }
  0x1d   : > { %407 = vperm.xlu1 %2612, %v361_v55   ;;  %492 = vperm.xlu0 %2611, %v378_v56   ;;  %v362_v62 = vld [vmem:[%s3530_s2 + $0x20] sm:$0xff]  ;;  %v381_v5 = vld [vmem:[%s3530_s2 + $0xb8] sm:$0xff]  ;;  %v364_v6 = vld [vmem:[%s3530_s2 + $0x30] sm:$0xff]  ;;  %s3453_s19 = scalar_lea.vmem %s3532_s4, %s2201_s24 }
  0x1e   : > { %v2654_v63 = vld [vmem:[%s3529_s1 + $0x1a4] ss:$16 sps:$4 sm:$0xff]   ;;  %v2656_v4 = vld [vmem:[%s3529_s1 + $0x1a0] ss:$16 sps:$4 sm:$0xff]   ;;  %v365_v8 = vld [vmem:[%s3530_s2 + $0x38] sm:$0xff] }
  0x1f   : > { %2581 = vmatpush3.bf16.msra.mxu1 %v2620_v9  ;;  %2241 = vmatpush3.bf16.msra.mxu0 %v2620_v9  ;;  %v2699_v3 = vld [vmem:[%s3529_s1 + $0xa4] ss:$16 sps:$4 sm:$0xff]   ;;  %v2713_v26 = vld [vmem:[%s3529_s1 + $0xe0] ss:$16 sps:$4 sm:$0xff]   ;;  %v2692_v40 = vld [vmem:[%s3529_s1 + $0x68] ss:$16 sps:$4 sm:$0xff]  }
  0x20   : > { %2574 = vmatprep.subr.bf16.mxu1 %v2621_v10  ;;  %2242 = vmatprep.subr.bf16.mxu0 %v2621_v10  ;;  %v2659_v7 = vld [vmem:[%s3529_s1 + $0x1c4] ss:$16 sps:$4 sm:$0xff]   ;;  %v2701_v10 = vld [vmem:[%s3529_s1 + $0xa0] ss:$16 sps:$4 sm:$0xff]   ;;  %v2702_v43 = vld [vmem:[%s3529_s1 + $0xac] ss:$16 sps:$4 sm:$0xff]  }
  0x21   : > { %497 = vperm.xlu1 %2612, %v379_v61   ;;  %412 = vperm.xlu0 %2611, %v362_v62   ;;  %v382_v9 = vld [vmem:[%s3530_s2 + $0xc0] sm:$0xff]  ;;  %v2704_v44 = vld [vmem:[%s3529_s1 + $0xa8] ss:$16 sps:$4 sm:$0xff]   ;;  %v2720_v51 = vld [vmem:[%s3529_s1 + $0x12c] ss:$16 sps:$4 sm:$0xff]  }
  0x22   : > { %v2719_v50 = vld [vmem:[%s3529_s1 + $0x108] ss:$16 sps:$4 sm:$0xff]   ;;  %v2726_v55 = vld [vmem:[%s3529_s1 + $0x16c] ss:$16 sps:$4 sm:$0xff]  }
  0x23   : > { %2582 = vmatpush3.bf16.msra.mxu1 %v2622_v11  ;;  %2243 = vmatpush3.bf16.msra.mxu0 %v2622_v11  ;;  %v2705_v11 = vld [vmem:[%s3529_s1 + $0xc4] ss:$16 sps:$4 sm:$0xff]   ;;  %v2728_v56 = vld [vmem:[%s3529_s1 + $0x168] ss:$16 sps:$4 sm:$0xff]   ;;  %v2735_v61 = vld [vmem:[%s3529_s1 + $0x1cc] ss:$16 sps:$4 sm:$0xff]  }
  0x24   : > { %2575 = vmatprep.subr.bf16.mxu1 %v2623_v12  ;;  %2244 = vmatprep.subr.bf16.mxu0 %v2623_v12  ;;  %v2661_v12 = vld [vmem:[%s3529_s1 + $0x1c0] ss:$16 sps:$4 sm:$0xff]   ;;  %v2737_v62 = vld [vmem:[%s3529_s1 + $0x1c8] ss:$16 sps:$4 sm:$0xff]  }
  0x25   : > { %417 = vperm.xlu1 %2612, %v363_v0   ;;  %502 = vperm.xlu0 %2611, %v380_v1   ;;  %v2740_v0 = vld [vmem:[%s3529_s1 + $0x1e8] ss:$16 sps:$4 sm:$0xff]  }
  0x27   : > { %2583 = vmatpush3.bf16.msra.mxu1 %v2624_v13  ;;  %2245 = vmatpush3.bf16.msra.mxu0 %v2624_v13  ;;  %v383_v13 = vld [vmem:[%s3530_s2 + $0xc8] sm:$0xff] }
  0x28   : > { %2576 = vmatprep.subr.bf16.mxu1 %v2625_v14  ;;  %2246 = vmatprep.subr.bf16.mxu0 %v2625_v14  ;;  %v2664_v14 = vld [vmem:[%s3529_s1 + $0x1e4] ss:$16 sps:$4 sm:$0xff]  }
  0x29   : > { %507 = vperm.xlu1 %2612, %v381_v5   ;;  %422 = vperm.xlu0 %2611, %v364_v6  }
  0x2b   : > { %2584 = vmatpush3.bf16.msra.mxu1 %v2626_v15  ;;  %2247 = vmatpush3.bf16.msra.mxu0 %v2626_v15  ;;  %v366_v15 = vld [vmem:[%s3530_s2 + $0x40] sm:$0xff] }
  0x2c   : > { %2577 = vmatprep.subr.bf16.mxu1 %v2627_v16  ;;  %2248 = vmatprep.subr.bf16.mxu0 %v2627_v16  ;;  %v367_v16 = vld [vmem:[%s3530_s2 + $0x48] sm:$0xff] }
  0x2d   : > { %427 = vperm.xlu1 %2612, %v365_v8   ;;  %512 = vperm.xlu0 %2611, %v382_v9  }
  0x2f   : > { %2585 = vmatpush3.bf16.msra.mxu1 %v2628_v17  ;;  %2249 = vmatpush3.bf16.msra.mxu0 %v2628_v17  ;;  %v2707_v17 = vld [vmem:[%s3529_s1 + $0xc0] ss:$16 sps:$4 sm:$0xff]  }
  0x30   : > { %2346 = vmatprep.subr.bf16.mxu1 %v2632_v18  ;;  %v384_v18 = vld [vmem:[%s3530_s2 + $0xd0] sm:$0xff] }
  0x31   : > { %517 = vperm.xlu1 %2612, %v383_v13   ;;  %432 = vperm.xlu0 %2611, %v366_v15  }
  0x32   : > { %1159 = vmatmul.mubr.bf16.vlgmr.msra.gmra.mrb[0].mxu1 %v2629_v19  ;;  %1095 = vmatmul.mubr.bf16.vlgmr.msra.gmra.mrb[0].mxu0 %v2668_v25  ;;  %v2711_v19 = vld [vmem:[%s3529_s1 + $0xe4] ss:$16 sps:$4 sm:$0xff]  }
  0x33   : > { %2347 = vmatpush3.bf16.msra.mxu1 %v2633_v21  ;;  %1166 = vmatprep.mubr.bf16.mxu1 %v2634_v20  ;;  %v2666_v20 = vld [vmem:[%s3529_s1 + $0x1e0] ss:$16 sps:$4 sm:$0xff]   ;;  %v385_v21 = vld [vmem:[%s3530_s2 + $0xd8] sm:$0xff] }
  0x34   : > { %2348 = vmatprep.subr.bf16.mxu1 %v2637_v22  ;;  %1102 = vmatprep.mubr.bf16.mxu0 %v2675_v31  ;;  %v368_v22 = vld [vmem:[%s3530_s2 + $0x50] sm:$0xff]  ;;  %v386_v25 = vld [vmem:[%s3530_s2 + $0xe0] sm:$0xff]  ;;  %v371_v31 = vld [vmem:[%s3530_s2 + $0x68] sm:$0xff] }
  0x35   : > { %437 = vperm.xlu1 %2612, %v367_v16   ;;  %522 = vperm.xlu0 %2611, %v384_v18  }
  0x37   : > { %2349 = vmatpush3.bf16.msra.mxu1 %v2638_v23  ;;  %v2674_v23 = vld [vmem:[%s3529_s1 + $0xc] ss:$16 sps:$4 sm:$0xff]  }
  0x38   : > { %2350 = vmatprep.subr.bf16.mxu1 %v2642_v24  ;;  %v369_v24 = vld [vmem:[%s3530_s2 + $0x58] sm:$0xff] }
  0x39   : > { %527 = vperm.xlu1 %2612, %v385_v21   ;;  %442 = vperm.xlu0 %2611, %v368_v22  }
  0x3a   : > { %1167 = vmatmul.mubr.bf16.gmra.mrb[4].mxu1 %v2636_v27  ;;  %1103 = vmatmul.mubr.bf16.gmra.mrb[4].mxu0 %v2677_v33  ;;  %v2672_v27 = vld [vmem:[%s3529_s1 + $0x8] ss:$16 sps:$4 sm:$0xff]  }
  0x3b   : > { %1174 = vmatprep.mubr.bf16.mxu1 %v2639_v28  ;;  %2351 = vmatpush3.bf16.msra.mxu1 %v2643_v29  ;;  %v387_v28 = vld [vmem:[%s3530_s2 + $0xe8] sm:$0xff]  ;;  %v370_v29 = vld [vmem:[%s3530_s2 + $0x60] sm:$0xff] }
  0x3c   : > { %2352 = vmatprep.subr.bf16.mxu1 %v2647_v30  ;;  %1110 = vmatprep.mubr.bf16.mxu0 %v2681_v35  ;;  %v2678_v30 = vld [vmem:[%s3529_s1 + $0x2c] ss:$16 sps:$4 sm:$0xff]   ;;  %v2680_v33 = vld [vmem:[%s3529_s1 + $0x28] ss:$16 sps:$4 sm:$0xff]   ;;  %v372_v35 = vld [vmem:[%s3530_s2 + $0x70] sm:$0xff] }
  0x3d   : > { %447 = vperm.xlu1 %2612, %v369_v24   ;;  %532 = vperm.xlu0 %2611, %v386_v25  }
  0x3f   : > { %2353 = vmatpush3.bf16.msra.mxu1 %v2648_v32  ;;  %v388_v32 = vld [vmem:[%s3530_s2 + $0xf0] sm:$0xff] }
  0x40   : > { %2354 = vmatprep.subr.bf16.mxu1 %v2652_v34  ;;  %v389_v34 = vld [vmem:[%s3530_s2 + $0xf8] sm:$0xff] }
  0x41   : > { %537 = vperm.xlu1 %2612, %v387_v28   ;;  %452 = vperm.xlu0 %2611, %v370_v29  }
  0x42   : > { %1175 = vmatmul.mubr.bf16.gmra.mrb[8].mxu1 %v2641_v37  ;;  %1111 = vmatmul.mubr.bf16.gmra.mrb[8].mxu0 %v2683_v46  ;;  %v373_v37 = vld [vmem:[%s3530_s2 + $0x78] sm:$0xff] }
  0x43   : > { %1182 = vmatprep.mubr.bf16.mxu1 %v2644_v38  ;;  %2355 = vmatpush3.bf16.msra.mxu1 %v2653_v39  ;;  %v2686_v38 = vld [vmem:[%s3529_s1 + $0x48] ss:$16 sps:$4 sm:$0xff]   ;;  %v2690_v39 = vld [vmem:[%s3529_s1 + $0x6c] ss:$16 sps:$4 sm:$0xff]  }
  0x44   : > { %2356 = vmatprep.subr.bf16.mxu1 %v2657_v41  ;;  %1118 = vmatprep.mubr.bf16.mxu0 %v2687_v48  ;;  %v2696_v41 = vld [vmem:[%s3529_s1 + $0x8c] ss:$16 sps:$4 sm:$0xff]   ;;  %v2710_v46 = vld [vmem:[%s3529_s1 + $0xc8] ss:$16 sps:$4 sm:$0xff]  }
  0x45   : > { %457 = vperm.xlu1 %2612, %v371_v31   ;;  %542 = vperm.xlu0 %2611, %v388_v32   ;;  %v2716_v48 = vld [vmem:[%s3529_s1 + $0xe8] ss:$16 sps:$4 sm:$0xff]  }
  0x47   : > { %2357 = vmatpush3.bf16.msra.mxu1 %v2658_v45  ;;  %v2708_v45 = vld [vmem:[%s3529_s1 + $0xcc] ss:$16 sps:$4 sm:$0xff]  }
  0x48   : > { %2358 = vmatprep.subr.bf16.mxu1 %v2662_v47  ;;  %v2714_v47 = vld [vmem:[%s3529_s1 + $0xec] ss:$16 sps:$4 sm:$0xff]  }
  0x49   : > { %547 = vperm.xlu1 %2612, %v389_v34   ;;  %462 = vperm.xlu0 %2611, %v372_v35  }
  0x4a   : > { %1183 = vmatmul.mubr.bf16.gmra.mrb[12].mxu1 %v2646_v49  ;;  %1119 = vmatmul.mubr.bf16.gmra.mrb[12].mxu0 %v2689_v58  ;;  %v2717_v49 = vld [vmem:[%s3529_s1 + $0x10c] ss:$16 sps:$4 sm:$0xff]   ;;  %v2731_v58 = vld [vmem:[%s3529_s1 + $0x188] ss:$16 sps:$4 sm:$0xff]  }
  0x4b   : > { %1190 = vmatprep.mubr.bf16.mxu1 %v2649_v52  ;;  %2359 = vmatpush3.bf16.msra.mxu1 %v2663_v53  ;;  %v2722_v52 = vld [vmem:[%s3529_s1 + $0x128] ss:$16 sps:$4 sm:$0xff]   ;;  %v2723_v53 = vld [vmem:[%s3529_s1 + $0x14c] ss:$16 sps:$4 sm:$0xff]  }
  0x4c   : > { %2360 = vmatprep.subr.bf16.mxu1 %v2667_v54  ;;  %1126 = vmatprep.mubr.bf16.mxu0 %v2693_v59  ;;  %v2725_v54 = vld [vmem:[%s3529_s1 + $0x148] ss:$16 sps:$4 sm:$0xff]   ;;  %v2732_v59 = vld [vmem:[%s3529_s1 + $0x1ac] ss:$16 sps:$4 sm:$0xff]  }
  0x4d   : > { %467 = vperm.xlu1 %2612, %v373_v37  }
  0x4f   : > { %2361 = vmatpush3.bf16.msra.mxu1 %v2671_v57  ;;  %v2729_v57 = vld [vmem:[%s3529_s1 + $0x18c] ss:$16 sps:$4 sm:$0xff]  }
  0x52   : > { %1191 = vmatmul.mubr.bf16.gmra.mrb[16].mxu1 %v2651_v60  ;;  %1127 = vmatmul.mubr.bf16.gmra.mrb[16].mxu0 %v2695_v2  ;;  %v2734_v60 = vld [vmem:[%s3529_s1 + $0x1a8] ss:$16 sps:$4 sm:$0xff]  }
  0x53   : > { %1198 = vmatprep.mubr.bf16.mxu1 %v2654_v63  ;;  %1134 = vmatprep.mubr.bf16.mxu0 %v2699_v3  ;;  %v2738_v63 = vld [vmem:[%s3529_s1 + $0x1ec] ss:$16 sps:$4 sm:$0xff]  }
  0x5a   : > { %1199 = vmatmul.mubr.bf16.gmra.mrb[20].mxu1 %v2656_v4  ;;  %1135 = vmatmul.mubr.bf16.gmra.mrb[20].mxu0 %v2701_v10 }
  0x5b   : > { %1206 = vmatprep.mubr.bf16.mxu1 %v2659_v7  ;;  %1142 = vmatprep.mubr.bf16.mxu0 %v2705_v11 }
  0x62   : > { %1207 = vmatmul.mubr.bf16.gmra.mrb[24].mxu1 %v2661_v12  ;;  %1143 = vmatmul.mubr.bf16.gmra.mrb[24].mxu0 %v2707_v17 }
  0x63   : > { %1214 = vmatprep.mubr.bf16.mxu1 %v2664_v14  ;;  %1150 = vmatprep.mubr.bf16.mxu0 %v2711_v19 }
  0x6a   : > { %1215 = vmatmul.mubr.bf16.gmra.mrb[28].mxu1 %v2666_v20  ;;  %1151 = vmatmul.mubr.bf16.gmra.mrb[28].mxu0 %v2713_v26 }
  0x6b   : > { %1255 = vmatprep.mubr.bf16.mxu1 %v2674_v23 }
  0x72   : > { %1256 = vmatmul.mubr.bf16.vlgmr.msra.gmra.mrb[32].mxu1 %v2672_v27 }
  0x73   : > { %1263 = vmatprep.mubr.bf16.mxu1 %v2678_v30 }
  0x7a   : > { %1264 = vmatmul.mubr.bf16.gmra.mrb[36].mxu1 %v2680_v33 }
  0x7b   : > { %1271 = vmatprep.mubr.bf16.mxu1 %v2684_v36 }
  0x82   : > { %1272 = vmatmul.mubr.bf16.gmra.mrb[40].mxu1 %v2686_v38 }
  0x83   : > { %1279 = vmatprep.mubr.bf16.mxu1 %v2690_v39 }
  0x8a   : > { %1280 = vmatmul.mubr.bf16.gmra.mrb[44].mxu1 %v2692_v40 }
  0x8b   : > { %1287 = vmatprep.mubr.bf16.mxu1 %v2696_v41 }
  0x92   : > { %1288 = vmatmul.mubr.bf16.gmra.mrb[48].mxu1 %v2698_v42 }
  0x93   : > { %1295 = vmatprep.mubr.bf16.mxu1 %v2702_v43 }
  0x9a   : > { %1296 = vmatmul.mubr.bf16.gmra.mrb[52].mxu1 %v2704_v44  ;;  %v3213_v44 = vpop.permute.xlu0 %472 }
  0x9b   : > { %1303 = vmatprep.mubr.bf16.mxu1 %v2708_v45 }
  0xa2   : > { %1304 = vmatmul.mubr.bf16.gmra.mrb[56].mxu1 %v2710_v46  ;;  %v393_v46 = vpop.permute.xlu1 %392 }
  0xa3   : > { %1311 = vmatprep.mubr.bf16.mxu1 %v2714_v47 }
  0xaa   : > { %1312 = vmatmul.mubr.bf16.gmra.mrb[60].mxu1 %v2716_v48 }
  0xab   : > { %1319 = vmatprep.mubr.bf16.mxu1 %v2717_v49 }
  0xb2   : > { %1320 = vmatmul.mubr.bf16.gmra.mrb[64].mxu1 %v2719_v50 }
  0xb3   : > { %1327 = vmatprep.mubr.bf16.mxu1 %v2720_v51 }
  0xba   : > { %1328 = vmatmul.mubr.bf16.gmra.mrb[68].mxu1 %v2722_v52 }
  0xbb   : > { %1335 = vmatprep.mubr.bf16.mxu1 %v2723_v53 }
  0xc2   : > { %1336 = vmatmul.mubr.bf16.gmra.mrb[72].mxu1 %v2725_v54 }
  0xc3   : > { %1343 = vmatprep.mubr.bf16.mxu1 %v2726_v55 }
  0xca   : > { %1344 = vmatmul.mubr.bf16.gmra.mrb[76].mxu1 %v2728_v56  ;;  %v3221_v56 = vpop.permute.xlu0 %477 }
  0xcb   : > { %1351 = vmatprep.mubr.bf16.mxu1 %v2729_v57 }
  0xd2   : > { %1352 = vmatmul.mubr.bf16.gmra.mrb[80].mxu1 %v2731_v58  ;;  %v398_v58 = vpop.permute.xlu1 %397 }
  0xd3   : > { %1359 = vmatprep.mubr.bf16.mxu1 %v2732_v59 }
  0xda   : > { %1360 = vmatmul.mubr.bf16.gmra.mrb[84].mxu1 %v2734_v60 }
  0xdb   : > { %1367 = vmatprep.mubr.bf16.mxu1 %v2735_v61 }
  0xe2   : > { %1368 = vmatmul.mubr.bf16.gmra.mrb[88].mxu1 %v2737_v62 }
  0xe3   : > { %1375 = vmatprep.mubr.bf16.mxu1 %v2738_v63 }
  0xea   : > { %1376 = vmatmul.mubr.bf16.gmra.mrb[92].mxu1 %v2740_v0 }
 0x105   : > { %v2298_v1 = vpop.f32.mrb[0].mxu1  ;;  %v2250_v7 = vpop.f32.mrb[0].mxu0 }
 0x106   : > { %v2299_v2 = vpop.f32.mrb[1].mxu1  ;;  %v2251_v8 = vpop.f32.mrb[1].mxu0 }
 0x107   : > { %v3185_v3 = vadd.f32 %v2299_v2, %v2298_v1  ;;  %v2301_v4 = vpop.f32.mrb[2].mxu1  ;;  %v3189_v9 = vadd.f32 %v2251_v8, %v2250_v7  ;;  %v2253_v10 = vpop.f32.mrb[2].mxu0 }
 0x108   : > { %v2302_v5 = vpop.f32.mrb[3].mxu1  ;;  %v2254_v12 = vpop.f32.mrb[3].mxu0 }
 0x109   : > { %v3187_v6 = vadd.f32 %v2302_v5, %v2301_v4  ;;  %v3191_v14 = vadd.f32 %v2254_v12, %v2253_v10  ;;  %v3227_v1 = vpop.permute.xlu0 %482  ;;  %v3233_v8 = vpop.permute.xlu1 %487 }
 0x10d   : > { %v2304_v11 = vpop.f32.mrb[4].mxu1  ;;  %v2256_v19 = vpop.f32.mrb[4].mxu0 }
 0x10e   : > { %v2305_v13 = vpop.f32.mrb[5].mxu1  ;;  %v2257_v20 = vpop.f32.mrb[5].mxu0 }
 0x10f   : > { %v3193_v15 = vadd.f32 %v2305_v13, %v2304_v11  ;;  %v2307_v16 = vpop.f32.mrb[6].mxu1  ;;  %v3197_v21 = vadd.f32 %v2257_v20, %v2256_v19  ;;  %v2259_v22 = vpop.f32.mrb[6].mxu0 }
 0x110   : > { %v2308_v17 = vpop.f32.mrb[7].mxu1  ;;  %v2260_v24 = vpop.f32.mrb[7].mxu0 }
 0x111   : > { %v3195_v18 = vadd.f32 %v2308_v17, %v2307_v16  ;;  %v3199_v26 = vadd.f32 %v2260_v24, %v2259_v22  ;;  %v403_v16 = vpop.permute.xlu0 %402 }
 0x115   : > { %v2310_v23 = vpop.f32.mrb[8].mxu1  ;;  %v2262_v31 = vpop.f32.mrb[8].mxu0 }
 0x116   : > { %v2311_v25 = vpop.f32.mrb[9].mxu1  ;;  %v2263_v32 = vpop.f32.mrb[9].mxu0 }
 0x117   : > { %v3201_v27 = vadd.f32 %v2311_v25, %v2310_v23  ;;  %v2313_v28 = vpop.f32.mrb[10].mxu1  ;;  %v3205_v33 = vadd.f32 %v2263_v32, %v2262_v31  ;;  %v2265_v34 = vpop.f32.mrb[10].mxu0 }
 0x118   : > { %v2314_v29 = vpop.f32.mrb[11].mxu1  ;;  %v2266_v36 = vpop.f32.mrb[11].mxu0 }
 0x119   : > { %v3203_v30 = vadd.f32 %v2314_v29, %v2313_v28  ;;  %v3207_v38 = vadd.f32 %v2266_v36, %v2265_v34  ;;  %v408_v23 = vpop.permute.xlu1 %407  ;;  %v3245_v34 = vpop.permute.xlu0 %492 }
 0x11d   : > { %v2316_v35 = vpop.f32.mrb[12].mxu1  ;;  %v2268_v43 = vpop.f32.mrb[12].mxu0 }
 0x11e   : > { %v2317_v37 = vpop.f32.mrb[13].mxu1  ;;  %v2269_v45 = vpop.f32.mrb[13].mxu0 }
 0x11f   : > { %v3209_v39 = vadd.f32 %v2317_v37, %v2316_v35  ;;  %v2319_v40 = vpop.f32.mrb[14].mxu1  ;;  %v3215_v47 = vadd.f32 %v2269_v45, %v2268_v43  ;;  %v2271_v48 = vpop.f32.mrb[14].mxu0 }
 0x120   : > { %v2320_v41 = vpop.f32.mrb[15].mxu1  ;;  %v2272_v50 = vpop.f32.mrb[15].mxu0 }
 0x121   : > { %v3211_v42 = vadd.f32 %v2320_v41, %v2319_v40  ;;  %v3217_v52 = vadd.f32 %v2272_v50, %v2271_v48  ;;  %v3247_v37 = vpop.permute.xlu1 %497 }
 0x125   : > { %v2322_v49 = vpop.f32.mrb[16].mxu1  ;;  %v2274_v59 = vpop.f32.mrb[16].mxu0 }
 0x126   : > { %v2323_v51 = vpop.f32.mrb[17].mxu1  ;;  %v2275_v60 = vpop.f32.mrb[17].mxu0 }
 0x127   : > { %v3219_v53 = vadd.f32 %v2323_v51, %v2322_v49  ;;  %v2325_v54 = vpop.f32.mrb[18].mxu1  ;;  %v3225_v61 = vadd.f32 %v2275_v60, %v2274_v59  ;;  %v2277_v62 = vpop.f32.mrb[18].mxu0 }
 0x128   : > { %v2326_v55 = vpop.f32.mrb[19].mxu1  ;;  %v2278_v0 = vpop.f32.mrb[19].mxu0 }
 0x129   : > { %v3223_v57 = vadd.f32 %v2326_v55, %v2325_v54  ;;  %v3229_v4 = vadd.f32 %v2278_v0, %v2277_v62  ;;  %v413_v54 = vpop.permute.xlu0 %412  ;;  %v418_v60 = vpop.permute.xlu1 %417 }
 0x12d   : > { %v2328_v63 = vpop.f32.mrb[20].mxu1  ;;  %v2280_v12 = vpop.f32.mrb[20].mxu0 }
 0x12e   : > { %v2329_v2 = vpop.f32.mrb[21].mxu1  ;;  %v2281_v13 = vpop.f32.mrb[21].mxu0 }
 0x12f   : > { %v3231_v5 = vadd.f32 %v2329_v2, %v2328_v63  ;;  %v2331_v7 = vpop.f32.mrb[22].mxu1  ;;  %v3237_v17 = vadd.f32 %v2281_v13, %v2280_v12  ;;  %v2283_v19 = vpop.f32.mrb[22].mxu0 }
 0x130   : > { %v2332_v10 = vpop.f32.mrb[23].mxu1  ;;  %v2284_v22 = vpop.f32.mrb[23].mxu0 }
 0x131   : > { %v3235_v11 = vadd.f32 %v2332_v10, %v2331_v7  ;;  %v3239_v25 = vadd.f32 %v2284_v22, %v2283_v19  ;;  %v1097_v7 = vadd.f32 %v3189_v9, %v393_v46  ;;  %v3260_v13 = vpop.permute.xlu0 %502  ;;  %v1100_v22 = vadd.f32 %v3191_v14, %v398_v58  ;;  %v2743_v9 = vld [vmem:[%s3531_s3 + $0x4] ss:$8 sps:$4 sm:$0xff]  }
 0x132   : > { %1656 = vmatprep.mubr.bf16.mxu0 %v2743_v9 }
 0x135   : > { %v2334_v20 = vpop.f32.mrb[24].mxu1  ;;  %v2286_v35 = vpop.f32.mrb[24].mxu0 }
 0x136   : > { %v2335_v24 = vpop.f32.mrb[25].mxu1  ;;  %v2287_v36 = vpop.f32.mrb[25].mxu0 }
 0x137   : > { %v3241_v28 = vadd.f32 %v2335_v24, %v2334_v20  ;;  %v2337_v29 = vpop.f32.mrb[26].mxu1  ;;  %v3249_v40 = vadd.f32 %v2287_v36, %v2286_v35  ;;  %v2289_v41 = vpop.f32.mrb[26].mxu0 }
 0x138   : > { %v2338_v31 = vpop.f32.mrb[27].mxu1  ;;  %v2290_v45 = vpop.f32.mrb[27].mxu0 }
 0x139   : > { %v3243_v32 = vadd.f32 %v2338_v31, %v2337_v29  ;;  %v3251_v49 = vadd.f32 %v2290_v45, %v2289_v41  ;;  %v3265_v31 = vpop.permute.xlu1 %507 }
 0x13d   : > { %v2340_v43 = vpop.f32.mrb[28].mxu1  ;;  %v2292_v62 = vpop.f32.mrb[28].mxu0 }
 0x13e   : > { %v2341_v48 = vpop.f32.mrb[29].mxu1  ;;  %v2293_v63 = vpop.f32.mrb[29].mxu0 }
 0x13f   : > { %v3253_v50 = vadd.f32 %v2341_v48, %v2340_v43  ;;  %v2343_v51 = vpop.f32.mrb[30].mxu1  ;;  %v3257_v0 = vadd.f32 %v2293_v63, %v2292_v62  ;;  %v2295_v2 = vpop.f32.mrb[30].mxu0  ;;  %v1108_v63 = vadd.f32 %v3199_v26, %v408_v23  ;;  %v1116_v26 = vadd.f32 %v3207_v38, %v418_v60 }
 0x140   : > { %v2344_v55 = vpop.f32.mrb[31].mxu1  ;;  %v2296_v12 = vpop.f32.mrb[31].mxu0 }
 0x141   : > { %v3255_v59 = vadd.f32 %v2344_v55, %v2343_v51  ;;  %v3262_v20 = vadd.f32 %v2296_v12, %v2295_v2  ;;  %v423_v43 = vpop.permute.xlu0 %422  ;;  %v1105_v51 = vadd.f32 %v3197_v21, %v403_v16  ;;  %v428_v14 = vpop.permute.xlu1 %427  ;;  %v1113_v21 = vadd.f32 %v3205_v33, %v413_v54 }
 0x142   : > { %v1124_v38 = vadd.f32 %v3217_v52, %v428_v14 }
 0x145   : > { %v2362_v10 = vpop.f32.mrb[32].mxu1 }
 0x146   : > { %v2363_v19 = vpop.f32.mrb[33].mxu1 }
 0x147   : > { %v2364_v24 = vadd.f32 %v2363_v19, %v2362_v10  ;;  %v2365_v29 = vpop.f32.mrb[34].mxu1 }
 0x148   : > { %v2366_v35 = vpop.f32.mrb[35].mxu1 }
 0x149   : > { %v1258_v36 = vadd.f32 %v2364_v24, %v1097_v7  ;;  %v2367_v41 = vadd.f32 %v2366_v35, %v2365_v29  ;;  %v3274_v24 = vpop.permute.xlu0 %512  ;;  %v3276_v29 = vpop.permute.xlu1 %517 }
 0x14b   : > { %v1261_v46 = vadd.f32 %v2367_v41, %v1100_v22  ;;  %v1384_v45 = vmax.f32 %v1258_v36, 0.0 }
 0x14d   : > { %v1385_v48 = vmax.f32 %v1261_v46, 0.0  ;;  %v2368_v55 = vpop.f32.mrb[36].mxu1 }
 0x14e   : > { %v2369_v58 = vpop.f32.mrb[37].mxu1 }
 0x14f   : > { %v3271_v62 = vpack.c.bf16 %v1385_v48, %v1384_v45  ;;  %v2370_v2 = vadd.f32 %v2369_v58, %v2368_v55  ;;  %v2371_v7 = vpop.f32.mrb[38].mxu1  ;;  %v433_v45 = vpop.permute.xlu0 %432 }
 0x150   : > { %v2372_v10 = vpop.f32.mrb[39].mxu1  ;;  %v438_v58 = vpop.permute.xlu1 %437 }
 0x151   : > { %v1266_v12 = vadd.f32 %v2370_v2, %v1105_v51  ;;  %v2373_v19 = vadd.f32 %v2372_v10, %v2371_v7  ;;  %v1121_v10 = vadd.f32 %v3215_v47, %v423_v43  ;;  %v1129_v47 = vadd.f32 %v3225_v61, %v433_v45 }
 0x152   : > { %v1132_v52 = vadd.f32 %v3229_v4, %v438_v58 }
 0x153   : > { %v1269_v22 = vadd.f32 %v2373_v19, %v1108_v63  ;;  %v1386_v35 = vmax.f32 %v1266_v12, 0.0  ;;  %v3283_v33 = vpop.permute.xlu0 %522 }
 0x155   : > { %v1387_v36 = vmax.f32 %v1269_v22, 0.0  ;;  %v2374_v16 = vpop.f32.mrb[40].mxu1 }
 0x156   : > { %v2375_v41 = vpop.f32.mrb[41].mxu1 }
 0x157   : > { %v3279_v9 = vpack.c.bf16 %v1387_v36, %v1386_v35  ;;  %v2376_v23 = vadd.f32 %v2375_v41, %v2374_v16  ;;  %v2377_v46 = vpop.f32.mrb[42].mxu1  ;;  %v3288_v35 = vpop.permute.xlu1 %527 }
 0x158   : > { %v2378_v48 = vpop.f32.mrb[43].mxu1 }
 0x159   : > { %v1274_v51 = vadd.f32 %v2376_v23, %v1113_v21  ;;  %v2379_v55 = vadd.f32 %v2378_v48, %v2377_v46 }
 0x15b   : > { %v1277_v63 = vadd.f32 %v2379_v55, %v1116_v26  ;;  %v1388_v2 = vmax.f32 %v1274_v51, 0.0  ;;  %v443_v26 = vpop.permute.xlu0 %442  ;;  %v448_v48 = vpop.permute.xlu1 %447 }
 0x15c   : > { %v1137_v61 = vadd.f32 %v3237_v17, %v443_v26  ;;  %v1140_v4 = vadd.f32 %v3239_v25, %v448_v48 }
 0x15d   : > { %v1389_v7 = vmax.f32 %v1277_v63, 0.0  ;;  %v2380_v12 = vpop.f32.mrb[44].mxu1 }
 0x15e   : > { %v2381_v54 = vpop.f32.mrb[45].mxu1 }
 0x15f   : > { %v3285_v19 = vpack.c.bf16 %v1389_v7, %v1388_v2  ;;  %v2382_v60 = vadd.f32 %v2381_v54, %v2380_v12  ;;  %v2383_v22 = vpop.f32.mrb[46].mxu1 }
 0x160   : > { %v2384_v36 = vpop.f32.mrb[47].mxu1 }
 0x161   : > { %v1282_v21 = vadd.f32 %v2382_v60, %v1121_v10  ;;  %v2385_v16 = vadd.f32 %v2384_v36, %v2383_v22  ;;  %v3294_v10 = vpop.permute.xlu0 %532 }
 0x163   : > { %v1285_v41 = vadd.f32 %v2385_v16, %v1124_v38  ;;  %v1390_v23 = vmax.f32 %v1282_v21, 0.0  ;;  %v3296_v38 = vpop.permute.xlu1 %537 }
 0x165   : > { %v1391_v46 = vmax.f32 %v1285_v41, 0.0  ;;  %v2386_v43 = vpop.f32.mrb[48].mxu1  ;;  %v453_v41 = vpop.permute.xlu0 %452 }
 0x166   : > { %v2387_v51 = vpop.f32.mrb[49].mxu1 }
 0x167   : > { %v3291_v55 = vpack.c.bf16 %v1391_v46, %v1390_v23  ;;  %v2388_v14 = vadd.f32 %v2387_v51, %v2386_v43  ;;  %v2389_v63 = vpop.f32.mrb[50].mxu1  ;;  %v458_v43 = vpop.permute.xlu1 %457 }
 0x168   : > { %v2390_v2 = vpop.f32.mrb[51].mxu1  ;;  %v1148_v25 = vadd.f32 %v3251_v49, %v458_v43 }
 0x169   : > { %v1290_v7 = vadd.f32 %v2388_v14, %v1129_v47  ;;  %v2391_v12 = vadd.f32 %v2390_v2, %v2389_v63  ;;  %v1145_v63 = vadd.f32 %v3249_v40, %v453_v41  ;;  %v3303_v17 = vpop.permute.xlu0 %542 }
 0x16b   : > { %v1293_v54 = vadd.f32 %v2391_v12, %v1132_v52  ;;  %v1392_v60 = vmax.f32 %v1290_v7, 0.0 }
 0x16d   : > { %v1393_v22 = vmax.f32 %v1293_v54, 0.0  ;;  %v2392_v45 = vpop.f32.mrb[52].mxu1  ;;  %v3308_v54 = vpop.permute.xlu1 %547 }
 0x16e   : > { %v2393_v36 = vpop.f32.mrb[53].mxu1 }
 0x16f   : > { %v3299_v21 = vpack.c.bf16 %v1393_v22, %v1392_v60  ;;  %v2394_v58 = vadd.f32 %v2393_v36, %v2392_v45  ;;  %v2395_v16 = vpop.f32.mrb[54].mxu1  ;;  %v463_v45 = vpop.permute.xlu0 %462 }
 0x170   : > { %v2396_v23 = vpop.f32.mrb[55].mxu1  ;;  %v1153_v41 = vadd.f32 %v3257_v0, %v463_v45  ;;  %v1164_v45 = vadd.f32 %v3187_v6, %v3221_v56 }
 0x171   : > { %v1298_v46 = vadd.f32 %v2394_v58, %v1137_v61  ;;  %v2397_v47 = vadd.f32 %v2396_v23, %v2395_v16 }
 0x173   : > { %v1301_v51 = vadd.f32 %v2397_v47, %v1140_v4  ;;  %v1394_v52 = vmax.f32 %v1298_v46, 0.0  ;;  %v468_v4 = vpop.permute.xlu1 %467 }
 0x174   : > { %v1156_v43 = vadd.f32 %v3262_v20, %v468_v4 }
 0x175   : > { %v1395_v14 = vmax.f32 %v1301_v51, 0.0  ;;  %v2398_v2 = vpop.f32.mrb[56].mxu1 }
 0x176   : > { %v2399_v26 = vpop.f32.mrb[57].mxu1 }
 0x177   : > { %v3305_v7 = vpack.c.bf16 %v1395_v14, %v1394_v52  ;;  %v2400_v48 = vadd.f32 %v2399_v26, %v2398_v2  ;;  %v2401_v12 = vpop.f32.mrb[58].mxu1 }
 0x178   : > { %v2402_v60 = vpop.f32.mrb[59].mxu1 }
 0x179   : > { %v1306_v22 = vadd.f32 %v2400_v48, %v1145_v63  ;;  %v2403_v61 = vadd.f32 %v2402_v60, %v2401_v12  ;;  %v1161_v12 = vadd.f32 %v3185_v3, %v3213_v44 }
 0x17b   : > { %v1309_v36 = vadd.f32 %v2403_v61, %v1148_v25  ;;  %v1396_v58 = vmax.f32 %v1306_v22, 0.0 }
 0x17d   : > { %v1397_v40 = vmax.f32 %v1309_v36, 0.0  ;;  %v2404_v16 = vpop.f32.mrb[60].mxu1 }
 0x17e   : > { %v2405_v23 = vpop.f32.mrb[61].mxu1 }
 0x17f   : > { %v3311_v46 = vpack.c.bf16 %v1397_v40, %v1396_v58  ;;  %v2406_v47 = vadd.f32 %v2405_v23, %v2404_v16  ;;  %v2407_v49 = vpop.f32.mrb[62].mxu1  ;;  %v1169_v23 = vadd.f32 %v3193_v15, %v3227_v1  ;;  %v1177_v15 = vadd.f32 %v3201_v27, %v3245_v34 }
 0x180   : > { %v2408_v51 = vpop.f32.mrb[63].mxu1  ;;  %v1185_v27 = vadd.f32 %v3209_v39, %v3260_v13  ;;  %v1193_v39 = vadd.f32 %v3219_v53, %v3274_v24  ;;  %v1201_v53 = vadd.f32 %v3231_v5, %v3283_v33  ;;  %v1209_v5 = vadd.f32 %v3241_v28, %v3294_v10 }
 0x181   : > { %v1314_v52 = vadd.f32 %v2406_v47, %v1153_v41  ;;  %v2409_v14 = vadd.f32 %v2408_v51, %v2407_v49  ;;  %v1217_v28 = vadd.f32 %v3253_v50, %v3303_v17  ;;  %v2741_v50 = vld [vmem:[%s3531_s3] ss:$8 sps:$4 sm:$0xff]   ;;  %v2746_v17 = vld [vmem:[%s3531_s3 + $0x10] ss:$8 sps:$4 sm:$0xff]  }
 0x183   : > { %v1317_v63 = vadd.f32 %v2409_v14, %v1156_v43  ;;  %v1398_v2 = vmax.f32 %v1314_v52, 0.0  ;;  %v1172_v43 = vadd.f32 %v3195_v18, %v3233_v8  ;;  %v1180_v18 = vadd.f32 %v3203_v30, %v3247_v37 }
 0x184   : > { %v1188_v30 = vadd.f32 %v3211_v42, %v3265_v31  ;;  %v1196_v42 = vadd.f32 %v3223_v57, %v3276_v29  ;;  %v1204_v57 = vadd.f32 %v3235_v11, %v3288_v35  ;;  %v1212_v11 = vadd.f32 %v3243_v32, %v3296_v38 }
 0x185   : > { %v1399_v26 = vmax.f32 %v1317_v63, 0.0  ;;  %v2410_v25 = vpop.f32.mrb[64].mxu1  ;;  %v1220_v32 = vadd.f32 %v3255_v59, %v3308_v54  ;;  %v2744_v59 = vld [vmem:[%s3531_s3 + $0x14] ss:$8 sps:$4 sm:$0xff]   ;;  %v2747_v54 = vld [vmem:[%s3531_s3 + $0x24] ss:$8 sps:$4 sm:$0xff]  }
 0x186   : > { %v2411_v48 = vpop.f32.mrb[65].mxu1 }
 0x187   : > { %v3316_v60 = vpack.c.bf16 %v1399_v26, %v1398_v2  ;;  %v2412_v0 = vadd.f32 %v2411_v48, %v2410_v25  ;;  %v2413_v22 = vpop.f32.mrb[66].mxu1 }
 0x188   : > { %v2414_v61 = vpop.f32.mrb[67].mxu1 }
 0x189   : > { %v1322_v20 = vadd.f32 %v2412_v0, %v1161_v12  ;;  %v2415_v36 = vadd.f32 %v2414_v61, %v2413_v22 }
 0x18b   : > { %v1325_v4 = vadd.f32 %v2415_v36, %v1164_v45  ;;  %v1400_v58 = vmax.f32 %v1322_v20, 0.0 }
 0x18d   : > { %v1401_v40 = vmax.f32 %v1325_v4, 0.0  ;;  %v2416_v16 = vpop.f32.mrb[68].mxu1 }
 0x18e   : > { %v2417_v41 = vpop.f32.mrb[69].mxu1 }
 0x18f   : > { %v2418_v47 = vadd.f32 %v2417_v41, %v2416_v16  ;;  %v2419_v3 = vpop.f32.mrb[70].mxu1  ;;  %v1456_v44 = vpack.c.bf16 %v1401_v40, %v1400_v58 }
 0x190   : > { %v2420_v49 = vpop.f32.mrb[71].mxu1 }
 0x191   : > { %v1330_v51 = vadd.f32 %v2418_v47, %v1169_v23  ;;  %v2421_v52 = vadd.f32 %v2420_v49, %v2419_v3  ;;  %2458 = vmatprep.subr.bf16.mxu0 %v1456_v44 }
 0x192   : > { %2459 = vmatpush3.bf16.msra.mxu0 %v3271_v62 }
 0x193   : > { %v1333_v6 = vadd.f32 %v2421_v52, %v1172_v43  ;;  %v1402_v56 = vmax.f32 %v1330_v51, 0.0 }
 0x195   : > { %v1403_v14 = vmax.f32 %v1333_v6, 0.0  ;;  %v2422_v63 = vpop.f32.mrb[72].mxu1 }
 0x196   : > { %v2423_v2 = vpop.f32.mrb[73].mxu1 }
 0x197   : > { %v2424_v1 = vadd.f32 %v2423_v2, %v2422_v63  ;;  %v2425_v26 = vpop.f32.mrb[74].mxu1  ;;  %v1457_v25 = vpack.c.bf16 %v1403_v14, %v1402_v56 }
 0x198   : > { %v2426_v48 = vpop.f32.mrb[75].mxu1 }
 0x199   : > { %v1338_v8 = vadd.f32 %v2424_v1, %v1177_v15  ;;  %v2427_v12 = vadd.f32 %v2426_v48, %v2425_v26  ;;  %2460 = vmatprep.subr.bf16.mxu0 %v1457_v25 }
 0x19a   : > { %2461 = vmatpush3.bf16.msra.mxu0 %v3279_v9 }
 0x19b   : > { %v1341_v62 = vadd.f32 %v2427_v12, %v1180_v18  ;;  %v1404_v0 = vmax.f32 %v1338_v8, 0.0 }
 0x19d   : > { %v1405_v22 = vmax.f32 %v1341_v62, 0.0  ;;  %v2428_v61 = vpop.f32.mrb[76].mxu1 }
 0x19e   : > { %v2429_v45 = vpop.f32.mrb[77].mxu1 }
 0x19f   : > { %v2430_v34 = vadd.f32 %v2429_v45, %v2428_v61  ;;  %v2431_v20 = vpop.f32.mrb[78].mxu1  ;;  %v1458_v36 = vpack.c.bf16 %v1405_v22, %v1404_v0 }
 0x1a0   : > { %v2432_v4 = vpop.f32.mrb[79].mxu1 }
 0x1a1   : > { %v1346_v37 = vadd.f32 %v2430_v34, %v1185_v27  ;;  %v2433_v58 = vadd.f32 %v2432_v4, %v2431_v20  ;;  %2462 = vmatprep.subr.bf16.mxu0 %v1458_v36 }
 0x1a2   : > { %2463 = vmatpush3.bf16.msra.mxu0 %v3285_v19 }
 0x1a3   : > { %v1349_v9 = vadd.f32 %v2433_v58, %v1188_v30  ;;  %v1406_v40 = vmax.f32 %v1346_v37, 0.0  ;;  %v2752_v37 = vld [vmem:[%s3531_s3 + $0x30] ss:$8 sps:$4 sm:$0xff]   ;;  %v2753_v58 = vld [vmem:[%s3531_s3 + $0x44] ss:$8 sps:$4 sm:$0xff]  }
 0x1a5   : > { %v1407_v16 = vmax.f32 %v1349_v9, 0.0  ;;  %v2434_v41 = vpop.f32.mrb[80].mxu1  ;;  %v2755_v9 = vld [vmem:[%s3531_s3 + $0x40] ss:$8 sps:$4 sm:$0xff]  }
 0x1a6   : > { %v2435_v23 = vpop.f32.mrb[81].mxu1 }
 0x1a7   : > { %v2436_v13 = vadd.f32 %v2435_v23, %v2434_v41  ;;  %v2437_v47 = vpop.f32.mrb[82].mxu1  ;;  %v1459_v3 = vpack.c.bf16 %v1407_v16, %v1406_v40  ;;  %v2756_v40 = vld [vmem:[%s3531_s3 + $0x54] ss:$8 sps:$4 sm:$0xff]   ;;  %v2758_v16 = vld [vmem:[%s3531_s3 + $0x50] ss:$8 sps:$4 sm:$0xff]  }
 0x1a8   : > { %v2438_v44 = vpop.f32.mrb[83].mxu1  ;;  %v2759_v41 = vld [vmem:[%s3531_s3 + $0x64] ss:$8 sps:$4 sm:$0xff]   ;;  %v2761_v23 = vld [vmem:[%s3531_s3 + $0x60] ss:$8 sps:$4 sm:$0xff]  }
 0x1a9   : > { %v1354_v31 = vadd.f32 %v2436_v13, %v1193_v39  ;;  %v2439_v49 = vadd.f32 %v2438_v44, %v2437_v47  ;;  %2464 = vmatprep.subr.bf16.mxu0 %v1459_v3  ;;  %v2762_v39 = vld [vmem:[%s3531_s3 + $0x74] ss:$8 sps:$4 sm:$0xff]   ;;  %v2764_v13 = vld [vmem:[%s3531_s3 + $0x70] ss:$8 sps:$4 sm:$0xff]   ;;  %v2765_v47 = vld [vmem:[%s3531_s3 + $0x84] ss:$8 sps:$4 sm:$0xff]  }
 0x1aa   : > { %2465 = vmatpush3.bf16.msra.mxu0 %v3291_v55  ;;  %v2767_v3 = vld [vmem:[%s3531_s3 + $0x80] ss:$8 sps:$4 sm:$0xff]   ;;  %v2768_v44 = vld [vmem:[%s3531_s3 + $0x94] ss:$8 sps:$4 sm:$0xff]  }
 0x1ab   : > { %v1357_v19 = vadd.f32 %v2439_v49, %v1196_v42  ;;  %v1408_v43 = vmax.f32 %v1354_v31, 0.0  ;;  %v2770_v42 = vld [vmem:[%s3531_s3 + $0x90] ss:$8 sps:$4 sm:$0xff]   ;;  %v2771_v31 = vld [vmem:[%s3531_s3 + $0xa4] ss:$8 sps:$4 sm:$0xff]  }
 0x1ac   : > { %v2773_v49 = vld [vmem:[%s3531_s3 + $0xa0] ss:$8 sps:$4 sm:$0xff]  }
 0x1ad   : > { %v1409_v51 = vmax.f32 %v1357_v19, 0.0  ;;  %v2440_v52 = vpop.f32.mrb[84].mxu1  ;;  %v2774_v19 = vld [vmem:[%s3531_s3 + $0xb4] ss:$8 sps:$4 sm:$0xff]  }
 0x1ae   : > { %v2441_v6 = vpop.f32.mrb[85].mxu1 }
 0x1af   : > { %v2442_v24 = vadd.f32 %v2441_v6, %v2440_v52  ;;  %v2443_v56 = vpop.f32.mrb[86].mxu1  ;;  %v1460_v14 = vpack.c.bf16 %v1409_v51, %v1408_v43  ;;  %v2776_v43 = vld [vmem:[%s3531_s3 + $0xb0] ss:$8 sps:$4 sm:$0xff]   ;;  %v2777_v51 = vld [vmem:[%s3531_s3 + $0xc4] ss:$8 sps:$4 sm:$0xff]  }
 0x1b0   : > { %v2444_v63 = vpop.f32.mrb[87].mxu1  ;;  %v2779_v52 = vld [vmem:[%s3531_s3 + $0xc0] ss:$8 sps:$4 sm:$0xff]   ;;  %v2780_v6 = vld [vmem:[%s3531_s3 + $0xd4] ss:$8 sps:$4 sm:$0xff]  }
 0x1b1   : > { %v1362_v29 = vadd.f32 %v2442_v24, %v1201_v53  ;;  %v2445_v2 = vadd.f32 %v2444_v63, %v2443_v56  ;;  %2466 = vmatprep.subr.bf16.mxu0 %v1460_v14  ;;  %v2782_v53 = vld [vmem:[%s3531_s3 + $0xd0] ss:$8 sps:$4 sm:$0xff]   ;;  %v2783_v24 = vld [vmem:[%s3531_s3 + $0xe4] ss:$8 sps:$4 sm:$0xff]   ;;  %v2785_v56 = vld [vmem:[%s3531_s3 + $0xe0] ss:$8 sps:$4 sm:$0xff]  }
 0x1b2   : > { %2467 = vmatpush3.bf16.msra.mxu0 %v3299_v21  ;;  %v2786_v14 = vld [vmem:[%s3531_s3 + $0xf4] ss:$8 sps:$4 sm:$0xff]   ;;  %v2788_v63 = vld [vmem:[%s3531_s3 + $0xf0] ss:$8 sps:$4 sm:$0xff]  }
 0x1b3   : > { %v1365_v55 = vadd.f32 %v2445_v2, %v1204_v57  ;;  %v1410_v15 = vmax.f32 %v1362_v29, 0.0 }
 0x1b5   : > { %v1411_v1 = vmax.f32 %v1365_v55, 0.0  ;;  %v2446_v26 = vpop.f32.mrb[88].mxu1 }
 0x1b6   : > { %v2447_v25 = vpop.f32.mrb[89].mxu1 }
 0x1b7   : > { %v2448_v33 = vadd.f32 %v2447_v25, %v2446_v26  ;;  %v2449_v48 = vpop.f32.mrb[90].mxu1  ;;  %v1461_v18 = vpack.c.bf16 %v1411_v1, %v1410_v15 }
 0x1b8   : > { %v2450_v8 = vpop.f32.mrb[91].mxu1 }
 0x1b9   : > { %v1370_v35 = vadd.f32 %v2448_v33, %v1209_v5  ;;  %v2451_v12 = vadd.f32 %v2450_v8, %v2449_v48  ;;  %2468 = vmatprep.subr.bf16.mxu0 %v1461_v18 }
 0x1ba   : > { %2469 = vmatpush3.bf16.msra.mxu0 %v3305_v7 }
 0x1bb   : > { %v1373_v21 = vadd.f32 %v2451_v12, %v1212_v11  ;;  %v1412_v62 = vmax.f32 %v1370_v35, 0.0 }
 0x1bd   : > { %v1413_v0 = vmax.f32 %v1373_v21, 0.0  ;;  %v2452_v22 = vpop.f32.mrb[92].mxu1 }
 0x1be   : > { %v2453_v61 = vpop.f32.mrb[93].mxu1 }
 0x1bf   : > { %v2454_v10 = vadd.f32 %v2453_v61, %v2452_v22  ;;  %v2455_v45 = vpop.f32.mrb[94].mxu1  ;;  %v1462_v27 = vpack.c.bf16 %v1413_v0, %v1412_v62 }
 0x1c0   : > { %v2456_v34 = vpop.f32.mrb[95].mxu1 }
 0x1c1   : > { %v1378_v38 = vadd.f32 %v2454_v10, %v1217_v28  ;;  %v2457_v20 = vadd.f32 %v2456_v34, %v2455_v45  ;;  %2470 = vmatprep.subr.bf16.mxu0 %v1462_v27 }
 0x1c2   : > { %2471 = vmatpush3.bf16.msra.mxu0 %v3311_v46  ;;  %v2749_v46 = vld [vmem:[%s3531_s3 + $0x20] ss:$8 sps:$4 sm:$0xff]  }
 0x1c3   : > { %v1381_v7 = vadd.f32 %v2457_v20, %v1220_v32  ;;  %v1414_v36 = vmax.f32 %v1378_v38, 0.0 }
 0x1c5   : > { %v1415_v4 = vmax.f32 %v1381_v7, 0.0 }
 0x1c7   : > { %v1463_v30 = vpack.c.bf16 %v1415_v4, %v1414_v36 }
 0x1c9   : > { %2472 = vmatprep.subr.bf16.mxu0 %v1463_v30 }
 0x1ca   : > { %2473 = vmatpush3.bf16.msra.mxu0 %v3316_v60  ;;  %v2750_v60 = vld [vmem:[%s3531_s3 + $0x34] ss:$8 sps:$4 sm:$0xff]  }
 0x1cd   : > { %1657 = vmatmul.mubr.bf16.vlgmr.msra.gmra.mrb[32].mxu0 %v2741_v50 }
 0x1ce   : > { %1664 = vmatprep.mubr.bf16.mxu0 %v2744_v59 }
 0x1d5   : > { %1665 = vmatmul.mubr.bf16.gmra.mrb[36].mxu0 %v2746_v17 }
 0x1d6   : > { %1672 = vmatprep.mubr.bf16.mxu0 %v2747_v54 }
 0x1dd   : > { %1673 = vmatmul.mubr.bf16.gmra.mrb[40].mxu0 %v2749_v46 }
 0x1de   : > { %1680 = vmatprep.mubr.bf16.mxu0 %v2750_v60 }
 0x1e5   : > { %1681 = vmatmul.mubr.bf16.gmra.mrb[44].mxu0 %v2752_v37 }
 0x1e6   : > { %1688 = vmatprep.mubr.bf16.mxu0 %v2753_v58 }
 0x1ed   : > { %1689 = vmatmul.mubr.bf16.gmra.mrb[48].mxu0 %v2755_v9 }
 0x1ee   : > { %1696 = vmatprep.mubr.bf16.mxu0 %v2756_v40 }
 0x1f5   : > { %1697 = vmatmul.mubr.bf16.gmra.mrb[52].mxu0 %v2758_v16 }
 0x1f6   : > { %1704 = vmatprep.mubr.bf16.mxu0 %v2759_v41 }
 0x1fd   : > { %1705 = vmatmul.mubr.bf16.gmra.mrb[56].mxu0 %v2761_v23 }
 0x1fe   : > { %1712 = vmatprep.mubr.bf16.mxu0 %v2762_v39 }
 0x205   : > { %1713 = vmatmul.mubr.bf16.gmra.mrb[60].mxu0 %v2764_v13 }
 0x206   : > { %1720 = vmatprep.mubr.bf16.mxu0 %v2765_v47 }
 0x20d   : > { %1721 = vmatmul.mubr.bf16.gmra.mrb[64].mxu0 %v2767_v3 }
 0x20e   : > { %1728 = vmatprep.mubr.bf16.mxu0 %v2768_v44 }
 0x215   : > { %1729 = vmatmul.mubr.bf16.gmra.mrb[68].mxu0 %v2770_v42 }
 0x216   : > { %1736 = vmatprep.mubr.bf16.mxu0 %v2771_v31 }
 0x21d   : > { %1737 = vmatmul.mubr.bf16.gmra.mrb[72].mxu0 %v2773_v49 }
 0x21e   : > { %1744 = vmatprep.mubr.bf16.mxu0 %v2774_v19 }
 0x225   : > { %1745 = vmatmul.mubr.bf16.gmra.mrb[76].mxu0 %v2776_v43 }
 0x226   : > { %1752 = vmatprep.mubr.bf16.mxu0 %v2777_v51 }
 0x22d   : > { %1753 = vmatmul.mubr.bf16.gmra.mrb[80].mxu0 %v2779_v52 }
 0x22e   : > { %1760 = vmatprep.mubr.bf16.mxu0 %v2780_v6 }
 0x235   : > { %1761 = vmatmul.mubr.bf16.gmra.mrb[84].mxu0 %v2782_v53 }
 0x236   : > { %1768 = vmatprep.mubr.bf16.mxu0 %v2783_v24 }
 0x23d   : > { %1769 = vmatmul.mubr.bf16.gmra.mrb[88].mxu0 %v2785_v56 }
 0x23e   : > { %1776 = vmatprep.mubr.bf16.mxu0 %v2786_v14 }
 0x245   : > { %1777 = vmatmul.mubr.bf16.gmra.mrb[92].mxu0 %v2788_v63 }
 0x2a0   : > { %v2474_v57 = vpop.f32.mrb[32].mxu0 }
 0x2a1   : > { %v2475_v29 = vpop.f32.mrb[33].mxu0 }
 0x2a2   : > { %v2476_v2 = vadd.f32 %v2475_v29, %v2474_v57  ;;  %v2477_v55 = vpop.f32.mrb[34].mxu0 }
 0x2a3   : > { %v2478_v15 = vpop.f32.mrb[35].mxu0 }
 0x2a4   : > { %v2202_v1 = vpack.c.bf16 %v2476_v2, %v2476_v2  ;;  %v2479_v26 = vadd.f32 %v2478_v15, %v2477_v55 }
 0x2a6   : > { %1914 = vst.msk [vmem:[%s3453_s19] sm:$0xf] %vm1913_vm0, %v2202_v1  ;;  %v2203_v25 = vpack.c.bf16 %v2479_v26, %v2479_v26 }
 0x2a8   : > { %1915 = vst.msk [vmem:[%s3453_s19 + $0x4] sm:$0xf] %vm1913_vm0, %v2203_v25  ;;  %v2480_v5 = vpop.f32.mrb[36].mxu0 }
 0x2a9   : > { %v2481_v33 = vpop.f32.mrb[37].mxu0 }
 0x2aa   : > { %v2482_v48 = vadd.f32 %v2481_v33, %v2480_v5  ;;  %v2483_v18 = vpop.f32.mrb[38].mxu0 }
 0x2ab   : > { %v2484_v8 = vpop.f32.mrb[39].mxu0 }
 0x2ac   : > { %v2204_v11 = vpack.c.bf16 %v2482_v48, %v2482_v48  ;;  %v2485_v35 = vadd.f32 %v2484_v8, %v2483_v18 }
 0x2ae   : > { %1916 = vst.msk [vmem:[%s3453_s19 + $0x8] sm:$0xf] %vm1913_vm0, %v2204_v11  ;;  %v2205_v12 = vpack.c.bf16 %v2485_v35, %v2485_v35 }
 0x2b0   : > { %1917 = vst.msk [vmem:[%s3453_s19 + $0xc] sm:$0xf] %vm1913_vm0, %v2205_v12  ;;  %v2486_v21 = vpop.f32.mrb[40].mxu0 }
 0x2b1   : > { %v2487_v62 = vpop.f32.mrb[41].mxu0 }
 0x2b2   : > { %v2488_v0 = vadd.f32 %v2487_v62, %v2486_v21  ;;  %v2489_v22 = vpop.f32.mrb[42].mxu0 }
 0x2b3   : > { %v2490_v61 = vpop.f32.mrb[43].mxu0 }
 0x2b4   : > { %v2206_v28 = vpack.c.bf16 %v2488_v0, %v2488_v0  ;;  %v2491_v10 = vadd.f32 %v2490_v61, %v2489_v22 }
 0x2b6   : > { %1918 = vst.msk [vmem:[%s3453_s19 + $0x10] sm:$0xf] %vm1913_vm0, %v2206_v28  ;;  %v2207_v45 = vpack.c.bf16 %v2491_v10, %v2491_v10 }
 0x2b8   : > { %1919 = vst.msk [vmem:[%s3453_s19 + $0x14] sm:$0xf] %vm1913_vm0, %v2207_v45  ;;  %v2492_v27 = vpop.f32.mrb[44].mxu0 }
 0x2b9   : > { %v2493_v34 = vpop.f32.mrb[45].mxu0 }
 0x2ba   : > { %v2494_v32 = vadd.f32 %v2493_v34, %v2492_v27  ;;  %v2495_v38 = vpop.f32.mrb[46].mxu0 }
 0x2bb   : > { %v2496_v20 = vpop.f32.mrb[47].mxu0 }
 0x2bc   : > { %v2208_v7 = vpack.c.bf16 %v2494_v32, %v2494_v32  ;;  %v2497_v36 = vadd.f32 %v2496_v20, %v2495_v38 }
 0x2be   : > { %1920 = vst.msk [vmem:[%s3453_s19 + $0x18] sm:$0xf] %vm1913_vm0, %v2208_v7  ;;  %v2209_v4 = vpack.c.bf16 %v2497_v36, %v2497_v36 }
 0x2c0   : > { %1921 = vst.msk [vmem:[%s3453_s19 + $0x1c] sm:$0xf] %vm1913_vm0, %v2209_v4  ;;  %v2498_v30 = vpop.f32.mrb[48].mxu0 }
 0x2c1   : > { %v2499_v50 = vpop.f32.mrb[49].mxu0 }
 0x2c2   : > { %v2500_v59 = vadd.f32 %v2499_v50, %v2498_v30  ;;  %v2501_v17 = vpop.f32.mrb[50].mxu0 }
 0x2c3   : > { %v2502_v54 = vpop.f32.mrb[51].mxu0 }
 0x2c4   : > { %v2210_v46 = vpack.c.bf16 %v2500_v59, %v2500_v59  ;;  %v2503_v60 = vadd.f32 %v2502_v54, %v2501_v17 }
 0x2c6   : > { %1922 = vst.msk [vmem:[%s3453_s19 + $0x20] sm:$0xf] %vm1913_vm0, %v2210_v46  ;;  %v2211_v37 = vpack.c.bf16 %v2503_v60, %v2503_v60 }
 0x2c8   : > { %1923 = vst.msk [vmem:[%s3453_s19 + $0x24] sm:$0xf] %vm1913_vm0, %v2211_v37  ;;  %v2504_v58 = vpop.f32.mrb[52].mxu0 }
 0x2c9   : > { %v2505_v9 = vpop.f32.mrb[53].mxu0 }
 0x2ca   : > { %v2506_v40 = vadd.f32 %v2505_v9, %v2504_v58  ;;  %v2507_v16 = vpop.f32.mrb[54].mxu0 }
 0x2cb   : > { %v2508_v41 = vpop.f32.mrb[55].mxu0 }
 0x2cc   : > { %v2212_v23 = vpack.c.bf16 %v2506_v40, %v2506_v40  ;;  %v2509_v39 = vadd.f32 %v2508_v41, %v2507_v16 }
 0x2ce   : > { %1924 = vst.msk [vmem:[%s3453_s19 + $0x28] sm:$0xf] %vm1913_vm0, %v2212_v23  ;;  %v2213_v13 = vpack.c.bf16 %v2509_v39, %v2509_v39 }
 0x2d0   : > { %1925 = vst.msk [vmem:[%s3453_s19 + $0x2c] sm:$0xf] %vm1913_vm0, %v2213_v13  ;;  %v2510_v47 = vpop.f32.mrb[56].mxu0 }
 0x2d1   : > { %v2511_v3 = vpop.f32.mrb[57].mxu0 }
 0x2d2   : > { %v2512_v44 = vadd.f32 %v2511_v3, %v2510_v47  ;;  %v2513_v42 = vpop.f32.mrb[58].mxu0 }
 0x2d3   : > { %v2514_v31 = vpop.f32.mrb[59].mxu0 }
 0x2d4   : > { %v2214_v49 = vpack.c.bf16 %v2512_v44, %v2512_v44  ;;  %v2515_v19 = vadd.f32 %v2514_v31, %v2513_v42 }
 0x2d6   : > { %1926 = vst.msk [vmem:[%s3453_s19 + $0x30] sm:$0xf] %vm1913_vm0, %v2214_v49  ;;  %v2215_v43 = vpack.c.bf16 %v2515_v19, %v2515_v19 }
 0x2d8   : > { %1927 = vst.msk [vmem:[%s3453_s19 + $0x34] sm:$0xf] %vm1913_vm0, %v2215_v43  ;;  %v2516_v51 = vpop.f32.mrb[60].mxu0 }
 0x2d9   : > { %v2517_v52 = vpop.f32.mrb[61].mxu0 }
 0x2da   : > { %v2518_v6 = vadd.f32 %v2517_v52, %v2516_v51  ;;  %v2519_v53 = vpop.f32.mrb[62].mxu0 }
 0x2db   : > { %v2520_v24 = vpop.f32.mrb[63].mxu0 }
 0x2dc   : > { %v2216_v56 = vpack.c.bf16 %v2518_v6, %v2518_v6  ;;  %v2521_v14 = vadd.f32 %v2520_v24, %v2519_v53 }
 0x2de   : > { %1928 = vst.msk [vmem:[%s3453_s19 + $0x38] sm:$0xf] %vm1913_vm0, %v2216_v56  ;;  %v2217_v63 = vpack.c.bf16 %v2521_v14, %v2521_v14 }
 0x2e0   : > { %1929 = vst.msk [vmem:[%s3453_s19 + $0x3c] sm:$0xf] %vm1913_vm0, %v2217_v63  ;;  %v2522_v57 = vpop.f32.mrb[64].mxu0 }
 0x2e1   : > { %v2523_v29 = vpop.f32.mrb[65].mxu0 }
 0x2e2   : > { %v2524_v2 = vadd.f32 %v2523_v29, %v2522_v57  ;;  %v2525_v55 = vpop.f32.mrb[66].mxu0 }
 0x2e3   : > { %v2526_v15 = vpop.f32.mrb[67].mxu0 }
 0x2e4   : > { %v2218_v1 = vpack.c.bf16 %v2524_v2, %v2524_v2  ;;  %v2527_v26 = vadd.f32 %v2526_v15, %v2525_v55 }
 0x2e6   : > { %1930 = vst.msk [vmem:[%s3453_s19 + $0x40] sm:$0xf] %vm1913_vm0, %v2218_v1  ;;  %v2219_v25 = vpack.c.bf16 %v2527_v26, %v2527_v26 }
 0x2e8   : > { %1931 = vst.msk [vmem:[%s3453_s19 + $0x44] sm:$0xf] %vm1913_vm0, %v2219_v25  ;;  %v2528_v5 = vpop.f32.mrb[68].mxu0 }
 0x2e9   : > { %v2529_v33 = vpop.f32.mrb[69].mxu0 }
 0x2ea   : > { %v2530_v48 = vadd.f32 %v2529_v33, %v2528_v5  ;;  %v2531_v18 = vpop.f32.mrb[70].mxu0 }
 0x2eb   : > { %v2532_v8 = vpop.f32.mrb[71].mxu0 }
 0x2ec   : > { %v2220_v11 = vpack.c.bf16 %v2530_v48, %v2530_v48  ;;  %v2533_v35 = vadd.f32 %v2532_v8, %v2531_v18 }
 0x2ee   : > { %1932 = vst.msk [vmem:[%s3453_s19 + $0x48] sm:$0xf] %vm1913_vm0, %v2220_v11  ;;  %v2221_v12 = vpack.c.bf16 %v2533_v35, %v2533_v35 }
 0x2f0   : > { %1933 = vst.msk [vmem:[%s3453_s19 + $0x4c] sm:$0xf] %vm1913_vm0, %v2221_v12  ;;  %v2534_v21 = vpop.f32.mrb[72].mxu0 }
 0x2f1   : > { %v2535_v62 = vpop.f32.mrb[73].mxu0 }
 0x2f2   : > { %v2536_v0 = vadd.f32 %v2535_v62, %v2534_v21  ;;  %v2537_v22 = vpop.f32.mrb[74].mxu0 }
 0x2f3   : > { %v2538_v61 = vpop.f32.mrb[75].mxu0 }
 0x2f4   : > { %v2222_v28 = vpack.c.bf16 %v2536_v0, %v2536_v0  ;;  %v2539_v10 = vadd.f32 %v2538_v61, %v2537_v22 }
 0x2f6   : > { %1934 = vst.msk [vmem:[%s3453_s19 + $0x50] sm:$0xf] %vm1913_vm0, %v2222_v28  ;;  %v2223_v45 = vpack.c.bf16 %v2539_v10, %v2539_v10 }
 0x2f8   : > { %1935 = vst.msk [vmem:[%s3453_s19 + $0x54] sm:$0xf] %vm1913_vm0, %v2223_v45  ;;  %v2540_v27 = vpop.f32.mrb[76].mxu0 }
 0x2f9   : > { %v2541_v34 = vpop.f32.mrb[77].mxu0 }
 0x2fa   : > { %v2542_v32 = vadd.f32 %v2541_v34, %v2540_v27  ;;  %v2543_v38 = vpop.f32.mrb[78].mxu0 }
 0x2fb   : > { %v2544_v20 = vpop.f32.mrb[79].mxu0 }
 0x2fc   : > { %v2224_v7 = vpack.c.bf16 %v2542_v32, %v2542_v32  ;;  %v2545_v36 = vadd.f32 %v2544_v20, %v2543_v38 }
 0x2fe   : > { %1936 = vst.msk [vmem:[%s3453_s19 + $0x58] sm:$0xf] %vm1913_vm0, %v2224_v7  ;;  %v2225_v4 = vpack.c.bf16 %v2545_v36, %v2545_v36 }
 0x300   : > { %1937 = vst.msk [vmem:[%s3453_s19 + $0x5c] sm:$0xf] %vm1913_vm0, %v2225_v4  ;;  %v2546_v30 = vpop.f32.mrb[80].mxu0 }
 0x301   : > { %v2547_v50 = vpop.f32.mrb[81].mxu0 }
 0x302   : > { %v2548_v59 = vadd.f32 %v2547_v50, %v2546_v30  ;;  %v2549_v17 = vpop.f32.mrb[82].mxu0 }
 0x303   : > { %v2550_v54 = vpop.f32.mrb[83].mxu0 }
 0x304   : > { %v2226_v46 = vpack.c.bf16 %v2548_v59, %v2548_v59  ;;  %v2551_v60 = vadd.f32 %v2550_v54, %v2549_v17 }
 0x306   : > { %1938 = vst.msk [vmem:[%s3453_s19 + $0x60] sm:$0xf] %vm1913_vm0, %v2226_v46  ;;  %v2227_v37 = vpack.c.bf16 %v2551_v60, %v2551_v60 }
 0x308   : > { %1939 = vst.msk [vmem:[%s3453_s19 + $0x64] sm:$0xf] %vm1913_vm0, %v2227_v37  ;;  %v2552_v58 = vpop.f32.mrb[84].mxu0 }
 0x309   : > { %v2553_v9 = vpop.f32.mrb[85].mxu0 }
 0x30a   : > { %v2554_v40 = vadd.f32 %v2553_v9, %v2552_v58  ;;  %v2555_v16 = vpop.f32.mrb[86].mxu0 }
 0x30b   : > { %v2556_v41 = vpop.f32.mrb[87].mxu0 }
 0x30c   : > { %v2228_v23 = vpack.c.bf16 %v2554_v40, %v2554_v40  ;;  %v2557_v39 = vadd.f32 %v2556_v41, %v2555_v16 }
 0x30e   : > { %1940 = vst.msk [vmem:[%s3453_s19 + $0x68] sm:$0xf] %vm1913_vm0, %v2228_v23  ;;  %v2229_v13 = vpack.c.bf16 %v2557_v39, %v2557_v39 }
 0x310   : > { %1941 = vst.msk [vmem:[%s3453_s19 + $0x6c] sm:$0xf] %vm1913_vm0, %v2229_v13  ;;  %v2558_v47 = vpop.f32.mrb[88].mxu0 }
 0x311   : > { %v2559_v3 = vpop.f32.mrb[89].mxu0 }
 0x312   : > { %v2560_v44 = vadd.f32 %v2559_v3, %v2558_v47  ;;  %v2561_v42 = vpop.f32.mrb[90].mxu0 }
 0x313   : > { %v2562_v31 = vpop.f32.mrb[91].mxu0 }
 0x314   : > { %v2230_v49 = vpack.c.bf16 %v2560_v44, %v2560_v44  ;;  %v2563_v19 = vadd.f32 %v2562_v31, %v2561_v42 }
 0x316   : > { %1942 = vst.msk [vmem:[%s3453_s19 + $0x70] sm:$0xf] %vm1913_vm0, %v2230_v49  ;;  %v2231_v43 = vpack.c.bf16 %v2563_v19, %v2563_v19 }
 0x318   : > { %1943 = vst.msk [vmem:[%s3453_s19 + $0x74] sm:$0xf] %vm1913_vm0, %v2231_v43  ;;  %v2564_v51 = vpop.f32.mrb[92].mxu0 }
 0x319   : > { %v2565_v52 = vpop.f32.mrb[93].mxu0 }
 0x31a   : > { %v2566_v6 = vadd.f32 %v2565_v52, %v2564_v51  ;;  %v2567_v53 = vpop.f32.mrb[94].mxu0 }
 0x31b   : > { %v2568_v24 = vpop.f32.mrb[95].mxu0 }
 0x31c   : > { %v2232_v56 = vpack.c.bf16 %v2566_v6, %v2566_v6  ;;  %v2569_v14 = vadd.f32 %v2568_v24, %v2567_v53 }
 0x31e   : > { %1944 = vst.msk [vmem:[%s3453_s19 + $0x78] sm:$0xf] %vm1913_vm0, %v2232_v56  ;;  %v2233_v63 = vpack.c.bf16 %v2569_v14, %v2569_v14 }
 0x320   : > { %1945 = vst.msk [vmem:[%s3453_s19 + $0x7c] sm:$0xf] %vm1913_vm0, %v2233_v63 }
 0x321 PF: > { %s14_s17 = sadd.s32 1, %s2811_s17   ;;  %s3533_s15 = smov %s2807_s16 }
 0x322   : > { %p11_p5 = scmp.ge.s32.totalorder %s14_s17, 4   ;;  %s3534_s16 = smov %s3536_s18 }
 0x324   :  { %13 = sbr.rel (!%p11_p5) target bundleno = 2 (0x2), region = 66 }

// kernel: decoder_forward.3
= control target key start
LH: loop header
LB: loop body
LE: loop exit
PB: predicated region body
PF: predicated region fallthrough
CT: control target
= control target key end

     0   :  { %s6753_s21 = smov 0   ;;  %s6755_s22 = smov 0   ;;  %s8698_s0 = inlined_call_operand.vmem [shape: bf16[2,256,64], index: 0, kind: input, shape index: {}]   ;;  %s8699_s1 = inlined_call_operand.vmem [shape: bf16[64,256], index: 1, kind: input, shape index: {}]   ;;  %s8700_s2 = inlined_call_operand.vmem [shape: bf16[2,256,256], index: 2, kind: input, shape index: {}]   ;;  %s8701_s3 = inlined_call_operand.vmem [shape: bf16[48,256], index: 3, kind: input, shape index: {}]   ;;  %s8702_s4 = inlined_call_operand.vmem [shape: bf16[256,48], index: 4, kind: input, shape index: {}]   ;;  %s8703_s5 = inlined_call_operand.vmem [shape: bf16[1024,256], index: 5, kind: input, shape index: {}]   ;;  %s8704_s6 = inlined_call_operand.vmem [shape: bf16[8,1024], index: 6, kind: input, shape index: {}]   ;;  %s8705_s7 = inlined_call_operand.vmem [shape: f32[48,1], index: 7, kind: input, shape index: {}]   ;;  %s8706_s8 = inlined_call_operand.vmem [shape: f32[256,1], index: 8, kind: input, shape index: {}]   ;;  %s8707_s9 = inlined_call_operand.vmem [shape: f32[1024,1], index: 9, kind: input, shape index: {}]   ;;  %s8708_s10 = inlined_call_operand.vmem [shape: f32[8,1], index: 10, kind: input, shape index: {}]   ;;  %s8709_s11 = inlined_call_operand.vmem [shape: bf16[2,1024,256], index: 11, kind: output, shape index: {0}]   ;;  %s8710_s12 = inlined_call_operand.vmem [shape: f32[2,8,256], index: 12, kind: output, shape index: {1}]  }
   0x1   :  { %s6757_s23 = smov 0  }
   0x2 LB: > { %s35_s24 = sadd.s32 1, %s6681_s22  ;;  %p5707_p0 = scmp.ge.s32.totalorder %s6685_s23, 1  ;;  %s6685_s23 = sphi %s6757_s23, %s23_s23   ;;  %s6681_s22 = sphi %s6755_s22, %s8929_s22   ;;  %s6677_s21 = sphi %s6753_s21, %s8928_s21  }
   0x3   : > { %p37_p1 = scmp.ge.s32.totalorder %s35_s24, 2  ;;  %p409_p2 = scmp.lt.s32.totalorder %s6685_s23, 3 }
   0x5   : > { %s8931_s24 = smov (%p37_p1, %s35_s24), 0  ;;  %p410_p3 = pnand %p5707_p0, %p409_p2 }
   0x7   : > { %413 = sbr.rel (%p410_p3) target bundleno = 1704 (0x6a8), region = 64 }
   0xe   : > { %v600_v0 = vld [vmem:[%s8705_s7 + $0x10] sm:$0xff]  ;;  %v598_v1 = vld [vmem:[%s8705_s7] sm:$0xff]  ;;  %p478_p4 = scmp.lt.s32.totalorder %s6677_s21, 1  ;;  %v8711_v2 = vmov 0   ;;  %v601_v3 = vld [vmem:[%s8705_s7 + $0x18] sm:$0xff]  ;;  %vm1017_vm0 = vcmask 392192  }
   0xf   : > { %6360 = vset.pattern.permute.xlu1 %v8711_v2  ;;  %6359 = vset.pattern.permute.xlu0 %v8711_v2  ;;  %v599_v4 = vld [vmem:[%s8705_s7 + $0x8] sm:$0xff]  ;;  %v602_v6 = vld [vmem:[%s8705_s7 + $0x20] sm:$0xff]  ;;  %v1624_v14 = vld [vmem:[%s8706_s8 + $0x18] sm:$0xff]  ;;  %vm1379_vm1 = vcmask 523264  }
  0x10   : > { %616 = vperm.xlu1 %6360, %v600_v0   ;;  %606 = vperm.xlu0 %6359, %v598_v1   ;;  %s8933_s21 = smov (!%p478_p4, %s6677_s21), 1  ;;  %v603_v5 = vld [vmem:[%s8705_s7 + $0x28] sm:$0xff]  ;;  %v1621_v12 = vld [vmem:[%s8706_s8] sm:$0xff]  ;;  %v1623_v16 = vld [vmem:[%s8706_s8 + $0x10] sm:$0xff] }
  0x11   : > { %1098 = vmatprep.mubr.bf16.mxu1 %v8711_v2  ;;  %s6093_s15 = sshll.u32 %s8933_s21, 8  ;;  %v1622_v10 = vld [vmem:[%s8706_s8 + $0x8] sm:$0xff]  ;;  %v1625_v20 = vld [vmem:[%s8706_s8 + $0x20] sm:$0xff]  ;;  %v1628_v23 = vld [vmem:[%s8706_s8 + $0x38] sm:$0xff]  ;;  %s6092_s26 = sshll.u32 %s8933_s21, 7 }
  0x12   : > { %s6792_s18 = scalar_lea.vmem %s8700_s2, %s6093_s15  ;;  %v1626_v19 = vld [vmem:[%s8706_s8 + $0x28] sm:$0xff]  ;;  %v1627_v24 = vld [vmem:[%s8706_s8 + $0x30] sm:$0xff]  ;;  %v1629_v28 = vld [vmem:[%s8706_s8 + $0x40] sm:$0xff]  ;;  %s6941_s16 = scalar_lea.vmem %s8698_s0, %s6092_s26 }
  0x13   : > { %v6361_v7 = vld [vmem:[%s6792_s18 + $0x4] ss:$8 sps:$4 sm:$0xff]   ;;  %v6363_v8 = vld [vmem:[%s6792_s18] ss:$8 sps:$4 sm:$0xff]   ;;  %v6364_v9 = vld [vmem:[%s6792_s18 + $0x14] ss:$8 sps:$4 sm:$0xff]  }
  0x14   : > { %621 = vperm.xlu1 %6360, %v601_v3   ;;  %611 = vperm.xlu0 %6359, %v599_v4   ;;  %v6366_v11 = vld [vmem:[%s6792_s18 + $0x10] ss:$8 sps:$4 sm:$0xff]   ;;  %v6367_v13 = vld [vmem:[%s6792_s18 + $0x24] ss:$8 sps:$4 sm:$0xff]   ;;  %v6369_v15 = vld [vmem:[%s6792_s18 + $0x20] ss:$8 sps:$4 sm:$0xff]  }
  0x15   : > { %824 = vmatprep.subr.bf16.mxu0 %v6361_v7  ;;  %v6370_v17 = vld [vmem:[%s6792_s18 + $0x34] ss:$8 sps:$4 sm:$0xff]   ;;  %v6372_v18 = vld [vmem:[%s6792_s18 + $0x30] ss:$8 sps:$4 sm:$0xff]   ;;  %v6373_v21 = vld [vmem:[%s6792_s18 + $0x44] ss:$8 sps:$4 sm:$0xff]  }
  0x16   : > { %825 = vmatpush1.bf16.msra.mxu0 %v6363_v8  ;;  %v6375_v22 = vld [vmem:[%s6792_s18 + $0x40] ss:$8 sps:$4 sm:$0xff]   ;;  %v6376_v25 = vld [vmem:[%s6792_s18 + $0x54] ss:$8 sps:$4 sm:$0xff]   ;;  %v6378_v26 = vld [vmem:[%s6792_s18 + $0x50] ss:$8 sps:$4 sm:$0xff]  }
  0x17   : > { %826 = vmatprep.subr.bf16.mxu0 %v6364_v9  ;;  %v1630_v27 = vld [vmem:[%s8706_s8 + $0x48] sm:$0xff]  ;;  %v1632_v31 = vld [vmem:[%s8706_s8 + $0x58] sm:$0xff]  ;;  %v1631_v32 = vld [vmem:[%s8706_s8 + $0x50] sm:$0xff] }
  0x18   : > { %631 = vperm.xlu1 %6360, %v603_v5   ;;  %626 = vperm.xlu0 %6359, %v602_v6   ;;  %v6379_v29 = vld [vmem:[%s6792_s18 + $0x64] ss:$8 sps:$4 sm:$0xff]   ;;  %v6381_v30 = vld [vmem:[%s6792_s18 + $0x60] ss:$8 sps:$4 sm:$0xff]   ;;  %v6382_v33 = vld [vmem:[%s6792_s18 + $0x74] ss:$8 sps:$4 sm:$0xff]  }
  0x19   : > { %v6384_v34 = vld [vmem:[%s6792_s18 + $0x70] ss:$8 sps:$4 sm:$0xff]   ;;  %v6411_v35 = vld [vmem:[%s8701_s3 + $0x4] ss:$8 sps:$4 sm:$0xff]   ;;  %v6387_v39 = vld [vmem:[%s6792_s18 + $0x80] ss:$8 sps:$4 sm:$0xff]  }
  0x1a   : > { %827 = vmatpush1.bf16.msra.mxu0 %v6366_v11  ;;  %v1634_v36 = vld [vmem:[%s8706_s8 + $0x68] sm:$0xff]  ;;  %v1633_v37 = vld [vmem:[%s8706_s8 + $0x60] sm:$0xff]  ;;  %856 = vmatprep.mubr.bf16.mxu0 %v6411_v35  ;;  %v1636_v40 = vld [vmem:[%s8706_s8 + $0x78] sm:$0xff] }
  0x1b   : > { %828 = vmatprep.subr.bf16.mxu0 %v6367_v13  ;;  %v6385_v38 = vld [vmem:[%s6792_s18 + $0x84] ss:$8 sps:$4 sm:$0xff]   ;;  %v1635_v41 = vld [vmem:[%s8706_s8 + $0x70] sm:$0xff]  ;;  %v6393_v47 = vld [vmem:[%s6792_s18 + $0xa0] ss:$8 sps:$4 sm:$0xff]  }
  0x1c   : > { %1660 = vperm.xlu1 %6360, %v1622_v10   ;;  %1655 = vperm.xlu0 %6359, %v1621_v12   ;;  %v6388_v42 = vld [vmem:[%s6792_s18 + $0x94] ss:$8 sps:$4 sm:$0xff]   ;;  %v6390_v43 = vld [vmem:[%s6792_s18 + $0x90] ss:$8 sps:$4 sm:$0xff]   ;;  %v1638_v44 = vld [vmem:[%s8706_s8 + $0x88] sm:$0xff] }
  0x1d   : > { %v1637_v45 = vld [vmem:[%s8706_s8 + $0x80] sm:$0xff]  ;;  %v1640_v48 = vld [vmem:[%s8706_s8 + $0x98] sm:$0xff]  ;;  %v1639_v49 = vld [vmem:[%s8706_s8 + $0x90] sm:$0xff] }
  0x1e   : > { %829 = vmatpush1.bf16.msra.mxu0 %v6369_v15  ;;  %v6391_v46 = vld [vmem:[%s6792_s18 + $0xa4] ss:$8 sps:$4 sm:$0xff]   ;;  %v6394_v50 = vld [vmem:[%s6792_s18 + $0xb4] ss:$8 sps:$4 sm:$0xff]   ;;  %v6396_v51 = vld [vmem:[%s6792_s18 + $0xb0] ss:$8 sps:$4 sm:$0xff]  }
  0x1f   : > { %830 = vmatprep.subr.bf16.mxu0 %v6370_v17  ;;  %v1642_v52 = vld [vmem:[%s8706_s8 + $0xa8] sm:$0xff]  ;;  %v1641_v53 = vld [vmem:[%s8706_s8 + $0xa0] sm:$0xff]  ;;  %v1644_v56 = vld [vmem:[%s8706_s8 + $0xb8] sm:$0xff] }
  0x20   : > { %1670 = vperm.xlu1 %6360, %v1624_v14   ;;  %1665 = vperm.xlu0 %6359, %v1623_v16   ;;  %v6397_v54 = vld [vmem:[%s6792_s18 + $0xc4] ss:$8 sps:$4 sm:$0xff]   ;;  %v6399_v55 = vld [vmem:[%s6792_s18 + $0xc0] ss:$8 sps:$4 sm:$0xff]   ;;  %v1643_v57 = vld [vmem:[%s8706_s8 + $0xb0] sm:$0xff] }
  0x21   : > { %v6400_v58 = vld [vmem:[%s6792_s18 + $0xd4] ss:$8 sps:$4 sm:$0xff]   ;;  %v1646_v59 = vld [vmem:[%s8706_s8 + $0xc8] sm:$0xff]  ;;  %v1645_v60 = vld [vmem:[%s8706_s8 + $0xc0] sm:$0xff] }
  0x22   : > { %831 = vmatpush1.bf16.msra.mxu0 %v6372_v18  ;;  %v6402_v61 = vld [vmem:[%s6792_s18 + $0xd0] ss:$8 sps:$4 sm:$0xff]   ;;  %v6403_v62 = vld [vmem:[%s6792_s18 + $0xe4] ss:$8 sps:$4 sm:$0xff]   ;;  %v6405_v1 = vld [vmem:[%s6792_s18 + $0xe0] ss:$8 sps:$4 sm:$0xff]  }
  0x23   : > { %832 = vmatprep.subr.bf16.mxu0 %v6373_v21  ;;  %v1648_v63 = vld [vmem:[%s8706_s8 + $0xd8] sm:$0xff]  ;;  %v1647_v0 = vld [vmem:[%s8706_s8 + $0xd0] sm:$0xff]  ;;  %v1650_v4 = vld [vmem:[%s8706_s8 + $0xe8] sm:$0xff] }
  0x24   : > { %1680 = vperm.xlu1 %6360, %v1626_v19   ;;  %1675 = vperm.xlu0 %6359, %v1625_v20   ;;  %v6406_v3 = vld [vmem:[%s6792_s18 + $0xf4] ss:$8 sps:$4 sm:$0xff]   ;;  %v1649_v5 = vld [vmem:[%s8706_s8 + $0xe0] sm:$0xff]  ;;  %v6408_v6 = vld [vmem:[%s6792_s18 + $0xf0] ss:$8 sps:$4 sm:$0xff]   ;;  %s6094_s18 = sshll.u32 %s8933_s21, 10 }
  0x25   : > { %v6409_v7 = vld [vmem:[%s8701_s3] ss:$8 sps:$4 sm:$0xff]   ;;  %v1652_v8 = vld [vmem:[%s8706_s8 + $0xf8] sm:$0xff]  ;;  %v1651_v9 = vld [vmem:[%s8706_s8 + $0xf0] sm:$0xff] }
  0x26   : > { %833 = vmatpush1.bf16.msra.mxu0 %v6375_v22  ;;  %v6412_v10 = vld [vmem:[%s8701_s3 + $0x14] ss:$8 sps:$4 sm:$0xff]   ;;  %v2102_v11 = vld [vmem:[%s8707_s9 + $0x8] sm:$0xff]  ;;  %v2101_v12 = vld [vmem:[%s8707_s9] sm:$0xff] }
  0x27   : > { %834 = vmatprep.subr.bf16.mxu0 %v6376_v25  ;;  %v6414_v13 = vld [vmem:[%s8701_s3 + $0x10] ss:$8 sps:$4 sm:$0xff]   ;;  %v6415_v16 = vld [vmem:[%s8701_s3 + $0x24] ss:$8 sps:$4 sm:$0xff]   ;;  %v6417_v19 = vld [vmem:[%s8701_s3 + $0x20] ss:$8 sps:$4 sm:$0xff]  }
  0x28   : > { %1690 = vperm.xlu1 %6360, %v1628_v23   ;;  %1685 = vperm.xlu0 %6359, %v1627_v24   ;;  %v2104_v14 = vld [vmem:[%s8707_s9 + $0x18] sm:$0xff]  ;;  %v2103_v15 = vld [vmem:[%s8707_s9 + $0x10] sm:$0xff]  ;;  %v2106_v17 = vld [vmem:[%s8707_s9 + $0x28] sm:$0xff] }
  0x29   : > { %v2105_v18 = vld [vmem:[%s8707_s9 + $0x20] sm:$0xff]  ;;  %v2108_v20 = vld [vmem:[%s8707_s9 + $0x38] sm:$0xff]  ;;  %v2107_v21 = vld [vmem:[%s8707_s9 + $0x30] sm:$0xff] }
  0x2a   : > { %835 = vmatpush1.bf16.msra.mxu0 %v6378_v26  ;;  %v2110_v22 = vld [vmem:[%s8707_s9 + $0x48] sm:$0xff]  ;;  %v2109_v23 = vld [vmem:[%s8707_s9 + $0x40] sm:$0xff]  ;;  %v2112_v24 = vld [vmem:[%s8707_s9 + $0x58] sm:$0xff] }
  0x2b   : > { %836 = vmatprep.subr.bf16.mxu0 %v6379_v29  ;;  %v2111_v25 = vld [vmem:[%s8707_s9 + $0x50] sm:$0xff]  ;;  %v2114_v26 = vld [vmem:[%s8707_s9 + $0x68] sm:$0xff]  ;;  %v2121_v35 = vld [vmem:[%s8707_s9 + $0xa0] sm:$0xff] }
  0x2c   : > { %1700 = vperm.xlu1 %6360, %v1630_v27   ;;  %1695 = vperm.xlu0 %6359, %v1629_v28   ;;  %v2113_v27 = vld [vmem:[%s8707_s9 + $0x60] sm:$0xff]  ;;  %v2116_v28 = vld [vmem:[%s8707_s9 + $0x78] sm:$0xff]  ;;  %v2115_v29 = vld [vmem:[%s8707_s9 + $0x70] sm:$0xff] }
  0x2d   : > { %v2207_v2 = vld [vmem:[%s8707_s9 + $0x350] sm:$0xff] }
  0x2e   : > { %837 = vmatpush1.bf16.msra.mxu0 %v6381_v30  ;;  %v2118_v30 = vld [vmem:[%s8707_s9 + $0x88] sm:$0xff] }
  0x2f   : > { %838 = vmatprep.subr.bf16.mxu0 %v6382_v33  ;;  %v2119_v33 = vld [vmem:[%s8707_s9 + $0x90] sm:$0xff] }
  0x30   : > { %1710 = vperm.xlu1 %6360, %v1632_v31   ;;  %1705 = vperm.xlu0 %6359, %v1631_v32   ;;  %v2117_v31 = vld [vmem:[%s8707_s9 + $0x80] sm:$0xff]  ;;  %v2120_v32 = vld [vmem:[%s8707_s9 + $0x98] sm:$0xff] }
  0x32   : > { %839 = vmatpush1.bf16.msra.mxu0 %v6384_v34  ;;  %v2122_v34 = vld [vmem:[%s8707_s9 + $0xa8] sm:$0xff] }
  0x33   : > { %840 = vmatprep.subr.bf16.mxu0 %v6385_v38  ;;  %v2126_v38 = vld [vmem:[%s8707_s9 + $0xc8] sm:$0xff] }
  0x34   : > { %1720 = vperm.xlu1 %6360, %v1634_v36   ;;  %1715 = vperm.xlu0 %6359, %v1633_v37   ;;  %v2124_v36 = vld [vmem:[%s8707_s9 + $0xb8] sm:$0xff]  ;;  %v2123_v37 = vld [vmem:[%s8707_s9 + $0xb0] sm:$0xff] }
  0x36   : > { %841 = vmatpush1.bf16.msra.mxu0 %v6387_v39  ;;  %v2125_v39 = vld [vmem:[%s8707_s9 + $0xc0] sm:$0xff] }
  0x37   : > { %842 = vmatprep.subr.bf16.mxu0 %v6388_v42  ;;  %v2130_v42 = vld [vmem:[%s8707_s9 + $0xe8] sm:$0xff] }
  0x38   : > { %1730 = vperm.xlu1 %6360, %v1636_v40   ;;  %1725 = vperm.xlu0 %6359, %v1635_v41   ;;  %v2128_v40 = vld [vmem:[%s8707_s9 + $0xd8] sm:$0xff]  ;;  %v2127_v41 = vld [vmem:[%s8707_s9 + $0xd0] sm:$0xff] }
  0x3a   : > { %843 = vmatpush1.bf16.msra.mxu0 %v6390_v43  ;;  %v2129_v43 = vld [vmem:[%s8707_s9 + $0xe0] sm:$0xff] }
  0x3b   : > { %844 = vmatprep.subr.bf16.mxu0 %v6391_v46  ;;  %v2132_v46 = vld [vmem:[%s8707_s9 + $0xf8] sm:$0xff] }
  0x3c   : > { %1740 = vperm.xlu1 %6360, %v1638_v44   ;;  %1735 = vperm.xlu0 %6359, %v1637_v45  }
  0x3e   : > { %845 = vmatpush1.bf16.msra.mxu0 %v6393_v47  ;;  %v2131_v47 = vld [vmem:[%s8707_s9 + $0xf0] sm:$0xff] }
  0x3f   : > { %846 = vmatprep.subr.bf16.mxu0 %v6394_v50  ;;  %v2134_v50 = vld [vmem:[%s8707_s9 + $0x108] sm:$0xff] }
  0x40   : > { %1750 = vperm.xlu1 %6360, %v1640_v48   ;;  %1745 = vperm.xlu0 %6359, %v1639_v49  }
  0x42   : > { %847 = vmatpush1.bf16.msra.mxu0 %v6396_v51  ;;  %v2133_v51 = vld [vmem:[%s8707_s9 + $0x100] sm:$0xff] }
  0x43   : > { %848 = vmatprep.subr.bf16.mxu0 %v6397_v54  ;;  %v2135_v54 = vld [vmem:[%s8707_s9 + $0x110] sm:$0xff] }
  0x44   : > { %1760 = vperm.xlu1 %6360, %v1642_v52   ;;  %1755 = vperm.xlu0 %6359, %v1641_v53   ;;  %v2136_v53 = vld [vmem:[%s8707_s9 + $0x118] sm:$0xff] }
  0x46   : > { %849 = vmatpush1.bf16.msra.mxu0 %v6399_v55 }
  0x47   : > { %850 = vmatprep.subr.bf16.mxu0 %v6400_v58 }
  0x48   : > { %1770 = vperm.xlu1 %6360, %v1644_v56   ;;  %1765 = vperm.xlu0 %6359, %v1643_v57   ;;  %v2138_v56 = vld [vmem:[%s8707_s9 + $0x128] sm:$0xff]  ;;  %v2137_v57 = vld [vmem:[%s8707_s9 + $0x120] sm:$0xff] }
  0x4a   : > { %851 = vmatpush1.bf16.msra.mxu0 %v6402_v61  ;;  %v2139_v61 = vld [vmem:[%s8707_s9 + $0x130] sm:$0xff] }
  0x4b   : > { %852 = vmatprep.subr.bf16.mxu0 %v6403_v62 }
  0x4c   : > { %1780 = vperm.xlu1 %6360, %v1646_v59   ;;  %1775 = vperm.xlu0 %6359, %v1645_v60   ;;  %v2140_v60 = vld [vmem:[%s8707_s9 + $0x138] sm:$0xff] }
  0x4e   : > { %853 = vmatpush1.bf16.msra.mxu0 %v6405_v1 }
  0x4f   : > { %854 = vmatprep.subr.bf16.mxu0 %v6406_v3  ;;  %v2144_v3 = vld [vmem:[%s8707_s9 + $0x158] sm:$0xff] }
  0x50   : > { %1790 = vperm.xlu1 %6360, %v1648_v63   ;;  %1785 = vperm.xlu0 %6359, %v1647_v0   ;;  %v2142_v63 = vld [vmem:[%s8707_s9 + $0x148] sm:$0xff]  ;;  %v2141_v0 = vld [vmem:[%s8707_s9 + $0x140] sm:$0xff] }
  0x52   : > { %855 = vmatpush1.bf16.msra.mxu0 %v6408_v6 }
  0x54   : > { %1800 = vperm.xlu1 %6360, %v1650_v4   ;;  %1795 = vperm.xlu0 %6359, %v1649_v5   ;;  %v2143_v4 = vld [vmem:[%s8707_s9 + $0x150] sm:$0xff] }
  0x55   : > { %857 = vmatmul.mubr.bf16.vlgmr.msra.gmra.mrb[0].mxu0 %v6409_v7  ;;  %v2146_v7 = vld [vmem:[%s8707_s9 + $0x168] sm:$0xff] }
  0x56   : > { %866 = vmatprep.mubr.bf16.mxu0 %v6412_v10  ;;  %v2148_v10 = vld [vmem:[%s8707_s9 + $0x178] sm:$0xff] }
  0x58   : > { %1810 = vperm.xlu1 %6360, %v1652_v8   ;;  %1805 = vperm.xlu0 %6359, %v1651_v9   ;;  %v2145_v8 = vld [vmem:[%s8707_s9 + $0x160] sm:$0xff] }
  0x5c   : > { %2236 = vperm.xlu1 %6360, %v2102_v11   ;;  %2231 = vperm.xlu0 %6359, %v2101_v12   ;;  %v2147_v11 = vld [vmem:[%s8707_s9 + $0x170] sm:$0xff] }
  0x5d   : > { %867 = vmatmul.mubr.bf16.gmra.mrb[4].mxu0 %v6414_v13  ;;  %v2150_v13 = vld [vmem:[%s8707_s9 + $0x188] sm:$0xff] }
  0x5e   : > { %876 = vmatprep.mubr.bf16.mxu0 %v6415_v16 }
  0x60   : > { %2246 = vperm.xlu1 %6360, %v2104_v14   ;;  %2241 = vperm.xlu0 %6359, %v2103_v15   ;;  %v2149_v14 = vld [vmem:[%s8707_s9 + $0x180] sm:$0xff] }
  0x64   : > { %2256 = vperm.xlu1 %6360, %v2106_v17   ;;  %2251 = vperm.xlu0 %6359, %v2105_v18   ;;  %v2152_v17 = vld [vmem:[%s8707_s9 + $0x198] sm:$0xff]  ;;  %v2151_v18 = vld [vmem:[%s8707_s9 + $0x190] sm:$0xff] }
  0x65   : > { %877 = vmatmul.mubr.bf16.gmra.mrb[8].mxu0 %v6417_v19 }
  0x68   : > { %2266 = vperm.xlu1 %6360, %v2108_v20   ;;  %2261 = vperm.xlu0 %6359, %v2107_v21   ;;  %v2154_v20 = vld [vmem:[%s8707_s9 + $0x1a8] sm:$0xff]  ;;  %v2153_v21 = vld [vmem:[%s8707_s9 + $0x1a0] sm:$0xff] }
  0x6c   : > { %2276 = vperm.xlu1 %6360, %v2110_v22   ;;  %2271 = vperm.xlu0 %6359, %v2109_v23   ;;  %v2156_v23 = vld [vmem:[%s8707_s9 + $0x1b8] sm:$0xff] }
  0x70   : > { %2286 = vperm.xlu1 %6360, %v2112_v24   ;;  %2281 = vperm.xlu0 %6359, %v2111_v25   ;;  %v2155_v24 = vld [vmem:[%s8707_s9 + $0x1b0] sm:$0xff] }
  0x74   : > { %2296 = vperm.xlu1 %6360, %v2114_v26   ;;  %2291 = vperm.xlu0 %6359, %v2113_v27   ;;  %v2158_v27 = vld [vmem:[%s8707_s9 + $0x1c8] sm:$0xff] }
  0x78   : > { %2306 = vperm.xlu1 %6360, %v2116_v28   ;;  %2301 = vperm.xlu0 %6359, %v2115_v29   ;;  %v2157_v28 = vld [vmem:[%s8707_s9 + $0x1c0] sm:$0xff] }
  0x7c   : > { %2316 = vperm.xlu1 %6360, %v2118_v30   ;;  %2311 = vperm.xlu0 %6359, %v2117_v31   ;;  %v2160_v30 = vld [vmem:[%s8707_s9 + $0x1d8] sm:$0xff]  ;;  %v2159_v31 = vld [vmem:[%s8707_s9 + $0x1d0] sm:$0xff] }
  0x80   : > { %2326 = vperm.xlu1 %6360, %v2120_v32   ;;  %2321 = vperm.xlu0 %6359, %v2119_v33   ;;  %v2162_v33 = vld [vmem:[%s8707_s9 + $0x1e8] sm:$0xff] }
  0x84   : > { %2336 = vperm.xlu1 %6360, %v2122_v34   ;;  %2331 = vperm.xlu0 %6359, %v2121_v35   ;;  %v2161_v34 = vld [vmem:[%s8707_s9 + $0x1e0] sm:$0xff] }
  0x88   : > { %2346 = vperm.xlu1 %6360, %v2124_v36   ;;  %2341 = vperm.xlu0 %6359, %v2123_v37   ;;  %v2164_v37 = vld [vmem:[%s8707_s9 + $0x1f8] sm:$0xff] }
  0x8c   : > { %2356 = vperm.xlu1 %6360, %v2126_v38   ;;  %2351 = vperm.xlu0 %6359, %v2125_v39   ;;  %v2163_v38 = vld [vmem:[%s8707_s9 + $0x1f0] sm:$0xff] }
  0x8f   : > { %v7042_v44 = vpop.permute.xlu0 %606  ;;  %v7044_v45 = vpop.permute.xlu1 %616 }
  0x90   : > { %2366 = vperm.xlu1 %6360, %v2128_v40   ;;  %2361 = vperm.xlu0 %6359, %v2127_v41   ;;  %v2166_v40 = vld [vmem:[%s8707_s9 + $0x208] sm:$0xff]  ;;  %v2165_v41 = vld [vmem:[%s8707_s9 + $0x200] sm:$0xff] }
  0x93   : > { %v7052_v48 = vpop.permute.xlu0 %611  ;;  %v7054_v49 = vpop.permute.xlu1 %621 }
  0x94   : > { %2376 = vperm.xlu1 %6360, %v2130_v42   ;;  %2371 = vperm.xlu0 %6359, %v2129_v43   ;;  %v2168_v43 = vld [vmem:[%s8707_s9 + $0x218] sm:$0xff] }
  0x97   : > { %v7062_v52 = vpop.permute.xlu0 %626  ;;  %v7070_v55 = vpop.permute.xlu1 %631 }
  0x98   : > { %2386 = vperm.xlu1 %6360, %v2132_v46   ;;  %2381 = vperm.xlu0 %6359, %v2131_v47   ;;  %v2167_v46 = vld [vmem:[%s8707_s9 + $0x210] sm:$0xff] }
  0x9b   : > { %v7078_v58 = vpop.permute.xlu0 %1655  ;;  %v7080_v59 = vpop.permute.xlu1 %1660 }
  0x9c   : > { %2396 = vperm.xlu1 %6360, %v2134_v50   ;;  %2391 = vperm.xlu0 %6359, %v2133_v51   ;;  %v2170_v51 = vld [vmem:[%s8707_s9 + $0x228] sm:$0xff] }
  0x9f   : > { %v7088_v62 = vpop.permute.xlu0 %1665  ;;  %v7096_v1 = vpop.permute.xlu1 %1670 }
  0xa0   : > { %2406 = vperm.xlu1 %6360, %v2136_v53   ;;  %2401 = vperm.xlu0 %6359, %v2135_v54   ;;  %v2169_v53 = vld [vmem:[%s8707_s9 + $0x220] sm:$0xff] }
  0xa3   : > { %v7104_v5 = vpop.permute.xlu0 %1675  ;;  %v7106_v6 = vpop.permute.xlu1 %1680 }
  0xa4   : > { %2416 = vperm.xlu1 %6360, %v2138_v56   ;;  %2411 = vperm.xlu0 %6359, %v2137_v57   ;;  %v2172_v56 = vld [vmem:[%s8707_s9 + $0x238] sm:$0xff]  ;;  %v2171_v57 = vld [vmem:[%s8707_s9 + $0x230] sm:$0xff] }
  0xa7   : > { %v7114_v9 = vpop.permute.xlu0 %1685  ;;  %v7122_v12 = vpop.permute.xlu1 %1690 }
  0xa8   : > { %2426 = vperm.xlu1 %6360, %v2140_v60   ;;  %2421 = vperm.xlu0 %6359, %v2139_v61   ;;  %v2174_v61 = vld [vmem:[%s8707_s9 + $0x248] sm:$0xff] }
  0xab   : > { %v7130_v15 = vpop.permute.xlu0 %1695  ;;  %v7132_v16 = vpop.permute.xlu1 %1700 }
  0xac   : > { %2436 = vperm.xlu1 %6360, %v2142_v63   ;;  %2431 = vperm.xlu0 %6359, %v2141_v0   ;;  %v2173_v63 = vld [vmem:[%s8707_s9 + $0x240] sm:$0xff] }
  0xaf   : > { %v7140_v19 = vpop.permute.xlu0 %1705  ;;  %v7148_v22 = vpop.permute.xlu1 %1710 }
  0xb0   : > { %2446 = vperm.xlu1 %6360, %v2144_v3   ;;  %2441 = vperm.xlu0 %6359, %v2143_v4   ;;  %v2176_v4 = vld [vmem:[%s8707_s9 + $0x258] sm:$0xff] }
  0xb3   : > { %v7156_v25 = vpop.permute.xlu0 %1715  ;;  %v7158_v26 = vpop.permute.xlu1 %1720 }
  0xb4   : > { %2456 = vperm.xlu1 %6360, %v2146_v7   ;;  %2451 = vperm.xlu0 %6359, %v2145_v8   ;;  %v2175_v7 = vld [vmem:[%s8707_s9 + $0x250] sm:$0xff] }
  0xb7   : > { %v7166_v29 = vpop.permute.xlu0 %1725  ;;  %v7174_v32 = vpop.permute.xlu1 %1730 }
  0xb8   : > { %2466 = vperm.xlu1 %6360, %v2148_v10   ;;  %2461 = vperm.xlu0 %6359, %v2147_v11   ;;  %v2178_v10 = vld [vmem:[%s8707_s9 + $0x268] sm:$0xff]  ;;  %v2177_v11 = vld [vmem:[%s8707_s9 + $0x260] sm:$0xff] }
  0xbb   : > { %v7182_v35 = vpop.permute.xlu0 %1735  ;;  %v7184_v36 = vpop.permute.xlu1 %1740 }
  0xbc   : > { %2476 = vperm.xlu1 %6360, %v2150_v13   ;;  %2471 = vperm.xlu0 %6359, %v2149_v14   ;;  %v2180_v14 = vld [vmem:[%s8707_s9 + $0x278] sm:$0xff] }
  0xbf   : > { %v7192_v39 = vpop.permute.xlu0 %1745  ;;  %v7200_v42 = vpop.permute.xlu1 %1750 }
  0xc0   : > { %2486 = vperm.xlu1 %6360, %v2152_v17   ;;  %2481 = vperm.xlu0 %6359, %v2151_v18   ;;  %v2179_v17 = vld [vmem:[%s8707_s9 + $0x270] sm:$0xff] }
  0xc3   : > { %v7208_v47 = vpop.permute.xlu0 %1755  ;;  %v7210_v50 = vpop.permute.xlu1 %1760 }
  0xc4   : > { %2496 = vperm.xlu1 %6360, %v2154_v20   ;;  %2491 = vperm.xlu0 %6359, %v2153_v21   ;;  %v2182_v21 = vld [vmem:[%s8707_s9 + $0x288] sm:$0xff] }
  0xc7   : > { %v7218_v54 = vpop.permute.xlu0 %1765  ;;  %v7226_v60 = vpop.permute.xlu1 %1770 }
  0xc8   : > { %2506 = vperm.xlu1 %6360, %v2156_v23   ;;  %2501 = vperm.xlu0 %6359, %v2155_v24   ;;  %v2181_v23 = vld [vmem:[%s8707_s9 + $0x280] sm:$0xff] }
  0xcb   : > { %v7234_v0 = vpop.permute.xlu0 %1775  ;;  %v7236_v3 = vpop.permute.xlu1 %1780 }
  0xcc   : > { %2516 = vperm.xlu1 %6360, %v2158_v27   ;;  %2511 = vperm.xlu0 %6359, %v2157_v28   ;;  %v2184_v27 = vld [vmem:[%s8707_s9 + $0x298] sm:$0xff]  ;;  %v2183_v28 = vld [vmem:[%s8707_s9 + $0x290] sm:$0xff] }
  0xcf   : > { %v7244_v8 = vpop.permute.xlu0 %1785  ;;  %v7252_v13 = vpop.permute.xlu1 %1790 }
  0xd0   : > { %2526 = vperm.xlu1 %6360, %v2160_v30   ;;  %2521 = vperm.xlu0 %6359, %v2159_v31   ;;  %v2186_v31 = vld [vmem:[%s8707_s9 + $0x2a8] sm:$0xff] }
  0xd3   : > { %v7260_v18 = vpop.permute.xlu0 %1795  ;;  %v7262_v20 = vpop.permute.xlu1 %1800 }
  0xd4   : > { %2536 = vperm.xlu1 %6360, %v2162_v33   ;;  %2531 = vperm.xlu0 %6359, %v2161_v34   ;;  %v2185_v33 = vld [vmem:[%s8707_s9 + $0x2a0] sm:$0xff] }
  0xd7   : > { %v7270_v24 = vpop.permute.xlu0 %1805  ;;  %v7278_v30 = vpop.permute.xlu1 %1810 }
  0xd8   : > { %2546 = vperm.xlu1 %6360, %v2164_v37   ;;  %2541 = vperm.xlu0 %6359, %v2163_v38   ;;  %v2188_v38 = vld [vmem:[%s8707_s9 + $0x2b8] sm:$0xff] }
  0xdb   : > { %v7286_v34 = vpop.permute.xlu0 %2231  ;;  %v7288_v37 = vpop.permute.xlu1 %2236 }
  0xdc   : > { %2556 = vperm.xlu1 %6360, %v2166_v40   ;;  %2551 = vperm.xlu0 %6359, %v2165_v41   ;;  %v2187_v40 = vld [vmem:[%s8707_s9 + $0x2b0] sm:$0xff] }
  0xdf   : > { %v7296_v41 = vpop.permute.xlu0 %2241 }
  0xe0   : > { %2566 = vperm.xlu1 %6360, %v2168_v43   ;;  %2561 = vperm.xlu0 %6359, %v2167_v46   ;;  %v2190_v43 = vld [vmem:[%s8707_s9 + $0x2c8] sm:$0xff]  ;;  %v2189_v46 = vld [vmem:[%s8707_s9 + $0x2c0] sm:$0xff] }
  0xe4   : > { %2576 = vperm.xlu1 %6360, %v2170_v51   ;;  %2571 = vperm.xlu0 %6359, %v2169_v53   ;;  %v7304_v51 = vpop.permute.xlu1 %2246  ;;  %v2192_v53 = vld [vmem:[%s8707_s9 + $0x2d8] sm:$0xff] }
  0xe8   : > { %2586 = vperm.xlu1 %6360, %v2172_v56   ;;  %2581 = vperm.xlu0 %6359, %v2171_v57   ;;  %v2191_v56 = vld [vmem:[%s8707_s9 + $0x2d0] sm:$0xff]  ;;  %v7312_v57 = vpop.permute.xlu0 %2251 }
  0xec   : > { %2596 = vperm.xlu1 %6360, %v2174_v61   ;;  %2591 = vperm.xlu0 %6359, %v2173_v63   ;;  %v7314_v61 = vpop.permute.xlu1 %2256  ;;  %v2194_v63 = vld [vmem:[%s8707_s9 + $0x2e8] sm:$0xff] }
  0xf0   : > { %2606 = vperm.xlu1 %6360, %v2176_v4   ;;  %2601 = vperm.xlu0 %6359, %v2175_v7   ;;  %v2193_v4 = vld [vmem:[%s8707_s9 + $0x2e0] sm:$0xff]  ;;  %v7322_v7 = vpop.permute.xlu0 %2261 }
  0xf4   : > { %2616 = vperm.xlu1 %6360, %v2178_v10   ;;  %2611 = vperm.xlu0 %6359, %v2177_v11   ;;  %v2196_v10 = vld [vmem:[%s8707_s9 + $0x2f8] sm:$0xff]  ;;  %v2195_v11 = vld [vmem:[%s8707_s9 + $0x2f0] sm:$0xff] }
  0xf8   : > { %2626 = vperm.xlu1 %6360, %v2180_v14   ;;  %2621 = vperm.xlu0 %6359, %v2179_v17   ;;  %v7330_v14 = vpop.permute.xlu1 %2266  ;;  %v2198_v17 = vld [vmem:[%s8707_s9 + $0x308] sm:$0xff] }
  0xfc   : > { %2636 = vperm.xlu1 %6360, %v2182_v21   ;;  %2631 = vperm.xlu0 %6359, %v2181_v23   ;;  %v2197_v21 = vld [vmem:[%s8707_s9 + $0x300] sm:$0xff]  ;;  %v7338_v23 = vpop.permute.xlu0 %2271 }
 0x100   : > { %2646 = vperm.xlu1 %6360, %v2184_v27   ;;  %2641 = vperm.xlu0 %6359, %v2183_v28   ;;  %v7340_v27 = vpop.permute.xlu1 %2276  ;;  %v2200_v28 = vld [vmem:[%s8707_s9 + $0x318] sm:$0xff] }
 0x104   : > { %2656 = vperm.xlu1 %6360, %v2186_v31   ;;  %2651 = vperm.xlu0 %6359, %v2185_v33   ;;  %v2199_v31 = vld [vmem:[%s8707_s9 + $0x310] sm:$0xff]  ;;  %v7348_v33 = vpop.permute.xlu0 %2281 }
 0x105   : > { %8779 = vst [vmem:[#allocation2_spill] sm:$0xff] %v7348_v33 }
 0x108   : > { %2666 = vperm.xlu1 %6360, %v2188_v38   ;;  %2661 = vperm.xlu0 %6359, %v2187_v40   ;;  %v2202_v38 = vld [vmem:[%s8707_s9 + $0x328] sm:$0xff]  ;;  %v2201_v40 = vld [vmem:[%s8707_s9 + $0x320] sm:$0xff] }
 0x10c   : > { %2676 = vperm.xlu1 %6360, %v2190_v43   ;;  %2671 = vperm.xlu0 %6359, %v2189_v46   ;;  %v7356_v43 = vpop.permute.xlu1 %2286  ;;  %v2204_v46 = vld [vmem:[%s8707_s9 + $0x338] sm:$0xff] }
 0x10d   : > { %8780 = vst [vmem:[#allocation3_spill] sm:$0xff] %v7356_v43 }
 0x110   : > { %2686 = vperm.xlu1 %6360, %v2192_v53   ;;  %2681 = vperm.xlu0 %6359, %v2191_v56   ;;  %v2203_v53 = vld [vmem:[%s8707_s9 + $0x330] sm:$0xff]  ;;  %v7364_v56 = vpop.permute.xlu0 %2291 }
 0x111   : > { %8781 = vst [vmem:[#allocation4_spill] sm:$0xff] %v7364_v56  ;;  %v2209_v56 = vld [vmem:[%s8707_s9 + $0x360] sm:$0xff] }
 0x114   : > { %2696 = vperm.xlu1 %6360, %v2194_v63   ;;  %2691 = vperm.xlu0 %6359, %v2193_v4   ;;  %v7366_v63 = vpop.permute.xlu1 %2296 }
 0x115   : > { %8782 = vst [vmem:[#allocation5_spill] sm:$0xff] %v7366_v63 }
 0x118   : > { %2706 = vperm.xlu1 %6360, %v2196_v10   ;;  %2701 = vperm.xlu0 %6359, %v2195_v11   ;;  %v2206_v10 = vld [vmem:[%s8707_s9 + $0x348] sm:$0xff]  ;;  %v2205_v11 = vld [vmem:[%s8707_s9 + $0x340] sm:$0xff]  ;;  %v7385_v63 = vpop.permute.xlu1 %2306 }
 0x119   : > { %8784 = vst [vmem:[#allocation7_spill] sm:$0xff] %v7385_v63 }
 0x11c   : > { %2716 = vperm.xlu1 %6360, %v2198_v17   ;;  %2711 = vperm.xlu0 %6359, %v2197_v21  }
 0x120   : > { %2726 = vperm.xlu1 %6360, %v2200_v28   ;;  %2721 = vperm.xlu0 %6359, %v2199_v31   ;;  %v7375_v28 = vpop.permute.xlu0 %2301 }
 0x121   : > { %8783 = vst [vmem:[#allocation6_spill] sm:$0xff] %v7375_v28 }
 0x124   : > { %2736 = vperm.xlu1 %6360, %v2202_v38   ;;  %2731 = vperm.xlu0 %6359, %v2201_v40   ;;  %v7394_v33 = vpop.permute.xlu0 %2311 }
 0x128   : > { %2746 = vperm.xlu1 %6360, %v2204_v46   ;;  %2741 = vperm.xlu0 %6359, %v2203_v53   ;;  %v858_v4 = vpop.f32.mrb[0].mxu0  ;;  %v2208_v53 = vld [vmem:[%s8707_s9 + $0x358] sm:$0xff] }
 0x129   : > { %v860_v17 = vpop.f32.mrb[1].mxu0  ;;  %v859_v21 = vadd.f32 %v858_v4, %v7042_v44 }
 0x12a   : > { %v861_v31 = vadd.f32 %v860_v17, %v7042_v44  ;;  %v862_v38 = vpop.f32.mrb[2].mxu0 }
 0x12b   : > { %v863_v40 = vadd.f32 %v862_v38, %v7052_v48  ;;  %v864_v46 = vpop.f32.mrb[3].mxu0  ;;  %v887_v28 = vmax.f32 %v859_v21, 0.0  ;;  %v2210_v38 = vld [vmem:[%s8707_s9 + $0x368] sm:$0xff] }
 0x12c   : > { %2756 = vperm.xlu1 %6360, %v2206_v10   ;;  %2751 = vperm.xlu0 %6359, %v2205_v11   ;;  %v865_v4 = vadd.f32 %v864_v46, %v7052_v48  ;;  %v888_v10 = vmax.f32 %v861_v31, 0.0  ;;  %v7397_v31 = vpop.permute.xlu1 %2316 }
 0x12d   : > { %v889_v44 = vmax.f32 %v863_v40, 0.0 }
 0x12e   : > { %v890_v11 = vmax.f32 %v865_v4, 0.0  ;;  %v2211_v4 = vld [vmem:[%s8707_s9 + $0x370] sm:$0xff] }
 0x12f   : > { %v931_v43 = vpack.c.bf16 %v889_v44, %v887_v28  ;;  %v2212_v28 = vld [vmem:[%s8707_s9 + $0x378] sm:$0xff] }
 0x130   : > { %2766 = vperm.xlu1 %6360, %v2208_v53   ;;  %2761 = vperm.xlu0 %6359, %v2207_v2   ;;  %v868_v17 = vpop.f32.mrb[4].mxu0  ;;  %v932_v48 = vpack.c.bf16 %v890_v11, %v888_v10 }
 0x131   : > { %v870_v63 = vpop.f32.mrb[5].mxu0  ;;  %v869_v21 = vadd.f32 %v868_v17, %v7044_v45 }
 0x132   : > { %v871_v2 = vadd.f32 %v870_v63, %v7044_v45  ;;  %v872_v40 = vpop.f32.mrb[6].mxu0  ;;  %1066 = vmatprep.subr.bf16.mxu1 %v932_v48  ;;  %v7408_v63 = vpop.permute.xlu0 %2321  ;;  %v2214_v48 = vld [vmem:[%s8707_s9 + $0x388] sm:$0xff] }
 0x133   : > { %v873_v46 = vadd.f32 %v872_v40, %v7054_v49  ;;  %v874_v53 = vpop.f32.mrb[7].mxu0  ;;  %1067 = vmatpush1.bf16.msra.mxu1 %v931_v43  ;;  %v891_v10 = vmax.f32 %v869_v21, 0.0  ;;  %v2213_v40 = vld [vmem:[%s8707_s9 + $0x380] sm:$0xff] }
 0x134   : > { %2776 = vperm.xlu1 %6360, %v2210_v38   ;;  %2771 = vperm.xlu0 %6359, %v2209_v56   ;;  %v875_v44 = vadd.f32 %v874_v53, %v7054_v49  ;;  %v892_v56 = vmax.f32 %v871_v2, 0.0  ;;  %v7416_v49 = vpop.permute.xlu1 %2326 }
 0x135   : > { %v893_v45 = vmax.f32 %v873_v46, 0.0 }
 0x136   : > { %v894_v11 = vmax.f32 %v875_v44, 0.0  ;;  %v2216_v44 = vld [vmem:[%s8707_s9 + $0x398] sm:$0xff] }
 0x137   : > { %v933_v17 = vpack.c.bf16 %v893_v45, %v891_v10  ;;  %v2215_v10 = vld [vmem:[%s8707_s9 + $0x390] sm:$0xff]  ;;  %v7427_v45 = vpop.permute.xlu0 %2331 }
 0x138   : > { %2786 = vperm.xlu1 %6360, %v2212_v28   ;;  %2781 = vperm.xlu0 %6359, %v2211_v4   ;;  %v878_v38 = vpop.f32.mrb[8].mxu0  ;;  %v934_v43 = vpack.c.bf16 %v894_v11, %v892_v56  ;;  %8785 = vst [vmem:[#allocation8_spill] sm:$0xff] %v7427_v45 }
 0x139   : > { %v880_v21 = vpop.f32.mrb[9].mxu0  ;;  %v879_v46 = vadd.f32 %v878_v38, %v7062_v52  ;;  %v7430_v38 = vpop.permute.xlu1 %2336 }
 0x13a   : > { %v881_v2 = vadd.f32 %v880_v21, %v7062_v52  ;;  %v882_v53 = vpop.f32.mrb[10].mxu0  ;;  %1068 = vmatprep.subr.bf16.mxu1 %v934_v43  ;;  %v2218_v21 = vld [vmem:[%s8707_s9 + $0x3a8] sm:$0xff] }
 0x13b   : > { %v883_v28 = vadd.f32 %v882_v53, %v7070_v55  ;;  %v884_v4 = vpop.f32.mrb[11].mxu0  ;;  %1069 = vmatpush1.bf16.msra.mxu1 %v933_v17  ;;  %v895_v52 = vmax.f32 %v879_v46, 0.0  ;;  %v2217_v53 = vld [vmem:[%s8707_s9 + $0x3a0] sm:$0xff]  ;;  %v7441_v17 = vpop.permute.xlu0 %2341  ;;  %v2220_v46 = vld [vmem:[%s8707_s9 + $0x3b8] sm:$0xff] }
 0x13c   : > { %2796 = vperm.xlu1 %6360, %v2214_v48   ;;  %2791 = vperm.xlu0 %6359, %v2213_v40   ;;  %v885_v56 = vadd.f32 %v884_v4, %v7070_v55  ;;  %v896_v48 = vmax.f32 %v881_v2, 0.0  ;;  %v6421_v55 = vld [vmem:[%s8699_s1 + $0x4] ss:$8 sps:$4 sm:$0xff]   ;;  %8786 = vst [vmem:[#allocation9_spill] sm:$0xff] %v7441_v17  ;;  %v2219_v2 = vld [vmem:[%s8707_s9 + $0x3b0] sm:$0xff] }
 0x13d   : > { %v897_v11 = vmax.f32 %v883_v28, 0.0  ;;  %v6418_v28 = vld [vmem:[%s8702_s4] sm:$0xff]   ;;  %v7452_v4 = vpop.permute.xlu1 %2346 }
 0x13e   : > { %v898_v40 = vmax.f32 %v885_v56, 0.0  ;;  %8787 = vst [vmem:[#allocation10_spill] sm:$0xff] %v7452_v4  ;;  %v2221_v56 = vld [vmem:[%s8707_s9 + $0x3c0] sm:$0xff] }
 0x13f   : > { %v935_v43 = vpack.c.bf16 %v897_v11, %v895_v52  ;;  %v7467_v52 = vpop.permute.xlu0 %2351  ;;  %v8789_v11 = vmov 0  }
 0x140   : > { %2806 = vperm.xlu1 %6360, %v2216_v44   ;;  %2801 = vperm.xlu0 %6359, %v2215_v10   ;;  %v936_v45 = vpack.c.bf16 %v898_v40, %v896_v48  ;;  %v6419_v44 = vld [vmem:[%s8699_s1] ss:$8 sps:$4 sm:$0xff]   ;;  %v6428_v10 = vld [vmem:[%s8699_s1 + $0x14] ss:$8 sps:$4 sm:$0xff]   ;;  %8788 = vst [vmem:[#allocation11_spill] sm:$0xff] %v7467_v52 }
 0x141   : > { %v6426_v48 = vld [vmem:[%s8699_s1 + $0x10] ss:$8 sps:$4 sm:$0xff]   ;;  %v6435_v40 = vld [vmem:[%s8699_s1 + $0x24] ss:$8 sps:$4 sm:$0xff]  }
 0x142   : > { %1070 = vmatprep.subr.bf16.mxu1 %v936_v45  ;;  %v2222_v45 = vld [vmem:[%s8707_s9 + $0x3c8] sm:$0xff] }
 0x143   : > { %1071 = vmatpush1.bf16.msra.mxu1 %v935_v43  ;;  %v7476_v43 = vpop.permute.xlu1 %2356 }
 0x144   : > { %2816 = vperm.xlu1 %6360, %v2218_v21   ;;  %2811 = vperm.xlu0 %6359, %v2217_v53   ;;  %8790 = vst [vmem:[#allocation12_spill] sm:$0xff] %v7476_v43  ;;  %v2224_v21 = vld [vmem:[%s8707_s9 + $0x3d8] sm:$0xff]  ;;  %v2223_v53 = vld [vmem:[%s8707_s9 + $0x3d0] sm:$0xff] }
 0x145   : > { %1428 = vmatprep.subr.bf16.mxu1 %v6421_v55  ;;  %v6422_v55 = vld [vmem:[%s8702_s4 + $0x8] sm:$0xff]  }
 0x146   : > { %5770 = vmatmul.mubr.msk.bf16.vlgmr.msra.gmra.mrb[0].mxu1 %vm1017_vm0, %v6418_v28  ;;  %v7493_v28 = vpop.permute.xlu0 %2361 }
 0x147   : > { %1429 = vmatpush1.bf16.msra.mxu1 %v6419_v44  ;;  %1108 = vmatprep.mubr.bf16.mxu1 %v8789_v11  ;;  %8791 = vst [vmem:[#allocation13_spill] sm:$0xff] %v7493_v28  ;;  %v2226_v44 = vld [vmem:[%s8707_s9 + $0x3e8] sm:$0xff] }
 0x148   : > { %2826 = vperm.xlu1 %6360, %v2220_v46   ;;  %2821 = vperm.xlu0 %6359, %v2219_v2   ;;  %v6433_v46 = vld [vmem:[%s8699_s1 + $0x20] ss:$8 sps:$4 sm:$0xff]   ;;  %v6442_v2 = vld [vmem:[%s8699_s1 + $0x34] ss:$8 sps:$4 sm:$0xff]  }
 0x149   : > { %1430 = vmatprep.subr.bf16.mxu1 %v6428_v10  ;;  %v2225_v10 = vld [vmem:[%s8707_s9 + $0x3e0] sm:$0xff] }
 0x14b   : > { %1431 = vmatpush1.bf16.msra.mxu1 %v6426_v48  ;;  %v2228_v48 = vld [vmem:[%s8707_s9 + $0x3f8] sm:$0xff] }
 0x14c   : > { %2836 = vperm.xlu1 %6360, %v2222_v45   ;;  %2831 = vperm.xlu0 %6359, %v2221_v56   ;;  %v7502_v45 = vpop.permute.xlu1 %2366  ;;  %v6440_v56 = vld [vmem:[%s8699_s1 + $0x30] ss:$8 sps:$4 sm:$0xff]  }
 0x14d   : > { %1432 = vmatprep.subr.bf16.mxu1 %v6435_v40  ;;  %8792 = vst [vmem:[#allocation14_spill] sm:$0xff] %v7502_v45  ;;  %v2227_v40 = vld [vmem:[%s8707_s9 + $0x3f0] sm:$0xff] }
 0x14e   : > { %5771 = vmatmul.mubr.msk.bf16.gmra.mrb[4].mxu1 %vm1017_vm0, %v6422_v55 }
 0x14f   : > { %1118 = vmatprep.mubr.bf16.mxu1 %v8789_v11  ;;  %1433 = vmatpush1.bf16.msra.mxu1 %v6433_v46  ;;  %v5338_v46 = vld [vmem:[%s8708_s10] sm:$0xff] }
 0x150   : > { %2846 = vperm.xlu1 %6360, %v2224_v21   ;;  %2841 = vperm.xlu0 %6359, %v2223_v53   ;;  %v6423_v21 = vld [vmem:[%s8702_s4 + $0x10] sm:$0xff]   ;;  %v7517_v53 = vpop.permute.xlu0 %2371  ;;  %v7519_v55 = vpop.permute.xlu1 %2376 }
 0x151   : > { %1434 = vmatprep.subr.bf16.mxu1 %v6442_v2  ;;  %8793 = vst [vmem:[#allocation15_spill] sm:$0xff] %v7517_v53  ;;  %8794 = vst [vmem:[#allocation16_spill] sm:$0xff] %v7519_v55  ;;  %v6464_v53 = vld [vmem:[%s8703_s5 + $0x4] ss:$8 sps:$4 sm:$0xff]  }
 0x152   : > { %3541 = vmatprep.mubr.bf16.mxu0 %v6464_v53 }
 0x153   : > { %1435 = vmatpush1.bf16.msra.mxu1 %v6440_v56  ;;  %v6429_v56 = vld [vmem:[%s8702_s4 + $0x28] sm:$0xff]  }
 0x154   : > { %2856 = vperm.xlu1 %6360, %v2226_v44   ;;  %2851 = vperm.xlu0 %6359, %v2225_v10   ;;  %v7526_v2 = vpop.permute.xlu0 %2381  ;;  %v6424_v44 = vld [vmem:[%s8702_s4 + $0x18] sm:$0xff]   ;;  %v6425_v10 = vld [vmem:[%s8702_s4 + $0x20] sm:$0xff]  }
 0x155   : > { %8795 = vst [vmem:[#allocation17_spill] sm:$0xff] %v7526_v2 }
 0x156   : > { %5772 = vmatmul.mubr.msk.bf16.gmra.mrb[8].mxu1 %vm1017_vm0, %v6423_v21  ;;  %v6432_v21 = vld [vmem:[%s8702_s4 + $0x40] sm:$0xff]  }
 0x157   : > { %1128 = vmatprep.mubr.bf16.mxu1 %v8789_v11 }
 0x158   : > { %2866 = vperm.xlu1 %6360, %v2228_v48   ;;  %2861 = vperm.xlu0 %6359, %v2227_v40   ;;  %v6430_v48 = vld [vmem:[%s8702_s4 + $0x30] sm:$0xff]   ;;  %v6431_v40 = vld [vmem:[%s8702_s4 + $0x38] sm:$0xff]  }
 0x15c   : > { %5341 = vperm.xlu0 %6359, %v5338_v46   ;;  %v6436_v46 = vld [vmem:[%s8702_s4 + $0x48] sm:$0xff]  }
 0x15e   : > { %5773 = vmatmul.mubr.msk.bf16.gmra.mrb[12].mxu1 %vm1017_vm0, %v6424_v44  ;;  %v6437_v44 = vld [vmem:[%s8702_s4 + $0x50] sm:$0xff]  }
 0x15f   : > { %1138 = vmatprep.mubr.bf16.mxu1 %v8789_v11 }
 0x166   : > { %5774 = vmatmul.mubr.msk.bf16.gmra.mrb[16].mxu1 %vm1017_vm0, %v6425_v10  ;;  %v6438_v10 = vld [vmem:[%s8702_s4 + $0x58] sm:$0xff]  }
 0x167   : > { %1148 = vmatprep.mubr.bf16.mxu1 %v8789_v11 }
 0x16e   : > { %5775 = vmatmul.mubr.msk.bf16.gmra.mrb[20].mxu1 %vm1017_vm0, %v6429_v56  ;;  %v6439_v56 = vld [vmem:[%s8702_s4 + $0x60] sm:$0xff]  }
 0x16f   : > { %1158 = vmatprep.mubr.bf16.mxu1 %v8789_v11 }
 0x176   : > { %5776 = vmatmul.mubr.msk.bf16.gmra.mrb[24].mxu1 %vm1017_vm0, %v6430_v48  ;;  %v6443_v48 = vld [vmem:[%s8702_s4 + $0x68] sm:$0xff]  }
 0x177   : > { %1168 = vmatprep.mubr.bf16.mxu1 %v8789_v11 }
 0x17e   : > { %5777 = vmatmul.mubr.msk.bf16.gmra.mrb[28].mxu1 %vm1017_vm0, %v6431_v40  ;;  %v6444_v40 = vld [vmem:[%s8702_s4 + $0x70] sm:$0xff]  }
 0x17f   : > { %1178 = vmatprep.mubr.bf16.mxu1 %v8789_v11 }
 0x186   : > { %5778 = vmatmul.mubr.msk.bf16.gmra.mrb[32].mxu1 %vm1017_vm0, %v6432_v21  ;;  %v6445_v21 = vld [vmem:[%s8702_s4 + $0x78] sm:$0xff]  }
 0x187   : > { %1188 = vmatprep.mubr.bf16.mxu1 %v8789_v11 }
 0x18e   : > { %5779 = vmatmul.mubr.msk.bf16.gmra.mrb[36].mxu1 %vm1017_vm0, %v6436_v46  ;;  %v6446_v46 = vld [vmem:[%s6941_s16] sm:$0xff]  }
 0x18f   : > { %1198 = vmatprep.mubr.bf16.mxu1 %v8789_v11 }
 0x196   : > { %5780 = vmatmul.mubr.msk.bf16.gmra.mrb[40].mxu1 %vm1017_vm0, %v6437_v44  ;;  %v6447_v44 = vld [vmem:[%s6941_s16 + $0x8] sm:$0xff]  }
 0x197   : > { %1208 = vmatprep.mubr.bf16.mxu1 %v8789_v11 }
 0x19e   : > { %5781 = vmatmul.mubr.msk.bf16.gmra.mrb[44].mxu1 %vm1017_vm0, %v6438_v10  ;;  %v6448_v10 = vld [vmem:[%s6941_s16 + $0x10] sm:$0xff]  }
 0x19f   : > { %1218 = vmatprep.mubr.bf16.mxu1 %v8789_v11 }
 0x1a6   : > { %5782 = vmatmul.mubr.msk.bf16.gmra.mrb[48].mxu1 %vm1017_vm0, %v6439_v56  ;;  %v6449_v56 = vld [vmem:[%s6941_s16 + $0x18] sm:$0xff]  }
 0x1a7   : > { %1228 = vmatprep.mubr.bf16.mxu1 %v8789_v11 }
 0x1ae   : > { %5783 = vmatmul.mubr.msk.bf16.gmra.mrb[52].mxu1 %vm1017_vm0, %v6443_v48  ;;  %v6450_v48 = vld [vmem:[%s6941_s16 + $0x20] sm:$0xff]  }
 0x1af   : > { %1238 = vmatprep.mubr.bf16.mxu1 %v8789_v11 }
 0x1b6   : > { %5784 = vmatmul.mubr.msk.bf16.gmra.mrb[56].mxu1 %vm1017_vm0, %v6444_v40  ;;  %v6451_v40 = vld [vmem:[%s6941_s16 + $0x28] sm:$0xff]  }
 0x1b7   : > { %1248 = vmatprep.mubr.bf16.mxu1 %v8789_v11 }
 0x1be   : > { %5785 = vmatmul.mubr.msk.bf16.gmra.mrb[60].mxu1 %vm1017_vm0, %v6445_v21  ;;  %v6452_v21 = vld [vmem:[%s6941_s16 + $0x30] sm:$0xff]  }
 0x1bf   : > { %1460 = vmatprep.mubr.bf16.mxu1 %v8789_v11 }
 0x1c6   : > { %5810 = vmatmul.mubr.msk.bf16.vlgmr.msra.gmra.mrb[0].mxu1 %vm1379_vm1, %v6446_v46  ;;  %v6453_v46 = vld [vmem:[%s6941_s16 + $0x38] sm:$0xff]  }
 0x1c7   : > { %1470 = vmatprep.mubr.bf16.mxu1 %v8789_v11 }
 0x1ce   : > { %5811 = vmatmul.mubr.msk.bf16.gmra.mrb[4].mxu1 %vm1379_vm1, %v6447_v44  ;;  %v6454_v44 = vld [vmem:[%s6941_s16 + $0x40] sm:$0xff]  }
 0x1cf   : > { %1480 = vmatprep.mubr.bf16.mxu1 %v8789_v11 }
 0x1d6   : > { %5812 = vmatmul.mubr.msk.bf16.gmra.mrb[8].mxu1 %vm1379_vm1, %v6448_v10  ;;  %v6455_v10 = vld [vmem:[%s6941_s16 + $0x48] sm:$0xff]  }
 0x1d7   : > { %1490 = vmatprep.mubr.bf16.mxu1 %v8789_v11 }
 0x1de   : > { %5813 = vmatmul.mubr.msk.bf16.gmra.mrb[12].mxu1 %vm1379_vm1, %v6449_v56  ;;  %v6456_v56 = vld [vmem:[%s6941_s16 + $0x50] sm:$0xff]  }
 0x1df   : > { %1500 = vmatprep.mubr.bf16.mxu1 %v8789_v11 }
 0x1e6   : > { %5814 = vmatmul.mubr.msk.bf16.gmra.mrb[16].mxu1 %vm1379_vm1, %v6450_v48  ;;  %v6457_v48 = vld [vmem:[%s6941_s16 + $0x58] sm:$0xff]  }
 0x1e7   : > { %1510 = vmatprep.mubr.bf16.mxu1 %v8789_v11 }
 0x1ee   : > { %5815 = vmatmul.mubr.msk.bf16.gmra.mrb[20].mxu1 %vm1379_vm1, %v6451_v40  ;;  %v6458_v40 = vld [vmem:[%s6941_s16 + $0x60] sm:$0xff]  }
 0x1ef   : > { %1520 = vmatprep.mubr.bf16.mxu1 %v8789_v11 }
 0x1f6   : > { %5816 = vmatmul.mubr.msk.bf16.gmra.mrb[24].mxu1 %vm1379_vm1, %v6452_v21  ;;  %v6459_v21 = vld [vmem:[%s6941_s16 + $0x68] sm:$0xff]  }
 0x1f7   : > { %1530 = vmatprep.mubr.bf16.mxu1 %v8789_v11 }
 0x1fe   : > { %5817 = vmatmul.mubr.msk.bf16.gmra.mrb[28].mxu1 %vm1379_vm1, %v6453_v46  ;;  %v6460_v46 = vld [vmem:[%s6941_s16 + $0x70] sm:$0xff]  }
 0x1ff   : > { %1540 = vmatprep.mubr.bf16.mxu1 %v8789_v11 }
 0x206   : > { %5818 = vmatmul.mubr.msk.bf16.gmra.mrb[32].mxu1 %vm1379_vm1, %v6454_v44  ;;  %v6461_v44 = vld [vmem:[%s6941_s16 + $0x78] sm:$0xff]   ;;  %s8097_s16 = scalar_lea.vmem %s8709_s11, %s6094_s18 }
 0x207   : > { %1550 = vmatprep.mubr.bf16.mxu1 %v8789_v11 }
 0x20e   : > { %5819 = vmatmul.mubr.msk.bf16.gmra.mrb[36].mxu1 %vm1379_vm1, %v6455_v10 }
 0x20f   : > { %1560 = vmatprep.mubr.bf16.mxu1 %v8789_v11 }
 0x216   : > { %5820 = vmatmul.mubr.msk.bf16.gmra.mrb[40].mxu1 %vm1379_vm1, %v6456_v56 }
 0x217   : > { %1570 = vmatprep.mubr.bf16.mxu1 %v8789_v11 }
 0x21e   : > { %5821 = vmatmul.mubr.msk.bf16.gmra.mrb[44].mxu1 %vm1379_vm1, %v6457_v48 }
 0x21f   : > { %1580 = vmatprep.mubr.bf16.mxu1 %v8789_v11 }
 0x226   : > { %5822 = vmatmul.mubr.msk.bf16.gmra.mrb[48].mxu1 %vm1379_vm1, %v6458_v40 }
 0x227   : > { %1590 = vmatprep.mubr.bf16.mxu1 %v8789_v11 }
 0x22e   : > { %5823 = vmatmul.mubr.msk.bf16.gmra.mrb[52].mxu1 %vm1379_vm1, %v6459_v21 }
 0x22f   : > { %1600 = vmatprep.mubr.bf16.mxu1 %v8789_v11 }
 0x236   : > { %5824 = vmatmul.mubr.msk.bf16.gmra.mrb[56].mxu1 %vm1379_vm1, %v6460_v46 }
 0x237   : > { %1610 = vmatprep.mubr.bf16.mxu1 %v8789_v11  ;;  %v6467_v11 = vld [vmem:[%s8703_s5 + $0x364] ss:$8 sps:$4 sm:$0xff]  }
 0x23e   : > { %5825 = vmatmul.mubr.msk.bf16.gmra.mrb[60].mxu1 %vm1379_vm1, %v6461_v44 }
 0x23f   : > { %4081 = vmatprep.mubr.bf16.mxu1 %v6467_v11 }
 0x299   : > { %v1462_v10 = vpop.f32.mrb[0].mxu1 }
 0x29a   : > { %v1813_v56 = vadd.f32 %v7078_v58, %v1462_v10  ;;  %v1464_v48 = vpop.f32.mrb[1].mxu1 }
 0x29b   : > { %v1814_v40 = vadd.f32 %v7078_v58, %v1464_v48  ;;  %v1466_v2 = vpop.f32.mrb[2].mxu1 }
 0x29c   : > { %v1815_v55 = vadd.f32 %v7080_v59, %v1466_v2  ;;  %v1468_v21 = vpop.f32.mrb[3].mxu1  ;;  %v1877_v44 = vmax.f32 %v1813_v56, 0.0 }
 0x29d   : > { %v1816_v46 = vadd.f32 %v7080_v59, %v1468_v21  ;;  %v1878_v10 = vmax.f32 %v1814_v40, 0.0 }
 0x29e   : > { %v1879_v45 = vmax.f32 %v1815_v55, 0.0 }
 0x29f   : > { %v1880_v28 = vmax.f32 %v1816_v46, 0.0 }
 0x2a0   : > { %v2069_v58 = vpack.c.bf16 %v1879_v45, %v1877_v44 }
 0x2a1   : > { %v2070_v48 = vpack.c.bf16 %v1880_v28, %v1878_v10  ;;  %v1472_v2 = vpop.f32.mrb[4].mxu1 }
 0x2a2   : > { %v1817_v43 = vadd.f32 %v7088_v62, %v1472_v2  ;;  %v1474_v52 = vpop.f32.mrb[5].mxu1 }
 0x2a3   : > { %v1818_v4 = vadd.f32 %v7088_v62, %v1474_v52  ;;  %v1476_v17 = vpop.f32.mrb[6].mxu1  ;;  %3509 = vmatprep.subr.bf16.mxu0 %v2070_v48  ;;  %6224 = vmatprep.subr.bf16.mxu1 %v2070_v48 }
 0x2a4   : > { %v1819_v59 = vadd.f32 %v7096_v1, %v1476_v17  ;;  %v1478_v21 = vpop.f32.mrb[7].mxu1  ;;  %3510 = vmatpush1.bf16.msra.mxu0 %v2069_v58  ;;  %6240 = vmatpush1.bf16.msra.mxu1 %v2069_v58  ;;  %v1881_v55 = vmax.f32 %v1817_v43, 0.0 }
 0x2a5   : > { %v1820_v53 = vadd.f32 %v7096_v1, %v1478_v21  ;;  %v1882_v45 = vmax.f32 %v1818_v4, 0.0 }
 0x2a6   : > { %v1883_v56 = vmax.f32 %v1819_v59, 0.0 }
 0x2a7   : > { %v1884_v28 = vmax.f32 %v1820_v53, 0.0 }
 0x2a8   : > { %v2071_v40 = vpack.c.bf16 %v1883_v56, %v1881_v55 }
 0x2a9   : > { %v2072_v46 = vpack.c.bf16 %v1884_v28, %v1882_v45  ;;  %v1482_v11 = vpop.f32.mrb[8].mxu1 }
 0x2aa   : > { %v1821_v44 = vadd.f32 %v7104_v5, %v1482_v11  ;;  %v1484_v62 = vpop.f32.mrb[9].mxu1 }
 0x2ab   : > { %v1822_v52 = vadd.f32 %v7104_v5, %v1484_v62  ;;  %v1486_v10 = vpop.f32.mrb[10].mxu1  ;;  %3511 = vmatprep.subr.bf16.mxu0 %v2072_v46  ;;  %6225 = vmatprep.subr.bf16.mxu1 %v2072_v46 }
 0x2ac   : > { %v1823_v17 = vadd.f32 %v7106_v6, %v1486_v10  ;;  %v1488_v58 = vpop.f32.mrb[11].mxu1  ;;  %3512 = vmatpush1.bf16.msra.mxu0 %v2071_v40  ;;  %6241 = vmatpush1.bf16.msra.mxu1 %v2071_v40  ;;  %v1885_v4 = vmax.f32 %v1821_v44, 0.0 }
 0x2ad   : > { %v1824_v1 = vadd.f32 %v7106_v6, %v1488_v58  ;;  %v1886_v48 = vmax.f32 %v1822_v52, 0.0 }
 0x2ae   : > { %v1887_v43 = vmax.f32 %v1823_v17, 0.0 }
 0x2af   : > { %v1888_v2 = vmax.f32 %v1824_v1, 0.0 }
 0x2b0   : > { %v2073_v59 = vpack.c.bf16 %v1887_v43, %v1885_v4 }
 0x2b1   : > { %v2074_v21 = vpack.c.bf16 %v1888_v2, %v1886_v48  ;;  %v1492_v53 = vpop.f32.mrb[12].mxu1 }
 0x2b2   : > { %v1825_v55 = vadd.f32 %v7114_v9, %v1492_v53  ;;  %v1494_v5 = vpop.f32.mrb[13].mxu1 }
 0x2b3   : > { %v1826_v56 = vadd.f32 %v7114_v9, %v1494_v5  ;;  %v1496_v45 = vpop.f32.mrb[14].mxu1  ;;  %3513 = vmatprep.subr.bf16.mxu0 %v2074_v21  ;;  %6226 = vmatprep.subr.bf16.mxu1 %v2074_v21 }
 0x2b4   : > { %v1827_v28 = vadd.f32 %v7122_v12, %v1496_v45  ;;  %v1498_v40 = vpop.f32.mrb[15].mxu1  ;;  %3514 = vmatpush1.bf16.msra.mxu0 %v2073_v59  ;;  %6242 = vmatpush1.bf16.msra.mxu1 %v2073_v59  ;;  %v1889_v46 = vmax.f32 %v1825_v55, 0.0 }
 0x2b5   : > { %v1828_v6 = vadd.f32 %v7122_v12, %v1498_v40  ;;  %v1890_v44 = vmax.f32 %v1826_v56, 0.0 }
 0x2b6   : > { %v1891_v11 = vmax.f32 %v1827_v28, 0.0 }
 0x2b7   : > { %v1892_v62 = vmax.f32 %v1828_v6, 0.0 }
 0x2b8   : > { %v2075_v52 = vpack.c.bf16 %v1891_v11, %v1889_v46 }
 0x2b9   : > { %v2076_v10 = vpack.c.bf16 %v1892_v62, %v1890_v44  ;;  %v1502_v17 = vpop.f32.mrb[16].mxu1 }
 0x2ba   : > { %v1829_v58 = vadd.f32 %v7130_v15, %v1502_v17  ;;  %v1504_v9 = vpop.f32.mrb[17].mxu1 }
 0x2bb   : > { %v1830_v1 = vadd.f32 %v7130_v15, %v1504_v9  ;;  %v1506_v4 = vpop.f32.mrb[18].mxu1  ;;  %3515 = vmatprep.subr.bf16.mxu0 %v2076_v10  ;;  %6227 = vmatprep.subr.bf16.mxu1 %v2076_v10 }
 0x2bc   : > { %v1831_v43 = vadd.f32 %v7132_v16, %v1506_v4  ;;  %v1508_v48 = vpop.f32.mrb[19].mxu1  ;;  %3516 = vmatpush1.bf16.msra.mxu0 %v2075_v52  ;;  %6243 = vmatpush1.bf16.msra.mxu1 %v2075_v52  ;;  %v1893_v2 = vmax.f32 %v1829_v58, 0.0 }
 0x2bd   : > { %v1832_v12 = vadd.f32 %v7132_v16, %v1508_v48  ;;  %v1894_v21 = vmax.f32 %v1830_v1, 0.0 }
 0x2be   : > { %v1895_v59 = vmax.f32 %v1831_v43, 0.0 }
 0x2bf   : > { %v1896_v53 = vmax.f32 %v1832_v12, 0.0 }
 0x2c0   : > { %v2077_v55 = vpack.c.bf16 %v1895_v59, %v1893_v2 }
 0x2c1   : > { %v2078_v5 = vpack.c.bf16 %v1896_v53, %v1894_v21  ;;  %v1512_v56 = vpop.f32.mrb[20].mxu1 }
 0x2c2   : > { %v1833_v45 = vadd.f32 %v7140_v19, %v1512_v56  ;;  %v1514_v15 = vpop.f32.mrb[21].mxu1 }
 0x2c3   : > { %v1834_v28 = vadd.f32 %v7140_v19, %v1514_v15  ;;  %v1516_v40 = vpop.f32.mrb[22].mxu1  ;;  %3517 = vmatprep.subr.bf16.mxu0 %v2078_v5  ;;  %6228 = vmatprep.subr.bf16.mxu1 %v2078_v5 }
 0x2c4   : > { %v1835_v6 = vadd.f32 %v7148_v22, %v1516_v40  ;;  %v1518_v46 = vpop.f32.mrb[23].mxu1  ;;  %3518 = vmatpush1.bf16.msra.mxu0 %v2077_v55  ;;  %6244 = vmatpush1.bf16.msra.mxu1 %v2077_v55  ;;  %v1897_v11 = vmax.f32 %v1833_v45, 0.0 }
 0x2c5   : > { %v1836_v16 = vadd.f32 %v7148_v22, %v1518_v46  ;;  %v1898_v62 = vmax.f32 %v1834_v28, 0.0 }
 0x2c6   : > { %v1899_v44 = vmax.f32 %v1835_v6, 0.0 }
 0x2c7   : > { %v1900_v52 = vmax.f32 %v1836_v16, 0.0 }
 0x2c8   : > { %v2079_v10 = vpack.c.bf16 %v1899_v44, %v1897_v11 }
 0x2c9   : > { %v2080_v17 = vpack.c.bf16 %v1900_v52, %v1898_v62  ;;  %v1522_v58 = vpop.f32.mrb[24].mxu1 }
 0x2ca   : > { %v1837_v9 = vadd.f32 %v7156_v25, %v1522_v58  ;;  %v1524_v19 = vpop.f32.mrb[25].mxu1 }
 0x2cb   : > { %v1838_v1 = vadd.f32 %v7156_v25, %v1524_v19  ;;  %v1526_v4 = vpop.f32.mrb[26].mxu1  ;;  %3519 = vmatprep.subr.bf16.mxu0 %v2080_v17  ;;  %6229 = vmatprep.subr.bf16.mxu1 %v2080_v17 }
 0x2cc   : > { %v1839_v43 = vadd.f32 %v7158_v26, %v1526_v4  ;;  %v1528_v48 = vpop.f32.mrb[27].mxu1  ;;  %3520 = vmatpush1.bf16.msra.mxu0 %v2079_v10  ;;  %6245 = vmatpush1.bf16.msra.mxu1 %v2079_v10  ;;  %v1901_v12 = vmax.f32 %v1837_v9, 0.0 }
 0x2cd   : > { %v1840_v22 = vadd.f32 %v7158_v26, %v1528_v48  ;;  %v1902_v59 = vmax.f32 %v1838_v1, 0.0 }
 0x2ce   : > { %v1903_v2 = vmax.f32 %v1839_v43, 0.0 }
 0x2cf   : > { %v1904_v21 = vmax.f32 %v1840_v22, 0.0 }
 0x2d0   : > { %v2081_v53 = vpack.c.bf16 %v1903_v2, %v1901_v12 }
 0x2d1   : > { %v2082_v55 = vpack.c.bf16 %v1904_v21, %v1902_v59  ;;  %v1532_v5 = vpop.f32.mrb[28].mxu1 }
 0x2d2   : > { %v1841_v56 = vadd.f32 %v7166_v29, %v1532_v5  ;;  %v1534_v25 = vpop.f32.mrb[29].mxu1 }
 0x2d3   : > { %v1842_v45 = vadd.f32 %v7166_v29, %v1534_v25  ;;  %v1536_v15 = vpop.f32.mrb[30].mxu1  ;;  %3521 = vmatprep.subr.bf16.mxu0 %v2082_v55  ;;  %6230 = vmatprep.subr.bf16.mxu1 %v2082_v55 }
 0x2d4   : > { %v1843_v28 = vadd.f32 %v7174_v32, %v1536_v15  ;;  %v1538_v40 = vpop.f32.mrb[31].mxu1  ;;  %3522 = vmatpush1.bf16.msra.mxu0 %v2081_v53  ;;  %6246 = vmatpush1.bf16.msra.mxu1 %v2081_v53  ;;  %v1905_v6 = vmax.f32 %v1841_v56, 0.0 }
 0x2d5   : > { %v1844_v26 = vadd.f32 %v7174_v32, %v1538_v40  ;;  %v1906_v16 = vmax.f32 %v1842_v45, 0.0 }
 0x2d6   : > { %v1907_v46 = vmax.f32 %v1843_v28, 0.0 }
 0x2d7   : > { %v1908_v11 = vmax.f32 %v1844_v26, 0.0 }
 0x2d8   : > { %v2083_v44 = vpack.c.bf16 %v1907_v46, %v1905_v6 }
 0x2d9   : > { %v2084_v62 = vpack.c.bf16 %v1908_v11, %v1906_v16  ;;  %v1542_v52 = vpop.f32.mrb[32].mxu1 }
 0x2da   : > { %v1845_v10 = vadd.f32 %v7182_v35, %v1542_v52  ;;  %v1544_v29 = vpop.f32.mrb[33].mxu1 }
 0x2db   : > { %v1846_v17 = vadd.f32 %v7182_v35, %v1544_v29  ;;  %v1546_v58 = vpop.f32.mrb[34].mxu1  ;;  %3523 = vmatprep.subr.bf16.mxu0 %v2084_v62  ;;  %6231 = vmatprep.subr.bf16.mxu1 %v2084_v62 }
 0x2dc   : > { %v1847_v9 = vadd.f32 %v7184_v36, %v1546_v58  ;;  %v1548_v19 = vpop.f32.mrb[35].mxu1  ;;  %3524 = vmatpush1.bf16.msra.mxu0 %v2083_v44  ;;  %6247 = vmatpush1.bf16.msra.mxu1 %v2083_v44  ;;  %v1909_v1 = vmax.f32 %v1845_v10, 0.0 }
 0x2dd   : > { %v1848_v32 = vadd.f32 %v7184_v36, %v1548_v19  ;;  %v1910_v43 = vmax.f32 %v1846_v17, 0.0 }
 0x2de   : > { %v1911_v4 = vmax.f32 %v1847_v9, 0.0 }
 0x2df   : > { %v1912_v48 = vmax.f32 %v1848_v32, 0.0 }
 0x2e0   : > { %v2085_v22 = vpack.c.bf16 %v1911_v4, %v1909_v1 }
 0x2e1   : > { %v2086_v12 = vpack.c.bf16 %v1912_v48, %v1910_v43  ;;  %v1552_v2 = vpop.f32.mrb[36].mxu1 }
 0x2e2   : > { %v1849_v59 = vadd.f32 %v7192_v39, %v1552_v2  ;;  %v1554_v35 = vpop.f32.mrb[37].mxu1 }
 0x2e3   : > { %v1850_v21 = vadd.f32 %v7192_v39, %v1554_v35  ;;  %v1556_v53 = vpop.f32.mrb[38].mxu1  ;;  %3525 = vmatprep.subr.bf16.mxu0 %v2086_v12  ;;  %6232 = vmatprep.subr.bf16.mxu1 %v2086_v12 }
 0x2e4   : > { %v1851_v55 = vadd.f32 %v7200_v42, %v1556_v53  ;;  %v1558_v5 = vpop.f32.mrb[39].mxu1  ;;  %3526 = vmatpush1.bf16.msra.mxu0 %v2085_v22  ;;  %6248 = vmatpush1.bf16.msra.mxu1 %v2085_v22  ;;  %v1913_v56 = vmax.f32 %v1849_v59, 0.0 }
 0x2e5   : > { %v1852_v36 = vadd.f32 %v7200_v42, %v1558_v5  ;;  %v1914_v45 = vmax.f32 %v1850_v21, 0.0 }
 0x2e6   : > { %v1915_v25 = vmax.f32 %v1851_v55, 0.0 }
 0x2e7   : > { %v1916_v15 = vmax.f32 %v1852_v36, 0.0 }
 0x2e8   : > { %v2087_v28 = vpack.c.bf16 %v1915_v25, %v1913_v56 }
 0x2e9   : > { %v2088_v40 = vpack.c.bf16 %v1916_v15, %v1914_v45  ;;  %v1562_v26 = vpop.f32.mrb[40].mxu1 }
 0x2ea   : > { %v1853_v6 = vadd.f32 %v7208_v47, %v1562_v26  ;;  %v1564_v39 = vpop.f32.mrb[41].mxu1 }
 0x2eb   : > { %v1854_v46 = vadd.f32 %v7208_v47, %v1564_v39  ;;  %v1566_v16 = vpop.f32.mrb[42].mxu1  ;;  %3527 = vmatprep.subr.bf16.mxu0 %v2088_v40  ;;  %6233 = vmatprep.subr.bf16.mxu1 %v2088_v40 }
 0x2ec   : > { %v1855_v11 = vadd.f32 %v7210_v50, %v1566_v16  ;;  %v1568_v44 = vpop.f32.mrb[43].mxu1  ;;  %3528 = vmatpush1.bf16.msra.mxu0 %v2087_v28  ;;  %6249 = vmatpush1.bf16.msra.mxu1 %v2087_v28  ;;  %v1917_v62 = vmax.f32 %v1853_v6, 0.0 }
 0x2ed   : > { %v1856_v42 = vadd.f32 %v7210_v50, %v1568_v44  ;;  %v1918_v10 = vmax.f32 %v1854_v46, 0.0 }
 0x2ee   : > { %v1919_v52 = vmax.f32 %v1855_v11, 0.0 }
 0x2ef   : > { %v1920_v29 = vmax.f32 %v1856_v42, 0.0  ;;  %v7702_v42 = vpop.permute.xlu1 %2386 }
 0x2f0   : > { %v2089_v17 = vpack.c.bf16 %v1919_v52, %v1917_v62 }
 0x2f1   : > { %v2090_v58 = vpack.c.bf16 %v1920_v29, %v1918_v10  ;;  %v1572_v9 = vpop.f32.mrb[44].mxu1 }
 0x2f2   : > { %v1857_v19 = vadd.f32 %v7218_v54, %v1572_v9  ;;  %v1574_v47 = vpop.f32.mrb[45].mxu1 }
 0x2f3   : > { %v1858_v32 = vadd.f32 %v7218_v54, %v1574_v47  ;;  %v1576_v1 = vpop.f32.mrb[46].mxu1  ;;  %3529 = vmatprep.subr.bf16.mxu0 %v2090_v58  ;;  %6234 = vmatprep.subr.bf16.mxu1 %v2090_v58 }
 0x2f4   : > { %v1859_v4 = vadd.f32 %v7226_v60, %v1576_v1  ;;  %v1578_v43 = vpop.f32.mrb[47].mxu1  ;;  %3530 = vmatpush1.bf16.msra.mxu0 %v2089_v17  ;;  %6250 = vmatpush1.bf16.msra.mxu1 %v2089_v17  ;;  %v1921_v48 = vmax.f32 %v1857_v19, 0.0  ;;  %v7706_v1 = vpop.permute.xlu1 %2396 }
 0x2f5   : > { %v1860_v50 = vadd.f32 %v7226_v60, %v1578_v43  ;;  %v1922_v12 = vmax.f32 %v1858_v32, 0.0  ;;  %v7709_v43 = vpop.permute.xlu0 %2391 }
 0x2f6   : > { %v1923_v22 = vmax.f32 %v1859_v4, 0.0 }
 0x2f7   : > { %v1924_v2 = vmax.f32 %v1860_v50, 0.0 }
 0x2f8   : > { %v2091_v59 = vpack.c.bf16 %v1923_v22, %v1921_v48 }
 0x2f9   : > { %v2092_v35 = vpack.c.bf16 %v1924_v2, %v1922_v12  ;;  %v1582_v21 = vpop.f32.mrb[48].mxu1 }
 0x2fa   : > { %v1861_v53 = vadd.f32 %v7234_v0, %v1582_v21  ;;  %v1584_v54 = vpop.f32.mrb[49].mxu1  ;;  %v7712_v21 = vpop.permute.xlu1 %2406 }
 0x2fb   : > { %v1862_v55 = vadd.f32 %v7234_v0, %v1584_v54  ;;  %v1586_v5 = vpop.f32.mrb[50].mxu1  ;;  %3531 = vmatprep.subr.bf16.mxu0 %v2092_v35  ;;  %6235 = vmatprep.subr.bf16.mxu1 %v2092_v35 }
 0x2fc   : > { %v1863_v36 = vadd.f32 %v7236_v3, %v1586_v5  ;;  %v1588_v56 = vpop.f32.mrb[51].mxu1  ;;  %3532 = vmatpush1.bf16.msra.mxu0 %v2091_v59  ;;  %6251 = vmatpush1.bf16.msra.mxu1 %v2091_v59  ;;  %v1925_v25 = vmax.f32 %v1861_v53, 0.0 }
 0x2fd   : > { %v1864_v60 = vadd.f32 %v7236_v3, %v1588_v56  ;;  %v1926_v15 = vmax.f32 %v1862_v55, 0.0  ;;  %v7715_v55 = vpop.permute.xlu0 %2401 }
 0x2fe   : > { %v1927_v45 = vmax.f32 %v1863_v36, 0.0 }
 0x2ff   : > { %v1928_v28 = vmax.f32 %v1864_v60, 0.0 }
 0x300   : > { %v2093_v40 = vpack.c.bf16 %v1927_v45, %v1925_v25 }
 0x301   : > { %v2094_v26 = vpack.c.bf16 %v1928_v28, %v1926_v15  ;;  %v1592_v6 = vpop.f32.mrb[52].mxu1 }
 0x302   : > { %v1865_v39 = vadd.f32 %v7244_v8, %v1592_v6  ;;  %v1594_v0 = vpop.f32.mrb[53].mxu1  ;;  %v7722_v6 = vpop.permute.xlu0 %2411 }
 0x303   : > { %v1866_v46 = vadd.f32 %v7244_v8, %v1594_v0  ;;  %v1596_v16 = vpop.f32.mrb[54].mxu1  ;;  %3533 = vmatprep.subr.bf16.mxu0 %v2094_v26  ;;  %6236 = vmatprep.subr.bf16.mxu1 %v2094_v26  ;;  %v7720_v26 = vpop.permute.xlu1 %2416  ;;  %v6468_v0 = vld [vmem:[%s8703_s5 + $0x14] ss:$8 sps:$4 sm:$0xff]  }
 0x304   : > { %v1867_v11 = vadd.f32 %v7252_v13, %v1596_v16  ;;  %v1598_v44 = vpop.f32.mrb[55].mxu1  ;;  %3534 = vmatpush1.bf16.msra.mxu0 %v2093_v40  ;;  %6252 = vmatpush1.bf16.msra.mxu1 %v2093_v40  ;;  %v1929_v62 = vmax.f32 %v1865_v39, 0.0  ;;  %v6462_v39 = vld [vmem:[%s8703_s5] ss:$8 sps:$4 sm:$0xff]  }
 0x305   : > { %v1868_v3 = vadd.f32 %v7252_v13, %v1598_v44  ;;  %v1930_v10 = vmax.f32 %v1866_v46, 0.0  ;;  %v6470_v46 = vld [vmem:[%s8703_s5 + $0x374] ss:$8 sps:$4 sm:$0xff]   ;;  %v6472_v44 = vld [vmem:[%s8703_s5 + $0x10] ss:$8 sps:$4 sm:$0xff]  }
 0x306   : > { %v1931_v52 = vmax.f32 %v1867_v11, 0.0  ;;  %v7738_v11 = vpop.permute.xlu0 %2421 }
 0x307   : > { %v1932_v29 = vmax.f32 %v1868_v3, 0.0  ;;  %v7736_v16 = vpop.permute.xlu1 %2426  ;;  %v6473_v3 = vld [vmem:[%s8703_s5 + $0x370] ss:$8 sps:$4 sm:$0xff]  }
 0x308   : > { %v2095_v17 = vpack.c.bf16 %v1931_v52, %v1929_v62  ;;  %v6474_v62 = vld [vmem:[%s8703_s5 + $0x24] ss:$8 sps:$4 sm:$0xff]  }
 0x309   : > { %v2096_v58 = vpack.c.bf16 %v1932_v29, %v1930_v10  ;;  %v1602_v9 = vpop.f32.mrb[56].mxu1  ;;  %v6476_v52 = vld [vmem:[%s8703_s5 + $0x384] ss:$8 sps:$4 sm:$0xff]  }
 0x30a   : > { %v1869_v8 = vadd.f32 %v7260_v18, %v1602_v9  ;;  %v1604_v19 = vpop.f32.mrb[57].mxu1  ;;  %v7754_v29 = vpop.permute.xlu0 %2431  ;;  %v6478_v9 = vld [vmem:[%s8703_s5 + $0x20] ss:$8 sps:$4 sm:$0xff]  }
 0x30b   : > { %v1870_v47 = vadd.f32 %v7260_v18, %v1604_v19  ;;  %v1606_v32 = vpop.f32.mrb[58].mxu1  ;;  %3535 = vmatprep.subr.bf16.mxu0 %v2096_v58  ;;  %6237 = vmatprep.subr.bf16.mxu1 %v2096_v58  ;;  %v7752_v10 = vpop.permute.xlu1 %2436  ;;  %v6480_v19 = vld [vmem:[%s8703_s5 + $0x34] ss:$8 sps:$4 sm:$0xff]  }
 0x30c   : > { %v1871_v13 = vadd.f32 %v7262_v20, %v1606_v32  ;;  %v1608_v4 = vpop.f32.mrb[59].mxu1  ;;  %3536 = vmatpush1.bf16.msra.mxu0 %v2095_v17  ;;  %6253 = vmatpush1.bf16.msra.mxu1 %v2095_v17  ;;  %v1933_v48 = vmax.f32 %v1869_v8, 0.0  ;;  %v6479_v8 = vld [vmem:[%s8703_s5 + $0x380] ss:$8 sps:$4 sm:$0xff]  }
 0x30d   : > { %v1872_v50 = vadd.f32 %v7262_v20, %v1608_v4  ;;  %v1934_v12 = vmax.f32 %v1870_v47, 0.0  ;;  %v6482_v47 = vld [vmem:[%s8703_s5 + $0x394] ss:$8 sps:$4 sm:$0xff]   ;;  %v6484_v4 = vld [vmem:[%s8703_s5 + $0x30] ss:$8 sps:$4 sm:$0xff]  }
 0x30e   : > { %v1935_v22 = vmax.f32 %v1871_v13, 0.0  ;;  %v7758_v58 = vpop.permute.xlu0 %2441 }
 0x30f   : > { %v1936_v2 = vmax.f32 %v1872_v50, 0.0  ;;  %v7756_v17 = vpop.permute.xlu1 %2446  ;;  %v6485_v50 = vld [vmem:[%s8703_s5 + $0x390] ss:$8 sps:$4 sm:$0xff]  }
 0x310   : > { %v2097_v59 = vpack.c.bf16 %v1935_v22, %v1933_v48  ;;  %v6486_v48 = vld [vmem:[%s8703_s5 + $0x44] ss:$8 sps:$4 sm:$0xff]  }
 0x311   : > { %v2098_v18 = vpack.c.bf16 %v1936_v2, %v1934_v12  ;;  %v1612_v35 = vpop.f32.mrb[60].mxu1  ;;  %v6488_v22 = vld [vmem:[%s8703_s5 + $0x3a4] ss:$8 sps:$4 sm:$0xff]  }
 0x312   : > { %v1873_v53 = vadd.f32 %v7270_v24, %v1612_v35  ;;  %v1614_v54 = vpop.f32.mrb[61].mxu1  ;;  %v7774_v13 = vpop.permute.xlu0 %2451  ;;  %v6492_v35 = vld [vmem:[%s8703_s5 + $0x54] ss:$8 sps:$4 sm:$0xff]  }
 0x313   : > { %v1874_v5 = vadd.f32 %v7270_v24, %v1614_v54  ;;  %v1616_v36 = vpop.f32.mrb[62].mxu1  ;;  %3537 = vmatprep.subr.bf16.mxu0 %v2098_v18  ;;  %6238 = vmatprep.subr.bf16.mxu1 %v2098_v18  ;;  %v7772_v32 = vpop.permute.xlu1 %2456  ;;  %v6491_v18 = vld [vmem:[%s8703_s5 + $0x3a0] ss:$8 sps:$4 sm:$0xff]  }
 0x314   : > { %v1875_v20 = vadd.f32 %v7278_v30, %v1616_v36  ;;  %v1618_v56 = vpop.f32.mrb[63].mxu1  ;;  %3538 = vmatpush1.bf16.msra.mxu0 %v2097_v59  ;;  %6254 = vmatpush1.bf16.msra.mxu1 %v2097_v59  ;;  %v1937_v25 = vmax.f32 %v1873_v53, 0.0  ;;  %v6490_v59 = vld [vmem:[%s8703_s5 + $0x40] ss:$8 sps:$4 sm:$0xff]   ;;  %v6494_v53 = vld [vmem:[%s8703_s5 + $0x3b4] ss:$8 sps:$4 sm:$0xff]  }
 0x315   : > { %v1876_v60 = vadd.f32 %v7278_v30, %v1618_v56  ;;  %v1938_v15 = vmax.f32 %v1874_v5, 0.0  ;;  %v6465_v30 = vld [vmem:[%s8703_s5 + $0x360] ss:$8 sps:$4 sm:$0xff]   ;;  %v6496_v56 = vld [vmem:[%s8703_s5 + $0x50] ss:$8 sps:$4 sm:$0xff]  }
 0x316   : > { %v1939_v45 = vmax.f32 %v1875_v20, 0.0  ;;  %v7790_v2 = vpop.permute.xlu0 %2461 }
 0x317   : > { %v1940_v28 = vmax.f32 %v1876_v60, 0.0  ;;  %v7788_v12 = vpop.permute.xlu1 %2466  ;;  %v6497_v60 = vld [vmem:[%s8703_s5 + $0x3b0] ss:$8 sps:$4 sm:$0xff]  }
 0x318   : > { %v2099_v40 = vpack.c.bf16 %v1939_v45, %v1937_v25  ;;  %v6498_v25 = vld [vmem:[%s8703_s5 + $0x64] ss:$8 sps:$4 sm:$0xff]  }
 0x319   : > { %v2100_v24 = vpack.c.bf16 %v1940_v28, %v1938_v15  ;;  %v6500_v45 = vld [vmem:[%s8703_s5 + $0x3c4] ss:$8 sps:$4 sm:$0xff]  }
 0x31a   : > { %v7806_v5 = vpop.permute.xlu0 %2471 }
 0x31b   : > { %3539 = vmatprep.subr.bf16.mxu0 %v2100_v24  ;;  %6239 = vmatprep.subr.bf16.mxu1 %v2100_v24  ;;  %v7804_v54 = vpop.permute.xlu1 %2476  ;;  %v6503_v24 = vld [vmem:[%s8703_s5 + $0x3c0] ss:$8 sps:$4 sm:$0xff]  }
 0x31c   : > { %3540 = vmatpush1.bf16.msra.mxu0 %v2099_v40  ;;  %6255 = vmatpush1.bf16.msra.mxu1 %v2099_v40  ;;  %v6502_v40 = vld [vmem:[%s8703_s5 + $0x60] ss:$8 sps:$4 sm:$0xff]  }
 0x31e   : > { %v7810_v20 = vpop.permute.xlu0 %2481 }
 0x31f   : > { %3542 = vmatmul.mubr.bf16.vlgmr.msra.gmra.mrb[12].mxu0 %v6462_v39  ;;  %4082 = vmatmul.mubr.bf16.vlgmr.msra.gmra.mrb[64].mxu1 %v6465_v30  ;;  %v7808_v36 = vpop.permute.xlu1 %2486  ;;  %v6504_v39 = vld [vmem:[%s8703_s5 + $0x74] ss:$8 sps:$4 sm:$0xff]  }
 0x320   : > { %3551 = vmatprep.mubr.bf16.mxu0 %v6468_v0  ;;  %4091 = vmatprep.mubr.bf16.mxu1 %v6470_v46  ;;  %v6506_v30 = vld [vmem:[%s8703_s5 + $0x3d4] ss:$8 sps:$4 sm:$0xff]  }
 0x322   : > { %v7826_v28 = vpop.permute.xlu0 %2491 }
 0x323   : > { %v7824_v15 = vpop.permute.xlu1 %2496 }
 0x326   : > { %v7842_v46 = vpop.permute.xlu0 %2501 }
 0x327   : > { %3552 = vmatmul.mubr.bf16.gmra.mrb[16].mxu0 %v6472_v44  ;;  %4092 = vmatmul.mubr.bf16.gmra.mrb[68].mxu1 %v6473_v3  ;;  %v7840_v0 = vpop.permute.xlu1 %2506  ;;  %v6508_v44 = vld [vmem:[%s8703_s5 + $0x70] ss:$8 sps:$4 sm:$0xff]  }
 0x328   : > { %3561 = vmatprep.mubr.bf16.mxu0 %v6474_v62  ;;  %4101 = vmatprep.mubr.bf16.mxu1 %v6476_v52  ;;  %v6509_v3 = vld [vmem:[%s8703_s5 + $0x3d0] ss:$8 sps:$4 sm:$0xff]   ;;  %v6510_v62 = vld [vmem:[%s8703_s5 + $0x84] ss:$8 sps:$4 sm:$0xff]  }
 0x329   : > { %v6512_v52 = vld [vmem:[%s8703_s5 + $0x3e4] ss:$8 sps:$4 sm:$0xff]  }
 0x32f   : > { %3562 = vmatmul.mubr.bf16.gmra.mrb[20].mxu0 %v6478_v9  ;;  %4102 = vmatmul.mubr.bf16.gmra.mrb[72].mxu1 %v6479_v8  ;;  %v7856_v9 = vpop.permute.xlu1 %2516  ;;  %v7858_v8 = vpop.permute.xlu0 %2511 }
 0x330   : > { %3571 = vmatprep.mubr.bf16.mxu0 %v6480_v19  ;;  %4111 = vmatprep.mubr.bf16.mxu1 %v6482_v47 }
 0x333   : > { %v7860_v19 = vpop.permute.xlu1 %2526  ;;  %v7862_v47 = vpop.permute.xlu0 %2521 }
 0x334   : > { %8796 = vst [vmem:[#allocation18_spill] sm:$0xff] %v7860_v19  ;;  %8797 = vst [vmem:[#allocation19_spill] sm:$0xff] %v7862_v47 }
 0x337   : > { %3572 = vmatmul.mubr.bf16.gmra.mrb[24].mxu0 %v6484_v4  ;;  %4112 = vmatmul.mubr.bf16.gmra.mrb[76].mxu1 %v6485_v50  ;;  %v6514_v4 = vld [vmem:[%s8703_s5 + $0x80] ss:$8 sps:$4 sm:$0xff]  }
 0x338   : > { %3581 = vmatprep.mubr.bf16.mxu0 %v6486_v48  ;;  %4121 = vmatprep.mubr.bf16.mxu1 %v6488_v22  ;;  %v6515_v50 = vld [vmem:[%s8703_s5 + $0x3e0] ss:$8 sps:$4 sm:$0xff]   ;;  %v6516_v48 = vld [vmem:[%s8703_s5 + $0x94] ss:$8 sps:$4 sm:$0xff]  }
 0x339   : > { %v6518_v22 = vld [vmem:[%s8703_s5 + $0x3f4] ss:$8 sps:$4 sm:$0xff]  }
 0x33f   : > { %3582 = vmatmul.mubr.bf16.gmra.mrb[28].mxu0 %v6490_v59  ;;  %4122 = vmatmul.mubr.bf16.gmra.mrb[80].mxu1 %v6491_v18  ;;  %v7876_v59 = vpop.permute.xlu1 %2536  ;;  %v7878_v18 = vpop.permute.xlu0 %2531 }
 0x340   : > { %3591 = vmatprep.mubr.bf16.mxu0 %v6492_v35  ;;  %4131 = vmatprep.mubr.bf16.mxu1 %v6494_v53  ;;  %8798 = vst [vmem:[#allocation20_spill] sm:$0xff] %v7876_v59  ;;  %8799 = vst [vmem:[#allocation21_spill] sm:$0xff] %v7878_v18  ;;  %v6520_v35 = vld [vmem:[%s8703_s5 + $0x90] ss:$8 sps:$4 sm:$0xff]  }
 0x341   : > { %v6521_v53 = vld [vmem:[%s8703_s5 + $0x3f0] ss:$8 sps:$4 sm:$0xff]  }
 0x347   : > { %3592 = vmatmul.mubr.bf16.gmra.mrb[32].mxu0 %v6496_v56  ;;  %4132 = vmatmul.mubr.bf16.gmra.mrb[84].mxu1 %v6497_v60  ;;  %v6522_v56 = vld [vmem:[%s8703_s5 + $0xa4] ss:$8 sps:$4 sm:$0xff]   ;;  %v7889_v60 = vpop.permute.xlu1 %2546 }
 0x348   : > { %3601 = vmatprep.mubr.bf16.mxu0 %v6498_v25  ;;  %4141 = vmatprep.mubr.bf16.mxu1 %v6500_v45  ;;  %8800 = vst [vmem:[#allocation22_spill] sm:$0xff] %v7889_v60  ;;  %v7891_v25 = vpop.permute.xlu0 %2541  ;;  %v6524_v45 = vld [vmem:[%s8703_s5 + $0xa0] ss:$8 sps:$4 sm:$0xff]  }
 0x349   : > { %8801 = vst [vmem:[#allocation23_spill] sm:$0xff] %v7891_v25 }
 0x34f   : > { %3602 = vmatmul.mubr.bf16.gmra.mrb[36].mxu0 %v6502_v40  ;;  %4142 = vmatmul.mubr.bf16.gmra.mrb[88].mxu1 %v6503_v24  ;;  %v6525_v40 = vld [vmem:[%s8703_s5 + $0xb4] ss:$8 sps:$4 sm:$0xff]   ;;  %v7899_v24 = vpop.permute.xlu1 %2556 }
 0x350   : > { %3611 = vmatprep.mubr.bf16.mxu0 %v6504_v39  ;;  %4151 = vmatprep.mubr.bf16.mxu1 %v6506_v30  ;;  %8802 = vst [vmem:[#allocation24_spill] sm:$0xff] %v7899_v24  ;;  %v7901_v39 = vpop.permute.xlu0 %2551 }
 0x351   : > { %8803 = vst [vmem:[#allocation25_spill] sm:$0xff] %v7901_v39 }
 0x353   : > { %v7903_v30 = vpop.permute.xlu1 %2566 }
 0x354   : > { %8804 = vst [vmem:[#allocation26_spill] sm:$0xff] %v7903_v30 }
 0x357   : > { %3612 = vmatmul.mubr.bf16.gmra.mrb[40].mxu0 %v6508_v44  ;;  %4152 = vmatmul.mubr.bf16.gmra.mrb[92].mxu1 %v6509_v3  ;;  %v7905_v44 = vpop.permute.xlu0 %2561  ;;  %v6527_v3 = vld [vmem:[%s8703_s5 + $0xb0] ss:$8 sps:$4 sm:$0xff]  }
 0x358   : > { %3621 = vmatprep.mubr.bf16.mxu0 %v6510_v62  ;;  %4161 = vmatprep.mubr.bf16.mxu1 %v6512_v52  ;;  %8805 = vst [vmem:[#allocation27_spill] sm:$0xff] %v7905_v44  ;;  %v6528_v62 = vld [vmem:[%s8703_s5 + $0xc4] ss:$8 sps:$4 sm:$0xff]   ;;  %v7913_v52 = vpop.permute.xlu1 %2576 }
 0x359   : > { %8806 = vst [vmem:[#allocation28_spill] sm:$0xff] %v7913_v52 }
 0x35f   : > { %3622 = vmatmul.mubr.bf16.gmra.mrb[44].mxu0 %v6514_v4  ;;  %4162 = vmatmul.mubr.bf16.gmra.mrb[96].mxu1 %v6515_v50  ;;  %v7915_v4 = vpop.permute.xlu0 %2571  ;;  %v6530_v50 = vld [vmem:[%s8703_s5 + $0xc0] ss:$8 sps:$4 sm:$0xff]  }
 0x360   : > { %3631 = vmatprep.mubr.bf16.mxu0 %v6516_v48  ;;  %4171 = vmatprep.mubr.bf16.mxu1 %v6518_v22  ;;  %8807 = vst [vmem:[#allocation29_spill] sm:$0xff] %v7915_v4  ;;  %v6531_v48 = vld [vmem:[%s8703_s5 + $0xd4] ss:$8 sps:$4 sm:$0xff]   ;;  %v7923_v22 = vpop.permute.xlu1 %2586 }
 0x361   : > { %8808 = vst [vmem:[#allocation30_spill] sm:$0xff] %v7923_v22 }
 0x367   : > { %3632 = vmatmul.mubr.bf16.gmra.mrb[48].mxu0 %v6520_v35  ;;  %4172 = vmatmul.mubr.bf16.gmra.mrb[100].mxu1 %v6521_v53  ;;  %v7925_v35 = vpop.permute.xlu0 %2581  ;;  %v6533_v53 = vld [vmem:[%s8703_s5 + $0xd0] ss:$8 sps:$4 sm:$0xff]  }
 0x368   : > { %3641 = vmatprep.mubr.bf16.mxu0 %v6522_v56  ;;  %8809 = vst [vmem:[#allocation31_spill] sm:$0xff] %v7925_v35  ;;  %v6534_v56 = vld [vmem:[%s8703_s5 + $0xe4] ss:$8 sps:$4 sm:$0xff]  }
 0x36f   : > { %3642 = vmatmul.mubr.bf16.gmra.mrb[52].mxu0 %v6524_v45  ;;  %v7933_v45 = vpop.permute.xlu1 %2596 }
 0x370   : > { %3651 = vmatprep.mubr.bf16.mxu0 %v6525_v40  ;;  %8810 = vst [vmem:[#allocation32_spill] sm:$0xff] %v7933_v45  ;;  %v7935_v40 = vpop.permute.xlu0 %2591 }
 0x371   : > { %8811 = vst [vmem:[#allocation33_spill] sm:$0xff] %v7935_v40 }
 0x377   : > { %3652 = vmatmul.mubr.bf16.gmra.mrb[56].mxu0 %v6527_v3  ;;  %v7937_v3 = vpop.permute.xlu1 %2606 }
 0x378   : > { %3661 = vmatprep.mubr.bf16.mxu0 %v6528_v62  ;;  %8812 = vst [vmem:[#allocation34_spill] sm:$0xff] %v7937_v3  ;;  %v7939_v62 = vpop.permute.xlu0 %2601 }
 0x379   : > { %8813 = vst [vmem:[#allocation35_spill] sm:$0xff] %v7939_v62 }
 0x37b   : > { %v7947_v22 = vpop.permute.xlu1 %2616 }
 0x37c   : > { %8814 = vst [vmem:[#allocation36_spill] sm:$0xff] %v7947_v22  ;;  %v7949_v45 = vpop.permute.xlu0 %2611 }
 0x37d   : > { %8815 = vst [vmem:[#allocation37_spill] sm:$0xff] %v7949_v45 }
 0x37f   : > { %3662 = vmatmul.mubr.bf16.gmra.mrb[60].mxu0 %v6530_v50  ;;  %v6536_v50 = vld [vmem:[%s8703_s5 + $0xe0] ss:$8 sps:$4 sm:$0xff]   ;;  %v7957_v3 = vpop.permute.xlu1 %2626 }
 0x380   : > { %3671 = vmatprep.mubr.bf16.mxu0 %v6531_v48  ;;  %v6537_v48 = vld [vmem:[%s8703_s5 + $0xf4] ss:$8 sps:$4 sm:$0xff]   ;;  %8816 = vst [vmem:[#allocation38_spill] sm:$0xff] %v7957_v3  ;;  %v7959_v62 = vpop.permute.xlu0 %2621 }
 0x381   : > { %8817 = vst [vmem:[#allocation39_spill] sm:$0xff] %v7959_v62 }
 0x383   : > { %v7967_v22 = vpop.permute.xlu1 %2636 }
 0x384   : > { %8818 = vst [vmem:[#allocation40_spill] sm:$0xff] %v7967_v22  ;;  %v7969_v45 = vpop.permute.xlu0 %2631 }
 0x385   : > { %8819 = vst [vmem:[#allocation41_spill] sm:$0xff] %v7969_v45 }
 0x387   : > { %3672 = vmatmul.mubr.bf16.gmra.mrb[64].mxu0 %v6533_v53  ;;  %v6539_v53 = vld [vmem:[%s8703_s5 + $0xf0] ss:$8 sps:$4 sm:$0xff]   ;;  %v7971_v40 = vpop.permute.xlu1 %2646 }
 0x388   : > { %3681 = vmatprep.mubr.bf16.mxu0 %v6534_v56  ;;  %v6540_v56 = vld [vmem:[%s8703_s5 + $0x104] ss:$8 sps:$4 sm:$0xff]   ;;  %8820 = vst [vmem:[#allocation42_spill] sm:$0xff] %v7971_v40  ;;  %v7973_v3 = vpop.permute.xlu0 %2641 }
 0x389   : > { %8821 = vst [vmem:[#allocation43_spill] sm:$0xff] %v7973_v3 }
 0x38b   : > { %v7981_v62 = vpop.permute.xlu1 %2656 }
 0x38c   : > { %8822 = vst [vmem:[#allocation44_spill] sm:$0xff] %v7981_v62  ;;  %v7983_v22 = vpop.permute.xlu0 %2651 }
 0x38d   : > { %8823 = vst [vmem:[#allocation45_spill] sm:$0xff] %v7983_v22 }
 0x38f   : > { %3682 = vmatmul.mubr.bf16.gmra.mrb[68].mxu0 %v6536_v50  ;;  %v6542_v50 = vld [vmem:[%s8703_s5 + $0x100] ss:$8 sps:$4 sm:$0xff]   ;;  %v7991_v40 = vpop.permute.xlu1 %2666 }
 0x390   : > { %3691 = vmatprep.mubr.bf16.mxu0 %v6537_v48  ;;  %v6543_v48 = vld [vmem:[%s8703_s5 + $0x114] ss:$8 sps:$4 sm:$0xff]   ;;  %8824 = vst [vmem:[#allocation46_spill] sm:$0xff] %v7991_v40  ;;  %v7993_v3 = vpop.permute.xlu0 %2661 }
 0x391   : > { %8825 = vst [vmem:[#allocation47_spill] sm:$0xff] %v7993_v3 }
 0x393   : > { %v8001_v62 = vpop.permute.xlu1 %2676 }
 0x394   : > { %8826 = vst [vmem:[#allocation48_spill] sm:$0xff] %v8001_v62  ;;  %v8003_v22 = vpop.permute.xlu0 %2671 }
 0x395   : > { %8827 = vst [vmem:[#allocation49_spill] sm:$0xff] %v8003_v22 }
 0x397   : > { %3692 = vmatmul.mubr.bf16.gmra.mrb[72].mxu0 %v6539_v53  ;;  %v6545_v53 = vld [vmem:[%s8703_s5 + $0x110] ss:$8 sps:$4 sm:$0xff]   ;;  %v8005_v45 = vpop.permute.xlu1 %2686 }
 0x398   : > { %3701 = vmatprep.mubr.bf16.mxu0 %v6540_v56  ;;  %v6546_v56 = vld [vmem:[%s8703_s5 + $0x124] ss:$8 sps:$4 sm:$0xff]   ;;  %8828 = vst [vmem:[#allocation50_spill] sm:$0xff] %v8005_v45  ;;  %v8007_v40 = vpop.permute.xlu0 %2681 }
 0x399   : > { %8829 = vst [vmem:[#allocation51_spill] sm:$0xff] %v8007_v40 }
 0x39b   : > { %v8015_v3 = vpop.permute.xlu1 %2696 }
 0x39c   : > { %8830 = vst [vmem:[#allocation52_spill] sm:$0xff] %v8015_v3  ;;  %v8017_v62 = vpop.permute.xlu0 %2691 }
 0x39d   : > { %8831 = vst [vmem:[#allocation53_spill] sm:$0xff] %v8017_v62 }
 0x39f   : > { %3702 = vmatmul.mubr.bf16.gmra.mrb[76].mxu0 %v6542_v50  ;;  %v6548_v50 = vld [vmem:[%s8703_s5 + $0x120] ss:$8 sps:$4 sm:$0xff]   ;;  %v8025_v45 = vpop.permute.xlu1 %2706 }
 0x3a0   : > { %3711 = vmatprep.mubr.bf16.mxu0 %v6543_v48  ;;  %v6549_v48 = vld [vmem:[%s8703_s5 + $0x134] ss:$8 sps:$4 sm:$0xff]   ;;  %8832 = vst [vmem:[#allocation54_spill] sm:$0xff] %v8025_v45  ;;  %v8027_v40 = vpop.permute.xlu0 %2701 }
 0x3a1   : > { %8833 = vst [vmem:[#allocation55_spill] sm:$0xff] %v8027_v40 }
 0x3a3   : > { %v8035_v3 = vpop.permute.xlu1 %2716 }
 0x3a4   : > { %8834 = vst [vmem:[#allocation56_spill] sm:$0xff] %v8035_v3  ;;  %v8037_v62 = vpop.permute.xlu0 %2711 }
 0x3a5   : > { %8835 = vst [vmem:[#allocation57_spill] sm:$0xff] %v8037_v62 }
 0x3a7   : > { %3712 = vmatmul.mubr.bf16.gmra.mrb[80].mxu0 %v6545_v53  ;;  %v6551_v53 = vld [vmem:[%s8703_s5 + $0x130] ss:$8 sps:$4 sm:$0xff]   ;;  %v8039_v22 = vpop.permute.xlu1 %2726 }
 0x3a8   : > { %3721 = vmatprep.mubr.bf16.mxu0 %v6546_v56  ;;  %v6552_v56 = vld [vmem:[%s8703_s5 + $0x144] ss:$8 sps:$4 sm:$0xff]   ;;  %8836 = vst [vmem:[#allocation58_spill] sm:$0xff] %v8039_v22  ;;  %v8041_v45 = vpop.permute.xlu0 %2721 }
 0x3a9   : > { %8837 = vst [vmem:[#allocation59_spill] sm:$0xff] %v8041_v45 }
 0x3ab   : > { %v8049_v40 = vpop.permute.xlu1 %2736 }
 0x3ac   : > { %8838 = vst [vmem:[#allocation60_spill] sm:$0xff] %v8049_v40  ;;  %v8051_v3 = vpop.permute.xlu0 %2731 }
 0x3ad   : > { %8839 = vst [vmem:[#allocation61_spill] sm:$0xff] %v8051_v3 }
 0x3af   : > { %3722 = vmatmul.mubr.bf16.gmra.mrb[84].mxu0 %v6548_v50  ;;  %v6554_v50 = vld [vmem:[%s8703_s5 + $0x140] ss:$8 sps:$4 sm:$0xff]   ;;  %v8059_v22 = vpop.permute.xlu1 %2746 }
 0x3b0   : > { %3731 = vmatprep.mubr.bf16.mxu0 %v6549_v48  ;;  %v6555_v48 = vld [vmem:[%s8703_s5 + $0x154] ss:$8 sps:$4 sm:$0xff]   ;;  %8840 = vst [vmem:[#allocation62_spill] sm:$0xff] %v8059_v22  ;;  %v8061_v45 = vpop.permute.xlu0 %2741 }
 0x3b1   : > { %8841 = vst [vmem:[#allocation63_spill] sm:$0xff] %v8061_v45 }
 0x3b3   : > { %v8069_v40 = vpop.permute.xlu1 %2756 }
 0x3b4   : > { %8842 = vst [vmem:[#allocation64_spill] sm:$0xff] %v8069_v40  ;;  %v8071_v3 = vpop.permute.xlu0 %2751 }
 0x3b5   : > { %8843 = vst [vmem:[#allocation65_spill] sm:$0xff] %v8071_v3 }
 0x3b7   : > { %3732 = vmatmul.mubr.bf16.gmra.mrb[88].mxu0 %v6551_v53  ;;  %v6557_v53 = vld [vmem:[%s8703_s5 + $0x150] ss:$8 sps:$4 sm:$0xff]   ;;  %v8073_v22 = vpop.permute.xlu1 %2766 }
 0x3b8   : > { %3741 = vmatprep.mubr.bf16.mxu0 %v6552_v56  ;;  %v6558_v56 = vld [vmem:[%s8703_s5 + $0x164] ss:$8 sps:$4 sm:$0xff]   ;;  %8844 = vst [vmem:[#allocation66_spill] sm:$0xff] %v8073_v22  ;;  %v8075_v45 = vpop.permute.xlu0 %2761 }
 0x3b9   : > { %8845 = vst [vmem:[#allocation67_spill] sm:$0xff] %v8075_v45  ;;  %v6575_v45 = vld [vmem:[%s8703_s5 + $0x1b0] ss:$8 sps:$4 sm:$0xff]  }
 0x3bb   : > { %v2777_v40 = vpop.permute.xlu1 %2776 }
 0x3bc   : > { %v2772_v62 = vpop.permute.xlu0 %2771 }
 0x3bf   : > { %3742 = vmatmul.mubr.bf16.gmra.mrb[92].mxu0 %v6554_v50  ;;  %v6560_v50 = vld [vmem:[%s8703_s5 + $0x160] ss:$8 sps:$4 sm:$0xff]  }
 0x3c0   : > { %3751 = vmatprep.mubr.bf16.mxu0 %v6555_v48  ;;  %v6561_v48 = vld [vmem:[%s8703_s5 + $0x174] ss:$8 sps:$4 sm:$0xff]  }
 0x3c7   : > { %3752 = vmatmul.mubr.bf16.gmra.mrb[96].mxu0 %v6557_v53  ;;  %v6563_v53 = vld [vmem:[%s8703_s5 + $0x170] ss:$8 sps:$4 sm:$0xff]  }
 0x3c8   : > { %3761 = vmatprep.mubr.bf16.mxu0 %v6558_v56  ;;  %v6564_v56 = vld [vmem:[%s8703_s5 + $0x184] ss:$8 sps:$4 sm:$0xff]  }
 0x3cf   : > { %3762 = vmatmul.mubr.bf16.gmra.mrb[100].mxu0 %v6560_v50  ;;  %v6566_v50 = vld [vmem:[%s8703_s5 + $0x180] ss:$8 sps:$4 sm:$0xff]  }
 0x3d0   : > { %3771 = vmatprep.mubr.bf16.mxu0 %v6561_v48  ;;  %v6567_v48 = vld [vmem:[%s8703_s5 + $0x194] ss:$8 sps:$4 sm:$0xff]  }
 0x3d7   : > { %3772 = vmatmul.mubr.bf16.gmra.mrb[104].mxu0 %v6563_v53  ;;  %v6569_v53 = vld [vmem:[%s8703_s5 + $0x190] ss:$8 sps:$4 sm:$0xff]  }
 0x3d8   : > { %3781 = vmatprep.mubr.bf16.mxu0 %v6564_v56  ;;  %v6570_v56 = vld [vmem:[%s8703_s5 + $0x1a4] ss:$8 sps:$4 sm:$0xff]  }
 0x3df   : > { %3782 = vmatmul.mubr.bf16.gmra.mrb[108].mxu0 %v6566_v50  ;;  %v6572_v50 = vld [vmem:[%s8703_s5 + $0x1a0] ss:$8 sps:$4 sm:$0xff]  }
 0x3e0   : > { %3791 = vmatprep.mubr.bf16.mxu0 %v6567_v48  ;;  %v6573_v48 = vld [vmem:[%s8703_s5 + $0x1b4] ss:$8 sps:$4 sm:$0xff]  }
 0x3e7   : > { %3792 = vmatmul.mubr.bf16.gmra.mrb[112].mxu0 %v6569_v53 }
 0x3e8   : > { %3801 = vmatprep.mubr.bf16.mxu0 %v6570_v56 }
 0x3ef   : > { %3802 = vmatmul.mubr.bf16.gmra.mrb[116].mxu0 %v6572_v50 }
 0x3f0   : > { %3811 = vmatprep.mubr.bf16.mxu0 %v6573_v48  ;;  %v6576_v48 = vld [vmem:[%s8703_s5 + $0x1c4] ss:$8 sps:$4 sm:$0xff]  }
 0x3f2   : > { %v3543_v3 = vpop.f32.mrb[12].mxu0  ;;  %v4083_v53 = vpop.f32.mrb[64].mxu1 }
 0x3f3   : > { %v3544_v56 = vadd.f32 %v3543_v3, %v7286_v34  ;;  %v4084_v35 = vadd.f32 %v4083_v53, %v2772_v62  ;;  %v3545_v22 = vpop.f32.mrb[13].mxu0  ;;  %v4085_v52 = vpop.f32.mrb[65].mxu1 }
 0x3f4   : > { %v3546_v4 = vadd.f32 %v3545_v22, %v7286_v34  ;;  %v4086_v30 = vadd.f32 %v4085_v52, %v2772_v62  ;;  %v3547_v44 = vpop.f32.mrb[14].mxu0  ;;  %v4087_v50 = vpop.f32.mrb[66].mxu1 }
 0x3f5   : > { %v4182_v24 = vmax.f32 %v3544_v56, 0.0  ;;  %v4398_v39 = vmax.f32 %v4084_v35, 0.0  ;;  %v3548_v3 = vadd.f32 %v3547_v44, %v7288_v37  ;;  %v4088_v53 = vadd.f32 %v4087_v50, %v2777_v40  ;;  %v3549_v60 = vpop.f32.mrb[15].mxu0  ;;  %v4089_v25 = vpop.f32.mrb[67].mxu1 }
 0x3f6   : > { %v4183_v59 = vmax.f32 %v3546_v4, 0.0  ;;  %v4399_v18 = vmax.f32 %v4086_v30, 0.0  ;;  %v3550_v19 = vadd.f32 %v3549_v60, %v7288_v37  ;;  %v4090_v47 = vadd.f32 %v4089_v25, %v2777_v40  ;;  %v2787_v4 = vpop.permute.xlu1 %2786  ;;  %v2782_v30 = vpop.permute.xlu0 %2781  ;;  %v5334_v60 = vld [vmem:[%s8704_s6] sm:$0xff] }
 0x3f7   : > { %v4184_v34 = vmax.f32 %v3548_v3, 0.0  ;;  %v4400_v52 = vmax.f32 %v4088_v53, 0.0  ;;  %3812 = vmatmul.mubr.bf16.gmra.mrb[120].mxu0 %v6575_v45  ;;  %v6578_v53 = vld [vmem:[%s8703_s5 + $0x1c0] ss:$8 sps:$4 sm:$0xff]  }
 0x3f8   : > { %v6096_v22 = vpack.c.bf16 %v4183_v59, %v4182_v24  ;;  %v6204_v44 = vpack.c.bf16 %v4399_v18, %v4398_v39  ;;  %v4185_v35 = vmax.f32 %v3550_v19, 0.0  ;;  %v4401_v62 = vmax.f32 %v4090_v47, 0.0  ;;  %3821 = vmatprep.mubr.bf16.mxu0 %v6576_v48 }
 0x3f9   : > { %v4438_v56 = vpack.c.bf16 %v4184_v34, %v4182_v24  ;;  %v8099_v37 = vpack.c.bf16 %v4400_v52, %v4398_v39 }
 0x3fa   : > { %5206 = vst [vmem:[%s8097_s16] sm:$0xff] %v6096_v22  ;;  %5314 = vst [vmem:[%s8097_s16 + $0x360] sm:$0xff] %v6204_v44  ;;  %v4439_v25 = vpack.c.bf16 %v4185_v35, %v4183_v59  ;;  %v6097_v45 = vpack.c.bf16 %v4185_v35, %v4184_v34  ;;  %v8106_v40 = vpack.c.bf16 %v4401_v62, %v4399_v18  ;;  %v3553_v47 = vpop.f32.mrb[16].mxu0  ;;  %v4093_v50 = vpop.f32.mrb[68].mxu1 }
 0x3fb   : > { %8846 = vst [vmem:[#allocation68_spill] sm:$0xff] %v8099_v37  ;;  %v6205_v19 = vpack.c.bf16 %v4401_v62, %v4400_v52  ;;  %v3554_v48 = vadd.f32 %v3553_v47, %v7296_v41  ;;  %v4094_v24 = vadd.f32 %v4093_v50, %v2782_v30  ;;  %v3555_v39 = vpop.f32.mrb[17].mxu0  ;;  %v4095_v3 = vpop.f32.mrb[69].mxu1  ;;  %v6083_v37 = vcombine.high %v5334_v60, %v5334_v60  ;;  %v6579_v52 = vld [vmem:[%s8703_s5 + $0x1d4] ss:$8 sps:$4 sm:$0xff]  }
 0x3fc   : > { %8847 = vst [vmem:[#allocation69_spill] sm:$0xff] %v8106_v40  ;;  %5207 = vst [vmem:[%s8097_s16 + $0x8] sm:$0xff] %v6097_v45  ;;  %v3556_v59 = vadd.f32 %v3555_v39, %v7296_v41  ;;  %v4096_v34 = vadd.f32 %v4095_v3, %v2782_v30  ;;  %v3557_v18 = vpop.f32.mrb[18].mxu0  ;;  %v4097_v22 = vpop.f32.mrb[70].mxu1  ;;  %5372 = vmatprep.subr.bf16.mxu1 %v4439_v25 }
 0x3fd   : > { %5315 = vst [vmem:[%s8097_s16 + $0x368] sm:$0xff] %v6205_v19  ;;  %v4186_v44 = vmax.f32 %v3554_v48, 0.0  ;;  %v4402_v35 = vmax.f32 %v4094_v24, 0.0  ;;  %v3558_v62 = vadd.f32 %v3557_v18, %v7304_v51  ;;  %v4098_v47 = vadd.f32 %v4097_v22, %v2787_v4  ;;  %v3559_v50 = vpop.f32.mrb[19].mxu0  ;;  %v4099_v40 = vpop.f32.mrb[71].mxu1  ;;  %5373 = vmatpush1.bf16.msra.mxu1 %v4438_v56  ;;  %5404 = vmatprep.mubr.bf16.mxu1 %v6083_v37 }
 0x3fe   : > { %v4187_v60 = vmax.f32 %v3556_v59, 0.0  ;;  %v4403_v41 = vmax.f32 %v4096_v34, 0.0  ;;  %v3560_v30 = vadd.f32 %v3559_v50, %v7304_v51  ;;  %v4100_v25 = vadd.f32 %v4099_v40, %v2787_v4  ;;  %v2797_v18 = vpop.permute.xlu1 %2796  ;;  %v2792_v22 = vpop.permute.xlu0 %2791 }
 0x3ff   : > { %v4188_v45 = vmax.f32 %v3558_v62, 0.0  ;;  %v4404_v19 = vmax.f32 %v4098_v47, 0.0  ;;  %3822 = vmatmul.mubr.bf16.gmra.mrb[124].mxu0 %v6578_v53 }
 0x400   : > { %v6098_v39 = vpack.c.bf16 %v4187_v60, %v4186_v44  ;;  %v6206_v48 = vpack.c.bf16 %v4403_v41, %v4402_v35  ;;  %v4189_v24 = vmax.f32 %v3560_v30, 0.0  ;;  %v4405_v3 = vmax.f32 %v4100_v25, 0.0  ;;  %3831 = vmatprep.mubr.bf16.mxu0 %v6579_v52  ;;  %v6582_v25 = vld [vmem:[%s8703_s5 + $0x1e4] ss:$8 sps:$4 sm:$0xff]  }
 0x401   : > { %v4440_v56 = vpack.c.bf16 %v4188_v45, %v4186_v44  ;;  %v8120_v37 = vpack.c.bf16 %v4404_v19, %v4402_v35  ;;  %v6581_v44 = vld [vmem:[%s8703_s5 + $0x1d0] ss:$8 sps:$4 sm:$0xff]  }
 0x402   : > { %5208 = vst [vmem:[%s8097_s16 + $0x10] sm:$0xff] %v6098_v39  ;;  %5316 = vst [vmem:[%s8097_s16 + $0x370] sm:$0xff] %v6206_v48  ;;  %v4441_v59 = vpack.c.bf16 %v4189_v24, %v4187_v60  ;;  %v6099_v51 = vpack.c.bf16 %v4189_v24, %v4188_v45  ;;  %v8124_v4 = vpack.c.bf16 %v4405_v3, %v4403_v41  ;;  %v3563_v53 = vpop.f32.mrb[20].mxu0  ;;  %v4103_v34 = vpop.f32.mrb[72].mxu1 }
 0x403   : > { %v6207_v40 = vpack.c.bf16 %v4405_v3, %v4404_v19  ;;  %v3564_v62 = vadd.f32 %v3563_v53, %v7312_v57  ;;  %v4104_v47 = vadd.f32 %v4103_v34, %v2792_v22  ;;  %v3565_v52 = vpop.f32.mrb[21].mxu0  ;;  %v4105_v50 = vpop.f32.mrb[73].mxu1 }
 0x404   : > { %5209 = vst [vmem:[%s8097_s16 + $0x18] sm:$0xff] %v6099_v51  ;;  %v3566_v35 = vadd.f32 %v3565_v52, %v7312_v57  ;;  %v4106_v60 = vadd.f32 %v4105_v50, %v2792_v22  ;;  %v3567_v30 = vpop.f32.mrb[22].mxu0  ;;  %v4107_v41 = vpop.f32.mrb[74].mxu1  ;;  %5374 = vmatprep.subr.bf16.mxu1 %v4441_v59 }
 0x405   : > { %5317 = vst [vmem:[%s8097_s16 + $0x378] sm:$0xff] %v6207_v40  ;;  %v4190_v45 = vmax.f32 %v3564_v62, 0.0  ;;  %v4406_v19 = vmax.f32 %v4104_v47, 0.0  ;;  %v3568_v39 = vadd.f32 %v3567_v30, %v7314_v61  ;;  %v4108_v48 = vadd.f32 %v4107_v41, %v2797_v18  ;;  %v3569_v24 = vpop.f32.mrb[23].mxu0  ;;  %v4109_v3 = vpop.f32.mrb[75].mxu1  ;;  %5375 = vmatpush1.bf16.msra.mxu1 %v4440_v56 }
 0x406   : > { %v4191_v51 = vmax.f32 %v3566_v35, 0.0  ;;  %v4407_v40 = vmax.f32 %v4106_v60, 0.0  ;;  %v3570_v57 = vadd.f32 %v3569_v24, %v7314_v61  ;;  %v4110_v22 = vadd.f32 %v4109_v3, %v2797_v18  ;;  %v2807_v50 = vpop.permute.xlu1 %2806  ;;  %v2802_v30 = vpop.permute.xlu0 %2801 }
 0x407   : > { %v4192_v59 = vmax.f32 %v3568_v39, 0.0  ;;  %v4408_v53 = vmax.f32 %v4108_v48, 0.0  ;;  %3832 = vmatmul.mubr.bf16.gmra.mrb[128].mxu0 %v6581_v44 }
 0x408   : > { %v6100_v34 = vpack.c.bf16 %v4191_v51, %v4190_v45  ;;  %v6208_v52 = vpack.c.bf16 %v4407_v40, %v4406_v19  ;;  %v4193_v62 = vmax.f32 %v3570_v57, 0.0  ;;  %v4409_v47 = vmax.f32 %v4110_v22, 0.0  ;;  %3841 = vmatprep.mubr.bf16.mxu0 %v6582_v25  ;;  %v6585_v22 = vld [vmem:[%s8703_s5 + $0x1f4] ss:$8 sps:$4 sm:$0xff]  }
 0x409   : > { %v4442_v41 = vpack.c.bf16 %v4192_v59, %v4190_v45  ;;  %v8138_v56 = vpack.c.bf16 %v4408_v53, %v4406_v19  ;;  %v6584_v45 = vld [vmem:[%s8703_s5 + $0x1e0] ss:$8 sps:$4 sm:$0xff]  }
 0x40a   : > { %5210 = vst [vmem:[%s8097_s16 + $0x20] sm:$0xff] %v6100_v34  ;;  %5318 = vst [vmem:[%s8097_s16 + $0x380] sm:$0xff] %v6208_v52  ;;  %v4443_v35 = vpack.c.bf16 %v4193_v62, %v4191_v51  ;;  %v6101_v61 = vpack.c.bf16 %v4193_v62, %v4192_v59  ;;  %v8142_v18 = vpack.c.bf16 %v4409_v47, %v4407_v40  ;;  %v3573_v44 = vpop.f32.mrb[24].mxu0  ;;  %v4113_v39 = vpop.f32.mrb[76].mxu1 }
 0x40b   : > { %v6209_v60 = vpack.c.bf16 %v4409_v47, %v4408_v53  ;;  %v3574_v48 = vadd.f32 %v3573_v44, %v7322_v7  ;;  %v4114_v24 = vadd.f32 %v4113_v39, %v2802_v30  ;;  %v3575_v25 = vpop.f32.mrb[25].mxu0  ;;  %v4115_v3 = vpop.f32.mrb[77].mxu1 }
 0x40c   : > { %5211 = vst [vmem:[%s8097_s16 + $0x28] sm:$0xff] %v6101_v61  ;;  %v3576_v19 = vadd.f32 %v3575_v25, %v7322_v7  ;;  %v4116_v51 = vadd.f32 %v4115_v3, %v2802_v30  ;;  %v3577_v57 = vpop.f32.mrb[26].mxu0  ;;  %v4117_v40 = vpop.f32.mrb[78].mxu1  ;;  %5376 = vmatprep.subr.bf16.mxu1 %v4443_v35 }
 0x40d   : > { %5319 = vst [vmem:[%s8097_s16 + $0x388] sm:$0xff] %v6209_v60  ;;  %v4194_v59 = vmax.f32 %v3574_v48, 0.0  ;;  %v4410_v53 = vmax.f32 %v4114_v24, 0.0  ;;  %v3578_v34 = vadd.f32 %v3577_v57, %v7330_v14  ;;  %v4118_v52 = vadd.f32 %v4117_v40, %v2807_v50  ;;  %v3579_v62 = vpop.f32.mrb[27].mxu0  ;;  %v4119_v47 = vpop.f32.mrb[79].mxu1  ;;  %5377 = vmatpush1.bf16.msra.mxu1 %v4442_v41 }
 0x40e   : > { %v4195_v61 = vmax.f32 %v3576_v19, 0.0  ;;  %v4411_v60 = vmax.f32 %v4116_v51, 0.0  ;;  %v3580_v7 = vadd.f32 %v3579_v62, %v7330_v14  ;;  %v4120_v30 = vadd.f32 %v4119_v47, %v2807_v50  ;;  %v2817_v3 = vpop.permute.xlu1 %2816  ;;  %v2812_v57 = vpop.permute.xlu0 %2811 }
 0x40f   : > { %v4196_v35 = vmax.f32 %v3578_v34, 0.0  ;;  %v4412_v44 = vmax.f32 %v4118_v52, 0.0  ;;  %3842 = vmatmul.mubr.bf16.gmra.mrb[132].mxu0 %v6584_v45 }
 0x410   : > { %v6102_v39 = vpack.c.bf16 %v4195_v61, %v4194_v59  ;;  %v6210_v25 = vpack.c.bf16 %v4411_v60, %v4410_v53  ;;  %v4197_v48 = vmax.f32 %v3580_v7, 0.0  ;;  %v4413_v24 = vmax.f32 %v4120_v30, 0.0  ;;  %3851 = vmatprep.mubr.bf16.mxu0 %v6585_v22  ;;  %v6588_v30 = vld [vmem:[%s8703_s5 + $0x204] ss:$8 sps:$4 sm:$0xff]  }
 0x411   : > { %v4444_v40 = vpack.c.bf16 %v4196_v35, %v4194_v59  ;;  %v8156_v41 = vpack.c.bf16 %v4412_v44, %v4410_v53  ;;  %v6587_v59 = vld [vmem:[%s8703_s5 + $0x1f0] ss:$8 sps:$4 sm:$0xff]  }
 0x412   : > { %5212 = vst [vmem:[%s8097_s16 + $0x30] sm:$0xff] %v6102_v39  ;;  %5320 = vst [vmem:[%s8097_s16 + $0x390] sm:$0xff] %v6210_v25  ;;  %v4445_v19 = vpack.c.bf16 %v4197_v48, %v4195_v61  ;;  %v6103_v14 = vpack.c.bf16 %v4197_v48, %v4196_v35  ;;  %v8160_v50 = vpack.c.bf16 %v4413_v24, %v4411_v60  ;;  %v3583_v45 = vpop.f32.mrb[28].mxu0  ;;  %v4123_v34 = vpop.f32.mrb[80].mxu1 }
 0x413   : > { %v6211_v51 = vpack.c.bf16 %v4413_v24, %v4412_v44  ;;  %v3584_v52 = vadd.f32 %v3583_v45, %v7338_v23  ;;  %v4124_v62 = vadd.f32 %v4123_v34, %v2812_v57  ;;  %v3585_v22 = vpop.f32.mrb[29].mxu0  ;;  %v4125_v47 = vpop.f32.mrb[81].mxu1 }
 0x414   : > { %5213 = vst [vmem:[%s8097_s16 + $0x38] sm:$0xff] %v6103_v14  ;;  %v3586_v53 = vadd.f32 %v3585_v22, %v7338_v23  ;;  %v4126_v61 = vadd.f32 %v4125_v47, %v2812_v57  ;;  %v3587_v7 = vpop.f32.mrb[30].mxu0  ;;  %v4127_v60 = vpop.f32.mrb[82].mxu1  ;;  %5378 = vmatprep.subr.bf16.mxu1 %v4445_v19 }
 0x415   : > { %5321 = vst [vmem:[%s8097_s16 + $0x398] sm:$0xff] %v6211_v51  ;;  %v4198_v35 = vmax.f32 %v3584_v52, 0.0  ;;  %v4414_v44 = vmax.f32 %v4124_v62, 0.0  ;;  %v3588_v39 = vadd.f32 %v3587_v7, %v7340_v27  ;;  %v4128_v25 = vadd.f32 %v4127_v60, %v2817_v3  ;;  %v3589_v48 = vpop.f32.mrb[31].mxu0  ;;  %v4129_v24 = vpop.f32.mrb[83].mxu1  ;;  %5379 = vmatpush1.bf16.msra.mxu1 %v4444_v40 }
 0x416   : > { %v4199_v14 = vmax.f32 %v3586_v53, 0.0  ;;  %v4415_v51 = vmax.f32 %v4126_v61, 0.0  ;;  %v3590_v23 = vadd.f32 %v3589_v48, %v7340_v27  ;;  %v4130_v57 = vadd.f32 %v4129_v24, %v2817_v3  ;;  %v2827_v47 = vpop.permute.xlu1 %2826  ;;  %v2822_v7 = vpop.permute.xlu0 %2821 }
 0x417   : > { %v4200_v19 = vmax.f32 %v3588_v39, 0.0  ;;  %v4416_v45 = vmax.f32 %v4128_v25, 0.0  ;;  %3852 = vmatmul.mubr.bf16.gmra.mrb[136].mxu0 %v6587_v59  ;;  %v8850_v25 = vld [vmem:[#allocation2_spill] sm:$0xff] }
 0x418   : > { %v6104_v34 = vpack.c.bf16 %v4199_v14, %v4198_v35  ;;  %v6212_v22 = vpack.c.bf16 %v4415_v51, %v4414_v44  ;;  %v4201_v52 = vmax.f32 %v3590_v23, 0.0  ;;  %v4417_v62 = vmax.f32 %v4130_v57, 0.0  ;;  %3861 = vmatprep.mubr.bf16.mxu0 %v6588_v30 }
 0x419   : > { %v4446_v60 = vpack.c.bf16 %v4200_v19, %v4198_v35  ;;  %v8174_v40 = vpack.c.bf16 %v4416_v45, %v4414_v44  ;;  %v6590_v35 = vld [vmem:[%s8703_s5 + $0x200] ss:$8 sps:$4 sm:$0xff]  }
 0x41a   : > { %5214 = vst [vmem:[%s8097_s16 + $0x40] sm:$0xff] %v6104_v34  ;;  %5322 = vst [vmem:[%s8097_s16 + $0x3a0] sm:$0xff] %v6212_v22  ;;  %v4447_v53 = vpack.c.bf16 %v4201_v52, %v4199_v14  ;;  %v6105_v27 = vpack.c.bf16 %v4201_v52, %v4200_v19  ;;  %v8178_v3 = vpack.c.bf16 %v4417_v62, %v4415_v51  ;;  %v3593_v59 = vpop.f32.mrb[32].mxu0  ;;  %v4133_v39 = vpop.f32.mrb[84].mxu1  ;;  %v6591_v19 = vld [vmem:[%s8703_s5 + $0x214] ss:$8 sps:$4 sm:$0xff]  }
 0x41b   : > { %8848 = vst [vmem:[#allocation70_spill] sm:$0xff] %v8174_v40  ;;  %v6213_v61 = vpack.c.bf16 %v4417_v62, %v4416_v45  ;;  %v3594_v48 = vadd.f32 %v3593_v59, %v8850_v25  ;;  %v4134_v24 = vadd.f32 %v4133_v39, %v2822_v7  ;;  %v3595_v30 = vpop.f32.mrb[33].mxu0  ;;  %v4135_v23 = vpop.f32.mrb[85].mxu1  ;;  %v8851_v22 = vld [vmem:[#allocation3_spill] sm:$0xff] }
 0x41c   : > { %8849 = vst [vmem:[#allocation71_spill] sm:$0xff] %v8178_v3  ;;  %5215 = vst [vmem:[%s8097_s16 + $0x48] sm:$0xff] %v6105_v27  ;;  %v3596_v44 = vadd.f32 %v3595_v30, %v8850_v25  ;;  %v4136_v14 = vadd.f32 %v4135_v23, %v2822_v7  ;;  %v3597_v57 = vpop.f32.mrb[34].mxu0  ;;  %v4137_v51 = vpop.f32.mrb[86].mxu1  ;;  %5380 = vmatprep.subr.bf16.mxu1 %v4447_v53 }
 0x41d   : > { %5323 = vst [vmem:[%s8097_s16 + $0x3a8] sm:$0xff] %v6213_v61  ;;  %v4202_v45 = vmax.f32 %v3594_v48, 0.0  ;;  %v4418_v34 = vmax.f32 %v4134_v24, 0.0  ;;  %v3598_v52 = vadd.f32 %v3597_v57, %v8851_v22  ;;  %v4138_v62 = vadd.f32 %v4137_v51, %v2827_v47  ;;  %v3599_v59 = vpop.f32.mrb[35].mxu0  ;;  %v4139_v39 = vpop.f32.mrb[87].mxu1  ;;  %5381 = vmatpush1.bf16.msra.mxu1 %v4446_v60 }
 0x41e   : > { %v4203_v27 = vmax.f32 %v3596_v44, 0.0  ;;  %v4419_v61 = vmax.f32 %v4136_v14, 0.0  ;;  %v3600_v7 = vadd.f32 %v3599_v59, %v8851_v22  ;;  %v4140_v25 = vadd.f32 %v4139_v39, %v2827_v47  ;;  %v2837_v57 = vpop.permute.xlu1 %2836  ;;  %v2832_v51 = vpop.permute.xlu0 %2831 }
 0x41f   : > { %v4204_v53 = vmax.f32 %v3598_v52, 0.0  ;;  %v4420_v30 = vmax.f32 %v4138_v62, 0.0  ;;  %3862 = vmatmul.mubr.bf16.gmra.mrb[140].mxu0 %v6590_v35  ;;  %v8854_v62 = vld [vmem:[#allocation4_spill] sm:$0xff] }
 0x420   : > { %v6106_v23 = vpack.c.bf16 %v4203_v27, %v4202_v45  ;;  %v6214_v40 = vpack.c.bf16 %v4419_v61, %v4418_v34  ;;  %v4205_v48 = vmax.f32 %v3600_v7, 0.0  ;;  %v4421_v24 = vmax.f32 %v4140_v25, 0.0  ;;  %3871 = vmatprep.mubr.bf16.mxu0 %v6591_v19  ;;  %v6594_v25 = vld [vmem:[%s8703_s5 + $0x224] ss:$8 sps:$4 sm:$0xff]  }
 0x421   : > { %v4448_v3 = vpack.c.bf16 %v4204_v53, %v4202_v45  ;;  %v8192_v60 = vpack.c.bf16 %v4420_v30, %v4418_v34  ;;  %v6593_v45 = vld [vmem:[%s8703_s5 + $0x210] ss:$8 sps:$4 sm:$0xff]  }
 0x422   : > { %5216 = vst [vmem:[%s8097_s16 + $0x50] sm:$0xff] %v6106_v23  ;;  %5324 = vst [vmem:[%s8097_s16 + $0x3b0] sm:$0xff] %v6214_v40  ;;  %v4449_v44 = vpack.c.bf16 %v4205_v48, %v4203_v27  ;;  %v6107_v14 = vpack.c.bf16 %v4205_v48, %v4204_v53  ;;  %v8196_v47 = vpack.c.bf16 %v4421_v24, %v4419_v61  ;;  %v3603_v35 = vpop.f32.mrb[36].mxu0  ;;  %v4143_v52 = vpop.f32.mrb[88].mxu1  ;;  %v8855_v23 = vld [vmem:[#allocation5_spill] sm:$0xff] }
 0x423   : > { %8852 = vst [vmem:[#allocation2_spill] sm:$0xff] %v8192_v60  ;;  %v6215_v22 = vpack.c.bf16 %v4421_v24, %v4420_v30  ;;  %v3604_v59 = vadd.f32 %v3603_v35, %v8854_v62  ;;  %v4144_v39 = vadd.f32 %v4143_v52, %v2832_v51  ;;  %v3605_v19 = vpop.f32.mrb[37].mxu0  ;;  %v4145_v7 = vpop.f32.mrb[89].mxu1 }
 0x424   : > { %8853 = vst [vmem:[#allocation3_spill] sm:$0xff] %v8196_v47  ;;  %5217 = vst [vmem:[%s8097_s16 + $0x58] sm:$0xff] %v6107_v14  ;;  %v3606_v40 = vadd.f32 %v3605_v19, %v8854_v62  ;;  %v4146_v34 = vadd.f32 %v4145_v7, %v2832_v51  ;;  %v3607_v27 = vpop.f32.mrb[38].mxu0  ;;  %v4147_v61 = vpop.f32.mrb[90].mxu1  ;;  %5382 = vmatprep.subr.bf16.mxu1 %v4449_v44 }
 0x425   : > { %5325 = vst [vmem:[%s8097_s16 + $0x3b8] sm:$0xff] %v6215_v22  ;;  %v4206_v53 = vmax.f32 %v3604_v59, 0.0  ;;  %v4422_v30 = vmax.f32 %v4144_v39, 0.0  ;;  %v3608_v48 = vadd.f32 %v3607_v27, %v8855_v23  ;;  %v4148_v24 = vadd.f32 %v4147_v61, %v2837_v57  ;;  %v3609_v35 = vpop.f32.mrb[39].mxu0  ;;  %v4149_v52 = vpop.f32.mrb[91].mxu1  ;;  %5383 = vmatpush1.bf16.msra.mxu1 %v4448_v3 }
 0x426   : > { %v4207_v14 = vmax.f32 %v3606_v40, 0.0  ;;  %v4423_v22 = vmax.f32 %v4146_v34, 0.0  ;;  %v3610_v51 = vadd.f32 %v3609_v35, %v8855_v23  ;;  %v4150_v62 = vadd.f32 %v4149_v52, %v2837_v57  ;;  %v2847_v27 = vpop.permute.xlu1 %2846  ;;  %v2842_v61 = vpop.permute.xlu0 %2841 }
 0x427   : > { %v4208_v44 = vmax.f32 %v3608_v48, 0.0  ;;  %v4424_v19 = vmax.f32 %v4148_v24, 0.0  ;;  %3872 = vmatmul.mubr.bf16.gmra.mrb[144].mxu0 %v6593_v45  ;;  %v8858_v24 = vld [vmem:[#allocation6_spill] sm:$0xff] }
 0x428   : > { %v6108_v7 = vpack.c.bf16 %v4207_v14, %v4206_v53  ;;  %v6216_v60 = vpack.c.bf16 %v4423_v22, %v4422_v30  ;;  %v4209_v59 = vmax.f32 %v3610_v51, 0.0  ;;  %v4425_v39 = vmax.f32 %v4150_v62, 0.0  ;;  %3881 = vmatprep.mubr.bf16.mxu0 %v6594_v25  ;;  %v6597_v62 = vld [vmem:[%s8703_s5 + $0x234] ss:$8 sps:$4 sm:$0xff]  }
 0x429   : > { %v4450_v47 = vpack.c.bf16 %v4208_v44, %v4206_v53  ;;  %v8210_v3 = vpack.c.bf16 %v4424_v19, %v4422_v30  ;;  %v6596_v53 = vld [vmem:[%s8703_s5 + $0x220] ss:$8 sps:$4 sm:$0xff]  }
 0x42a   : > { %5218 = vst [vmem:[%s8097_s16 + $0x60] sm:$0xff] %v6108_v7  ;;  %5326 = vst [vmem:[%s8097_s16 + $0x3c0] sm:$0xff] %v6216_v60  ;;  %v4451_v40 = vpack.c.bf16 %v4209_v59, %v4207_v14  ;;  %v6109_v34 = vpack.c.bf16 %v4209_v59, %v4208_v44  ;;  %v8214_v57 = vpack.c.bf16 %v4425_v39, %v4423_v22  ;;  %v3613_v45 = vpop.f32.mrb[40].mxu0  ;;  %v4153_v48 = vpop.f32.mrb[92].mxu1  ;;  %v8859_v7 = vld [vmem:[#allocation7_spill] sm:$0xff] }
 0x42b   : > { %8856 = vst [vmem:[#allocation4_spill] sm:$0xff] %v8210_v3  ;;  %v6217_v23 = vpack.c.bf16 %v4425_v39, %v4424_v19  ;;  %v3614_v35 = vadd.f32 %v3613_v45, %v8858_v24  ;;  %v4154_v52 = vadd.f32 %v4153_v48, %v2842_v61  ;;  %v3615_v25 = vpop.f32.mrb[41].mxu0  ;;  %v4155_v51 = vpop.f32.mrb[93].mxu1 }
 0x42c   : > { %8857 = vst [vmem:[#allocation5_spill] sm:$0xff] %v8214_v57  ;;  %5219 = vst [vmem:[%s8097_s16 + $0x68] sm:$0xff] %v6109_v34  ;;  %v3616_v60 = vadd.f32 %v3615_v25, %v8858_v24  ;;  %v4156_v30 = vadd.f32 %v4155_v51, %v2842_v61  ;;  %v3617_v14 = vpop.f32.mrb[42].mxu0  ;;  %v4157_v22 = vpop.f32.mrb[94].mxu1  ;;  %5384 = vmatprep.subr.bf16.mxu1 %v4451_v40 }
 0x42d   : > { %5327 = vst [vmem:[%s8097_s16 + $0x3c8] sm:$0xff] %v6217_v23  ;;  %v4210_v44 = vmax.f32 %v3614_v35, 0.0  ;;  %v4426_v19 = vmax.f32 %v4154_v52, 0.0  ;;  %v3618_v59 = vadd.f32 %v3617_v14, %v8859_v7  ;;  %v4158_v39 = vadd.f32 %v4157_v22, %v2847_v27  ;;  %v3619_v45 = vpop.f32.mrb[43].mxu0  ;;  %v4159_v48 = vpop.f32.mrb[95].mxu1  ;;  %5385 = vmatpush1.bf16.msra.mxu1 %v4450_v47 }
 0x42e   : > { %v4211_v34 = vmax.f32 %v3616_v60, 0.0  ;;  %v4427_v23 = vmax.f32 %v4156_v30, 0.0  ;;  %v3620_v61 = vadd.f32 %v3619_v45, %v8859_v7  ;;  %v4160_v24 = vadd.f32 %v4159_v48, %v2847_v27  ;;  %v2857_v14 = vpop.permute.xlu1 %2856  ;;  %v2852_v22 = vpop.permute.xlu0 %2851 }
 0x42f   : > { %v4212_v40 = vmax.f32 %v3618_v59, 0.0  ;;  %v4428_v25 = vmax.f32 %v4158_v39, 0.0  ;;  %3882 = vmatmul.mubr.bf16.gmra.mrb[148].mxu0 %v6596_v53 }
 0x430   : > { %v6110_v51 = vpack.c.bf16 %v4211_v34, %v4210_v44  ;;  %v6218_v3 = vpack.c.bf16 %v4427_v23, %v4426_v19  ;;  %v4213_v35 = vmax.f32 %v3620_v61, 0.0  ;;  %v4429_v52 = vmax.f32 %v4160_v24, 0.0  ;;  %3891 = vmatprep.mubr.bf16.mxu0 %v6597_v62  ;;  %v6600_v61 = vld [vmem:[%s8703_s5 + $0x244] ss:$8 sps:$4 sm:$0xff]  }
 0x431   : > { %v4452_v57 = vpack.c.bf16 %v4212_v40, %v4210_v44  ;;  %v8228_v47 = vpack.c.bf16 %v4428_v25, %v4426_v19  ;;  %v6599_v44 = vld [vmem:[%s8703_s5 + $0x230] ss:$8 sps:$4 sm:$0xff]  }
 0x432   : > { %5220 = vst [vmem:[%s8097_s16 + $0x70] sm:$0xff] %v6110_v51  ;;  %5328 = vst [vmem:[%s8097_s16 + $0x3d0] sm:$0xff] %v6218_v3  ;;  %v4453_v60 = vpack.c.bf16 %v4213_v35, %v4211_v34  ;;  %v6111_v30 = vpack.c.bf16 %v4213_v35, %v4212_v40  ;;  %v8232_v27 = vpack.c.bf16 %v4429_v52, %v4427_v23  ;;  %v3623_v53 = vpop.f32.mrb[44].mxu0  ;;  %v4163_v59 = vpop.f32.mrb[96].mxu1 }
 0x433   : > { %v6219_v7 = vpack.c.bf16 %v4429_v52, %v4428_v25  ;;  %v3624_v39 = vadd.f32 %v3623_v53, %v7394_v33  ;;  %v4164_v45 = vadd.f32 %v4163_v59, %v2852_v22  ;;  %v3625_v62 = vpop.f32.mrb[45].mxu0  ;;  %v4165_v48 = vpop.f32.mrb[97].mxu1 }
 0x434   : > { %5221 = vst [vmem:[%s8097_s16 + $0x78] sm:$0xff] %v6111_v30  ;;  %v3626_v3 = vadd.f32 %v3625_v62, %v7394_v33  ;;  %v4166_v19 = vadd.f32 %v4165_v48, %v2852_v22  ;;  %v3627_v34 = vpop.f32.mrb[46].mxu0  ;;  %v4167_v23 = vpop.f32.mrb[98].mxu1  ;;  %5386 = vmatprep.subr.bf16.mxu1 %v4453_v60 }
 0x435   : > { %5329 = vst [vmem:[%s8097_s16 + $0x3d8] sm:$0xff] %v6219_v7  ;;  %v4214_v24 = vmax.f32 %v3624_v39, 0.0  ;;  %v4430_v40 = vmax.f32 %v4164_v45, 0.0  ;;  %v3628_v25 = vadd.f32 %v3627_v34, %v7397_v31  ;;  %v4168_v51 = vadd.f32 %v4167_v23, %v2857_v14  ;;  %v3629_v35 = vpop.f32.mrb[47].mxu0  ;;  %v4169_v52 = vpop.f32.mrb[99].mxu1  ;;  %5387 = vmatpush1.bf16.msra.mxu1 %v4452_v57 }
 0x436   : > { %v4215_v30 = vmax.f32 %v3626_v3, 0.0  ;;  %v4431_v7 = vmax.f32 %v4166_v19, 0.0  ;;  %v3630_v33 = vadd.f32 %v3629_v35, %v7397_v31  ;;  %v4170_v22 = vadd.f32 %v4169_v52, %v2857_v14  ;;  %v2867_v48 = vpop.permute.xlu1 %2866  ;;  %v2862_v34 = vpop.permute.xlu0 %2861 }
 0x437   : > { %v4216_v60 = vmax.f32 %v3628_v25, 0.0  ;;  %v4432_v53 = vmax.f32 %v4168_v51, 0.0  ;;  %3892 = vmatmul.mubr.bf16.gmra.mrb[152].mxu0 %v6599_v44 }
 0x438   : > { %v6112_v59 = vpack.c.bf16 %v4215_v30, %v4214_v24  ;;  %v6220_v62 = vpack.c.bf16 %v4431_v7, %v4430_v40  ;;  %v4217_v39 = vmax.f32 %v3630_v33, 0.0  ;;  %v4433_v45 = vmax.f32 %v4170_v22, 0.0  ;;  %3901 = vmatprep.mubr.bf16.mxu0 %v6600_v61  ;;  %v6603_v22 = vld [vmem:[%s8703_s5 + $0x254] ss:$8 sps:$4 sm:$0xff]  }
 0x439   : > { %v4454_v23 = vpack.c.bf16 %v4216_v60, %v4214_v24  ;;  %v8246_v57 = vpack.c.bf16 %v4432_v53, %v4430_v40  ;;  %v6602_v24 = vld [vmem:[%s8703_s5 + $0x240] ss:$8 sps:$4 sm:$0xff]  }
 0x43a   : > { %5222 = vst [vmem:[%s8097_s16 + $0x80] sm:$0xff] %v6112_v59  ;;  %5330 = vst [vmem:[%s8097_s16 + $0x3e0] sm:$0xff] %v6220_v62  ;;  %v4455_v3 = vpack.c.bf16 %v4217_v39, %v4215_v30  ;;  %v6113_v31 = vpack.c.bf16 %v4217_v39, %v4216_v60  ;;  %v8250_v14 = vpack.c.bf16 %v4433_v45, %v4431_v7  ;;  %v3633_v44 = vpop.f32.mrb[48].mxu0  ;;  %v4173_v25 = vpop.f32.mrb[100].mxu1 }
 0x43b   : > { %v6221_v19 = vpack.c.bf16 %v4433_v45, %v4432_v53  ;;  %v3634_v51 = vadd.f32 %v3633_v44, %v7408_v63  ;;  %v4174_v35 = vadd.f32 %v4173_v25, %v2862_v34  ;;  %v3635_v61 = vpop.f32.mrb[49].mxu0  ;;  %v4175_v52 = vpop.f32.mrb[101].mxu1 }
 0x43c   : > { %5223 = vst [vmem:[%s8097_s16 + $0x88] sm:$0xff] %v6113_v31  ;;  %v3636_v40 = vadd.f32 %v3635_v61, %v7408_v63  ;;  %v4176_v30 = vadd.f32 %v4175_v52, %v2862_v34  ;;  %v3637_v33 = vpop.f32.mrb[50].mxu0  ;;  %v4177_v7 = vpop.f32.mrb[102].mxu1  ;;  %5388 = vmatprep.subr.bf16.mxu1 %v4455_v3 }
 0x43d   : > { %5331 = vst [vmem:[%s8097_s16 + $0x3e8] sm:$0xff] %v6221_v19  ;;  %v4218_v60 = vmax.f32 %v3634_v51, 0.0  ;;  %v4434_v53 = vmax.f32 %v4174_v35, 0.0  ;;  %v3638_v59 = vadd.f32 %v3637_v33, %v7416_v49  ;;  %v4178_v62 = vadd.f32 %v4177_v7, %v2867_v48  ;;  %v3639_v39 = vpop.f32.mrb[51].mxu0  ;;  %v4179_v45 = vpop.f32.mrb[103].mxu1  ;;  %5389 = vmatpush1.bf16.msra.mxu1 %v4454_v23  ;;  %v8860_v7 = vld [vmem:[#allocation8_spill] sm:$0xff] }
 0x43e   : > { %v4219_v31 = vmax.f32 %v3636_v40, 0.0  ;;  %v4435_v63 = vmax.f32 %v4176_v30, 0.0  ;;  %v3640_v34 = vadd.f32 %v3639_v39, %v7416_v49  ;;  %v4180_v19 = vadd.f32 %v4179_v45, %v2867_v48 }
 0x43f   : > { %v4220_v3 = vmax.f32 %v3638_v59, 0.0  ;;  %v4436_v44 = vmax.f32 %v4178_v62, 0.0  ;;  %3902 = vmatmul.mubr.bf16.gmra.mrb[156].mxu0 %v6602_v24  ;;  %v6605_v62 = vld [vmem:[%s8703_s5 + $0x250] ss:$8 sps:$4 sm:$0xff]  }
 0x440   : > { %v6114_v25 = vpack.c.bf16 %v4219_v31, %v4218_v60  ;;  %v6222_v61 = vpack.c.bf16 %v4435_v63, %v4434_v53  ;;  %v4221_v51 = vmax.f32 %v3640_v34, 0.0  ;;  %v4437_v35 = vmax.f32 %v4180_v19, 0.0  ;;  %3911 = vmatprep.mubr.bf16.mxu0 %v6603_v22 }
 0x441   : > { %v4456_v52 = vpack.c.bf16 %v4220_v3, %v4218_v60  ;;  %v8264_v33 = vpack.c.bf16 %v4436_v44, %v4434_v53  ;;  %v6606_v53 = vld [vmem:[%s8703_s5 + $0x264] ss:$8 sps:$4 sm:$0xff]  }
 0x442   : > { %5224 = vst [vmem:[%s8097_s16 + $0x90] sm:$0xff] %v6114_v25  ;;  %5332 = vst [vmem:[%s8097_s16 + $0x3f0] sm:$0xff] %v6222_v61  ;;  %v4457_v23 = vpack.c.bf16 %v4221_v51, %v4219_v31  ;;  %v6115_v40 = vpack.c.bf16 %v4221_v51, %v4220_v3  ;;  %v8268_v30 = vpack.c.bf16 %v4437_v35, %v4435_v63  ;;  %v3643_v48 = vpop.f32.mrb[52].mxu0 }
 0x443   : > { %v6223_v49 = vpack.c.bf16 %v4437_v35, %v4436_v44  ;;  %v3644_v24 = vadd.f32 %v3643_v48, %v8860_v7  ;;  %v3645_v59 = vpop.f32.mrb[53].mxu0 }
 0x444   : > { %5225 = vst [vmem:[%s8097_s16 + $0x98] sm:$0xff] %v6115_v40  ;;  %v3646_v22 = vadd.f32 %v3645_v59, %v8860_v7  ;;  %v3647_v60 = vpop.f32.mrb[54].mxu0  ;;  %5390 = vmatprep.subr.bf16.mxu1 %v4457_v23  ;;  %v8861_v23 = vld [vmem:[#allocation9_spill] sm:$0xff]  ;;  %v8862_v59 = vld [vmem:[#allocation10_spill] sm:$0xff] }
 0x445   : > { %5333 = vst [vmem:[%s8097_s16 + $0x3f8] sm:$0xff] %v6223_v49  ;;  %v4222_v39 = vmax.f32 %v3644_v24, 0.0  ;;  %v3648_v45 = vadd.f32 %v3647_v60, %v7430_v38  ;;  %v3649_v31 = vpop.f32.mrb[55].mxu0  ;;  %5391 = vmatpush1.bf16.msra.mxu1 %v4456_v52  ;;  %v6608_v52 = vld [vmem:[%s8703_s5 + $0x260] ss:$8 sps:$4 sm:$0xff]  }
 0x446   : > { %v4223_v63 = vmax.f32 %v3646_v22, 0.0  ;;  %v3650_v34 = vadd.f32 %v3649_v31, %v7430_v38  ;;  %v6609_v7 = vld [vmem:[%s8703_s5 + $0x274] ss:$8 sps:$4 sm:$0xff]  }
 0x447   : > { %v4224_v19 = vmax.f32 %v3648_v45, 0.0  ;;  %3912 = vmatmul.mubr.bf16.gmra.mrb[160].mxu0 %v6605_v62 }
 0x448   : > { %v6116_v3 = vpack.c.bf16 %v4223_v63, %v4222_v39  ;;  %v4225_v44 = vmax.f32 %v3650_v34, 0.0  ;;  %3921 = vmatprep.mubr.bf16.mxu0 %v6606_v53 }
 0x449   : > { %v4458_v25 = vpack.c.bf16 %v4224_v19, %v4222_v39 }
 0x44a   : > { %5226 = vst [vmem:[%s8097_s16 + $0xa0] sm:$0xff] %v6116_v3  ;;  %v4459_v61 = vpack.c.bf16 %v4225_v44, %v4223_v63  ;;  %v6117_v51 = vpack.c.bf16 %v4225_v44, %v4224_v19  ;;  %v3653_v35 = vpop.f32.mrb[56].mxu0  ;;  %v8863_v44 = vld [vmem:[#allocation11_spill] sm:$0xff] }
 0x44b   : > { %v3654_v40 = vadd.f32 %v3653_v35, %v8861_v23  ;;  %v3655_v49 = vpop.f32.mrb[57].mxu0 }
 0x44c   : > { %5227 = vst [vmem:[%s8097_s16 + $0xa8] sm:$0xff] %v6117_v51  ;;  %v3656_v38 = vadd.f32 %v3655_v49, %v8861_v23  ;;  %v3657_v48 = vpop.f32.mrb[58].mxu0  ;;  %5392 = vmatprep.subr.bf16.mxu1 %v4459_v61 }
 0x44d   : > { %v4226_v24 = vmax.f32 %v3654_v40, 0.0  ;;  %v3658_v62 = vadd.f32 %v3657_v48, %v8862_v59  ;;  %v3659_v22 = vpop.f32.mrb[59].mxu0  ;;  %5393 = vmatpush1.bf16.msra.mxu1 %v4458_v25  ;;  %v6611_v25 = vld [vmem:[%s8703_s5 + $0x270] ss:$8 sps:$4 sm:$0xff]   ;;  %v6612_v40 = vld [vmem:[%s8703_s5 + $0x284] ss:$8 sps:$4 sm:$0xff]  }
 0x44e   : > { %v4227_v60 = vmax.f32 %v3656_v38, 0.0  ;;  %v3660_v53 = vadd.f32 %v3659_v22, %v8862_v59 }
 0x44f   : > { %v4228_v39 = vmax.f32 %v3658_v62, 0.0  ;;  %3922 = vmatmul.mubr.bf16.gmra.mrb[164].mxu0 %v6608_v52  ;;  %v8864_v52 = vld [vmem:[#allocation12_spill] sm:$0xff] }
 0x450   : > { %v6118_v45 = vpack.c.bf16 %v4227_v60, %v4226_v24  ;;  %v4229_v31 = vmax.f32 %v3660_v53, 0.0  ;;  %3931 = vmatprep.mubr.bf16.mxu0 %v6609_v7 }
 0x451   : > { %v4460_v63 = vpack.c.bf16 %v4228_v39, %v4226_v24 }
 0x452   : > { %5228 = vst [vmem:[%s8097_s16 + $0xb0] sm:$0xff] %v6118_v45  ;;  %v4461_v34 = vpack.c.bf16 %v4229_v31, %v4227_v60  ;;  %v6119_v19 = vpack.c.bf16 %v4229_v31, %v4228_v39  ;;  %v3663_v3 = vpop.f32.mrb[60].mxu0  ;;  %v8865_v31 = vld [vmem:[#allocation13_spill] sm:$0xff] }
 0x453   : > { %v3664_v61 = vadd.f32 %v3663_v3, %v8863_v44  ;;  %v3665_v51 = vpop.f32.mrb[61].mxu0 }
 0x454   : > { %5229 = vst [vmem:[%s8097_s16 + $0xb8] sm:$0xff] %v6119_v19  ;;  %v3666_v35 = vadd.f32 %v3665_v51, %v8863_v44  ;;  %v3667_v23 = vpop.f32.mrb[62].mxu0  ;;  %5394 = vmatprep.subr.bf16.mxu1 %v4461_v34 }
 0x455   : > { %v4230_v49 = vmax.f32 %v3664_v61, 0.0  ;;  %v3668_v38 = vadd.f32 %v3667_v23, %v8864_v52  ;;  %v3669_v48 = vpop.f32.mrb[63].mxu0  ;;  %5395 = vmatpush1.bf16.msra.mxu1 %v4460_v63  ;;  %v6614_v63 = vld [vmem:[%s8703_s5 + $0x280] ss:$8 sps:$4 sm:$0xff]   ;;  %v6615_v61 = vld [vmem:[%s8703_s5 + $0x294] ss:$8 sps:$4 sm:$0xff]  }
 0x456   : > { %v4231_v7 = vmax.f32 %v3666_v35, 0.0  ;;  %v3670_v24 = vadd.f32 %v3669_v48, %v8864_v52 }
 0x457   : > { %v4232_v59 = vmax.f32 %v3668_v38, 0.0  ;;  %3932 = vmatmul.mubr.bf16.gmra.mrb[168].mxu0 %v6611_v25  ;;  %v8866_v25 = vld [vmem:[#allocation14_spill] sm:$0xff] }
 0x458   : > { %v6120_v62 = vpack.c.bf16 %v4231_v7, %v4230_v49  ;;  %v4233_v22 = vmax.f32 %v3670_v24, 0.0  ;;  %3941 = vmatprep.mubr.bf16.mxu0 %v6612_v40 }
 0x459   : > { %v4462_v60 = vpack.c.bf16 %v4232_v59, %v4230_v49 }
 0x45a   : > { %5230 = vst [vmem:[%s8097_s16 + $0xc0] sm:$0xff] %v6120_v62  ;;  %v4463_v53 = vpack.c.bf16 %v4233_v22, %v4231_v7  ;;  %v6121_v39 = vpack.c.bf16 %v4233_v22, %v4232_v59  ;;  %v3673_v45 = vpop.f32.mrb[64].mxu0  ;;  %v8867_v22 = vld [vmem:[#allocation15_spill] sm:$0xff] }
 0x45b   : > { %v3674_v34 = vadd.f32 %v3673_v45, %v8865_v31  ;;  %v3675_v19 = vpop.f32.mrb[65].mxu0 }
 0x45c   : > { %5231 = vst [vmem:[%s8097_s16 + $0xc8] sm:$0xff] %v6121_v39  ;;  %v3676_v3 = vadd.f32 %v3675_v19, %v8865_v31  ;;  %v3677_v44 = vpop.f32.mrb[66].mxu0  ;;  %5396 = vmatprep.subr.bf16.mxu1 %v4463_v53 }
 0x45d   : > { %v4234_v51 = vmax.f32 %v3674_v34, 0.0  ;;  %v3678_v35 = vadd.f32 %v3677_v44, %v8866_v25  ;;  %v3679_v23 = vpop.f32.mrb[67].mxu0  ;;  %5397 = vmatpush1.bf16.msra.mxu1 %v4462_v60  ;;  %v6617_v60 = vld [vmem:[%s8703_s5 + $0x290] ss:$8 sps:$4 sm:$0xff]   ;;  %v6618_v34 = vld [vmem:[%s8703_s5 + $0x2a4] ss:$8 sps:$4 sm:$0xff]  }
 0x45e   : > { %v4235_v40 = vmax.f32 %v3676_v3, 0.0  ;;  %v3680_v49 = vadd.f32 %v3679_v23, %v8866_v25 }
 0x45f   : > { %v4236_v52 = vmax.f32 %v3678_v35, 0.0  ;;  %3942 = vmatmul.mubr.bf16.gmra.mrb[172].mxu0 %v6614_v63  ;;  %v8868_v63 = vld [vmem:[#allocation16_spill] sm:$0xff] }
 0x460   : > { %v6122_v38 = vpack.c.bf16 %v4235_v40, %v4234_v51  ;;  %v4237_v48 = vmax.f32 %v3680_v49, 0.0  ;;  %3951 = vmatprep.mubr.bf16.mxu0 %v6615_v61 }
 0x461   : > { %v4464_v7 = vpack.c.bf16 %v4236_v52, %v4234_v51 }
 0x462   : > { %5232 = vst [vmem:[%s8097_s16 + $0xd0] sm:$0xff] %v6122_v38  ;;  %v4465_v24 = vpack.c.bf16 %v4237_v48, %v4235_v40  ;;  %v6123_v59 = vpack.c.bf16 %v4237_v48, %v4236_v52  ;;  %v3683_v62 = vpop.f32.mrb[68].mxu0  ;;  %v8869_v48 = vld [vmem:[#allocation17_spill] sm:$0xff] }
 0x463   : > { %v3684_v53 = vadd.f32 %v3683_v62, %v8867_v22  ;;  %v3685_v39 = vpop.f32.mrb[69].mxu0 }
 0x464   : > { %5233 = vst [vmem:[%s8097_s16 + $0xd8] sm:$0xff] %v6123_v59  ;;  %v3686_v45 = vadd.f32 %v3685_v39, %v8867_v22  ;;  %v3687_v31 = vpop.f32.mrb[70].mxu0  ;;  %5398 = vmatprep.subr.bf16.mxu1 %v4465_v24 }
 0x465   : > { %v4238_v19 = vmax.f32 %v3684_v53, 0.0  ;;  %v3688_v3 = vadd.f32 %v3687_v31, %v8868_v63  ;;  %v3689_v44 = vpop.f32.mrb[71].mxu0  ;;  %5399 = vmatpush1.bf16.msra.mxu1 %v4464_v7  ;;  %v6620_v7 = vld [vmem:[%s8703_s5 + $0x2a0] ss:$8 sps:$4 sm:$0xff]   ;;  %v6621_v53 = vld [vmem:[%s8703_s5 + $0x2b4] ss:$8 sps:$4 sm:$0xff]  }
 0x466   : > { %v4239_v61 = vmax.f32 %v3686_v45, 0.0  ;;  %v3690_v51 = vadd.f32 %v3689_v44, %v8868_v63 }
 0x467   : > { %v4240_v25 = vmax.f32 %v3688_v3, 0.0  ;;  %3952 = vmatmul.mubr.bf16.gmra.mrb[176].mxu0 %v6617_v60 }
 0x468   : > { %v6124_v35 = vpack.c.bf16 %v4239_v61, %v4238_v19  ;;  %v4241_v23 = vmax.f32 %v3690_v51, 0.0  ;;  %3961 = vmatprep.mubr.bf16.mxu0 %v6618_v34 }
 0x469   : > { %v4466_v40 = vpack.c.bf16 %v4240_v25, %v4238_v19 }
 0x46a   : > { %5234 = vst [vmem:[%s8097_s16 + $0xe0] sm:$0xff] %v6124_v35  ;;  %v4467_v49 = vpack.c.bf16 %v4241_v23, %v4239_v61  ;;  %v6125_v52 = vpack.c.bf16 %v4241_v23, %v4240_v25  ;;  %v3693_v38 = vpop.f32.mrb[72].mxu0 }
 0x46b   : > { %v3694_v24 = vadd.f32 %v3693_v38, %v8869_v48  ;;  %v3695_v59 = vpop.f32.mrb[73].mxu0 }
 0x46c   : > { %5235 = vst [vmem:[%s8097_s16 + $0xe8] sm:$0xff] %v6125_v52  ;;  %v3696_v62 = vadd.f32 %v3695_v59, %v8869_v48  ;;  %v3697_v22 = vpop.f32.mrb[74].mxu0  ;;  %5400 = vmatprep.subr.bf16.mxu1 %v4467_v49  ;;  %v6662_v52 = vld [vmem:[%s8704_s6] sm:$0xff] }
 0x46d   : > { %v4242_v39 = vmax.f32 %v3694_v24, 0.0  ;;  %v3698_v60 = vadd.f32 %v3697_v22, %v7702_v42  ;;  %v3699_v45 = vpop.f32.mrb[75].mxu0  ;;  %5401 = vmatpush1.bf16.msra.mxu1 %v4466_v40  ;;  %v6623_v40 = vld [vmem:[%s8703_s5 + $0x2b0] ss:$8 sps:$4 sm:$0xff]   ;;  %v6082_v38 = vcombine.low %v6662_v52, %v6662_v52  ;;  %v6626_v48 = vld [vmem:[%s8703_s5 + $0x2c4] ss:$8 sps:$4 sm:$0xff]  }
 0x46e   : > { %v4243_v31 = vmax.f32 %v3696_v62, 0.0  ;;  %v3700_v34 = vadd.f32 %v3699_v45, %v7702_v42  ;;  %v8360_v45 = vld [vmem:[%s8704_s6 + $0x8] sm:$0xff] }
 0x46f   : > { %v4244_v19 = vmax.f32 %v3698_v60, 0.0  ;;  %3962 = vmatmul.mubr.bf16.gmra.mrb[180].mxu0 %v6620_v7 }
 0x470   : > { %v6126_v63 = vpack.c.bf16 %v4243_v31, %v4242_v39  ;;  %v4245_v3 = vmax.f32 %v3700_v34, 0.0  ;;  %3971 = vmatprep.mubr.bf16.mxu0 %v6621_v53 }
 0x471   : > { %v4468_v44 = vpack.c.bf16 %v4244_v19, %v4242_v39 }
 0x472   : > { %5236 = vst [vmem:[%s8097_s16 + $0xf0] sm:$0xff] %v6126_v63  ;;  %v4469_v61 = vpack.c.bf16 %v4245_v3, %v4243_v31  ;;  %v6127_v51 = vpack.c.bf16 %v4245_v3, %v4244_v19  ;;  %v3703_v25 = vpop.f32.mrb[76].mxu0 }
 0x473   : > { %v3704_v35 = vadd.f32 %v3703_v25, %v7709_v43  ;;  %v3705_v23 = vpop.f32.mrb[77].mxu0  ;;  %v6629_v25 = vld [vmem:[%s8703_s5 + $0x2d4] ss:$8 sps:$4 sm:$0xff]  }
 0x474   : > { %5237 = vst [vmem:[%s8097_s16 + $0xf8] sm:$0xff] %v6127_v51  ;;  %v3706_v42 = vadd.f32 %v3705_v23, %v7709_v43  ;;  %v3707_v49 = vpop.f32.mrb[78].mxu0  ;;  %5402 = vmatprep.subr.bf16.mxu1 %v4469_v61 }
 0x475   : > { %v4246_v24 = vmax.f32 %v3704_v35, 0.0  ;;  %v3708_v59 = vadd.f32 %v3707_v49, %v7706_v1  ;;  %v3709_v7 = vpop.f32.mrb[79].mxu0  ;;  %5403 = vmatpush1.bf16.msra.mxu1 %v4468_v44  ;;  %v6628_v44 = vld [vmem:[%s8703_s5 + $0x2c0] ss:$8 sps:$4 sm:$0xff]  }
 0x476   : > { %v4247_v62 = vmax.f32 %v3706_v42, 0.0  ;;  %v3710_v43 = vadd.f32 %v3709_v7, %v7706_v1  ;;  %v6085_v1 = vcombine.high %v8360_v45, %v8360_v45 }
 0x477   : > { %v4248_v22 = vmax.f32 %v3708_v59, 0.0  ;;  %3972 = vmatmul.mubr.bf16.gmra.mrb[184].mxu0 %v6623_v40 }
 0x478   : > { %v6128_v53 = vpack.c.bf16 %v4247_v62, %v4246_v24  ;;  %v4249_v39 = vmax.f32 %v3710_v43, 0.0  ;;  %5405 = vmatmul.mubr.bf16.vlgmr.msra.gmra.mrb[104].mxu1 %v6082_v38  ;;  %3981 = vmatprep.mubr.bf16.mxu0 %v6626_v48 }
 0x479   : > { %v4470_v60 = vpack.c.bf16 %v4248_v22, %v4246_v24  ;;  %5445 = vmatprep.mubr.bf16.mxu1 %v6085_v1 }
 0x47a   : > { %5238 = vst [vmem:[%s8097_s16 + $0x100] sm:$0xff] %v6128_v53  ;;  %v4471_v31 = vpack.c.bf16 %v4249_v39, %v4247_v62  ;;  %v6129_v34 = vpack.c.bf16 %v4249_v39, %v4248_v22  ;;  %v3713_v19 = vpop.f32.mrb[80].mxu0  ;;  %v6631_v22 = vld [vmem:[%s8703_s5 + $0x2d0] ss:$8 sps:$4 sm:$0xff]   ;;  %v6632_v39 = vld [vmem:[%s8703_s5 + $0x2e4] ss:$8 sps:$4 sm:$0xff]  }
 0x47b   : > { %v3714_v63 = vadd.f32 %v3713_v19, %v7715_v55  ;;  %v3715_v3 = vpop.f32.mrb[81].mxu0 }
 0x47c   : > { %5239 = vst [vmem:[%s8097_s16 + $0x108] sm:$0xff] %v6129_v34  ;;  %v3716_v61 = vadd.f32 %v3715_v3, %v7715_v55  ;;  %v3717_v51 = vpop.f32.mrb[82].mxu0  ;;  %5413 = vmatprep.subr.bf16.mxu1 %v4471_v31 }
 0x47d   : > { %v4250_v35 = vmax.f32 %v3714_v63, 0.0  ;;  %v3718_v23 = vadd.f32 %v3717_v51, %v7712_v21  ;;  %v3719_v40 = vpop.f32.mrb[83].mxu0  ;;  %5414 = vmatpush1.bf16.msra.mxu1 %v4470_v60 }
 0x47e   : > { %v4251_v42 = vmax.f32 %v3716_v61, 0.0  ;;  %v3720_v49 = vadd.f32 %v3719_v40, %v7712_v21  ;;  %v6634_v40 = vld [vmem:[%s8703_s5 + $0x2e0] ss:$8 sps:$4 sm:$0xff]  }
 0x47f   : > { %v4252_v52 = vmax.f32 %v3718_v23, 0.0  ;;  %3982 = vmatmul.mubr.bf16.gmra.mrb[188].mxu0 %v6628_v44 }
 0x480   : > { %v6130_v55 = vpack.c.bf16 %v4251_v42, %v4250_v35  ;;  %v4253_v38 = vmax.f32 %v3720_v49, 0.0  ;;  %3991 = vmatprep.mubr.bf16.mxu0 %v6629_v25  ;;  %v6635_v49 = vld [vmem:[%s8703_s5 + $0x2f4] ss:$8 sps:$4 sm:$0xff]  }
 0x481   : > { %v4472_v48 = vpack.c.bf16 %v4252_v52, %v4250_v35 }
 0x482   : > { %5240 = vst [vmem:[%s8097_s16 + $0x110] sm:$0xff] %v6130_v55  ;;  %v4473_v24 = vpack.c.bf16 %v4253_v38, %v4251_v42  ;;  %v6131_v59 = vpack.c.bf16 %v4253_v38, %v4252_v52  ;;  %v3723_v7 = vpop.f32.mrb[84].mxu0 }
 0x483   : > { %v3724_v62 = vadd.f32 %v3723_v7, %v7722_v6  ;;  %v3725_v43 = vpop.f32.mrb[85].mxu0 }
 0x484   : > { %5241 = vst [vmem:[%s8097_s16 + $0x118] sm:$0xff] %v6131_v59  ;;  %v3726_v21 = vadd.f32 %v3725_v43, %v7722_v6  ;;  %v3727_v53 = vpop.f32.mrb[86].mxu0  ;;  %5415 = vmatprep.subr.bf16.mxu1 %v4473_v24 }
 0x485   : > { %v4254_v60 = vmax.f32 %v3724_v62, 0.0  ;;  %v3728_v31 = vadd.f32 %v3727_v53, %v7720_v26  ;;  %v3729_v34 = vpop.f32.mrb[87].mxu0  ;;  %5416 = vmatpush1.bf16.msra.mxu1 %v4472_v48 }
 0x486   : > { %v4255_v19 = vmax.f32 %v3726_v21, 0.0  ;;  %v3730_v1 = vadd.f32 %v3729_v34, %v7720_v26  ;;  %v6638_v34 = vld [vmem:[%s8703_s5 + $0x304] ss:$8 sps:$4 sm:$0xff]  }
 0x487   : > { %v4256_v63 = vmax.f32 %v3728_v31, 0.0  ;;  %3992 = vmatmul.mubr.bf16.gmra.mrb[192].mxu0 %v6631_v22 }
 0x488   : > { %v6132_v3 = vpack.c.bf16 %v4255_v19, %v4254_v60  ;;  %v4257_v6 = vmax.f32 %v3730_v1, 0.0  ;;  %4001 = vmatprep.mubr.bf16.mxu0 %v6632_v39 }
 0x489   : > { %v4474_v44 = vpack.c.bf16 %v4256_v63, %v4254_v60  ;;  %v6637_v60 = vld [vmem:[%s8703_s5 + $0x2f0] ss:$8 sps:$4 sm:$0xff]  }
 0x48a   : > { %5242 = vst [vmem:[%s8097_s16 + $0x120] sm:$0xff] %v6132_v3  ;;  %v4475_v61 = vpack.c.bf16 %v4257_v6, %v4255_v19  ;;  %v6133_v51 = vpack.c.bf16 %v4257_v6, %v4256_v63  ;;  %v3733_v25 = vpop.f32.mrb[88].mxu0 }
 0x48b   : > { %v3734_v35 = vadd.f32 %v3733_v25, %v7738_v11  ;;  %v3735_v23 = vpop.f32.mrb[89].mxu0 }
 0x48c   : > { %5243 = vst [vmem:[%s8097_s16 + $0x128] sm:$0xff] %v6133_v51  ;;  %v3736_v26 = vadd.f32 %v3735_v23, %v7738_v11  ;;  %v3737_v42 = vpop.f32.mrb[90].mxu0  ;;  %5417 = vmatprep.subr.bf16.mxu1 %v4475_v61 }
 0x48d   : > { %v4258_v52 = vmax.f32 %v3734_v35, 0.0  ;;  %v3738_v55 = vadd.f32 %v3737_v42, %v7736_v16  ;;  %v3739_v38 = vpop.f32.mrb[91].mxu0  ;;  %5418 = vmatpush1.bf16.msra.mxu1 %v4474_v44  ;;  %v6640_v42 = vld [vmem:[%s8703_s5 + $0x300] ss:$8 sps:$4 sm:$0xff]  }
 0x48e   : > { %v4259_v48 = vmax.f32 %v3736_v26, 0.0  ;;  %v3740_v24 = vadd.f32 %v3739_v38, %v7736_v16 }
 0x48f   : > { %v4260_v59 = vmax.f32 %v3738_v55, 0.0  ;;  %4002 = vmatmul.mubr.bf16.gmra.mrb[196].mxu0 %v6634_v40 }
 0x490   : > { %v6134_v7 = vpack.c.bf16 %v4259_v48, %v4258_v52  ;;  %v4261_v11 = vmax.f32 %v3740_v24, 0.0  ;;  %4011 = vmatprep.mubr.bf16.mxu0 %v6635_v49 }
 0x491   : > { %v4476_v62 = vpack.c.bf16 %v4260_v59, %v4258_v52  ;;  %v6641_v52 = vld [vmem:[%s8703_s5 + $0x314] ss:$8 sps:$4 sm:$0xff]  }
 0x492   : > { %5244 = vst [vmem:[%s8097_s16 + $0x130] sm:$0xff] %v6134_v7  ;;  %v4477_v43 = vpack.c.bf16 %v4261_v11, %v4259_v48  ;;  %v6135_v22 = vpack.c.bf16 %v4261_v11, %v4260_v59  ;;  %v3743_v21 = vpop.f32.mrb[92].mxu0 }
 0x493   : > { %v3744_v53 = vadd.f32 %v3743_v21, %v7754_v29  ;;  %v3745_v39 = vpop.f32.mrb[93].mxu0 }
 0x494   : > { %5245 = vst [vmem:[%s8097_s16 + $0x138] sm:$0xff] %v6135_v22  ;;  %v3746_v16 = vadd.f32 %v3745_v39, %v7754_v29  ;;  %v3747_v31 = vpop.f32.mrb[94].mxu0  ;;  %5419 = vmatprep.subr.bf16.mxu1 %v4477_v43 }
 0x495   : > { %v4262_v19 = vmax.f32 %v3744_v53, 0.0  ;;  %v3748_v1 = vadd.f32 %v3747_v31, %v7752_v10  ;;  %v3749_v63 = vpop.f32.mrb[95].mxu0  ;;  %5420 = vmatpush1.bf16.msra.mxu1 %v4476_v62  ;;  %v6644_v31 = vld [vmem:[%s8703_s5 + $0x324] ss:$8 sps:$4 sm:$0xff]  }
 0x496   : > { %v4263_v3 = vmax.f32 %v3746_v16, 0.0  ;;  %v3750_v6 = vadd.f32 %v3749_v63, %v7752_v10 }
 0x497   : > { %v4264_v44 = vmax.f32 %v3748_v1, 0.0  ;;  %4012 = vmatmul.mubr.bf16.gmra.mrb[200].mxu0 %v6637_v60  ;;  %v6643_v60 = vld [vmem:[%s8703_s5 + $0x310] ss:$8 sps:$4 sm:$0xff]  }
 0x498   : > { %v6136_v61 = vpack.c.bf16 %v4263_v3, %v4262_v19  ;;  %v4265_v29 = vmax.f32 %v3750_v6, 0.0  ;;  %4021 = vmatprep.mubr.bf16.mxu0 %v6638_v34 }
 0x499   : > { %v4478_v51 = vpack.c.bf16 %v4264_v44, %v4262_v19 }
 0x49a   : > { %5246 = vst [vmem:[%s8097_s16 + $0x140] sm:$0xff] %v6136_v61  ;;  %v4479_v25 = vpack.c.bf16 %v4265_v29, %v4263_v3  ;;  %v6137_v35 = vpack.c.bf16 %v4265_v29, %v4264_v44  ;;  %v3753_v23 = vpop.f32.mrb[96].mxu0 }
 0x49b   : > { %v3754_v40 = vadd.f32 %v3753_v23, %v7758_v58  ;;  %v3755_v26 = vpop.f32.mrb[97].mxu0 }
 0x49c   : > { %5247 = vst [vmem:[%s8097_s16 + $0x148] sm:$0xff] %v6137_v35  ;;  %v3756_v10 = vadd.f32 %v3755_v26, %v7758_v58  ;;  %v3757_v49 = vpop.f32.mrb[98].mxu0  ;;  %5421 = vmatprep.subr.bf16.mxu1 %v4479_v25 }
 0x49d   : > { %v4266_v55 = vmax.f32 %v3754_v40, 0.0  ;;  %v3758_v38 = vadd.f32 %v3757_v49, %v7756_v17  ;;  %v3759_v48 = vpop.f32.mrb[99].mxu0  ;;  %5422 = vmatpush1.bf16.msra.mxu1 %v4478_v51  ;;  %v6646_v40 = vld [vmem:[%s8703_s5 + $0x320] ss:$8 sps:$4 sm:$0xff]  }
 0x49e   : > { %v4267_v24 = vmax.f32 %v3756_v10, 0.0  ;;  %v3760_v59 = vadd.f32 %v3759_v48, %v7756_v17 }
 0x49f   : > { %v4268_v7 = vmax.f32 %v3758_v38, 0.0  ;;  %4022 = vmatmul.mubr.bf16.gmra.mrb[204].mxu0 %v6640_v42  ;;  %v6647_v42 = vld [vmem:[%s8703_s5 + $0x334] ss:$8 sps:$4 sm:$0xff]  }
 0x4a0   : > { %v6138_v11 = vpack.c.bf16 %v4267_v24, %v4266_v55  ;;  %v4269_v58 = vmax.f32 %v3760_v59, 0.0  ;;  %4031 = vmatprep.mubr.bf16.mxu0 %v6641_v52 }
 0x4a1   : > { %v4480_v62 = vpack.c.bf16 %v4268_v7, %v4266_v55 }
 0x4a2   : > { %5248 = vst [vmem:[%s8097_s16 + $0x150] sm:$0xff] %v6138_v11  ;;  %v4481_v43 = vpack.c.bf16 %v4269_v58, %v4267_v24  ;;  %v6139_v22 = vpack.c.bf16 %v4269_v58, %v4268_v7  ;;  %v3763_v21 = vpop.f32.mrb[100].mxu0 }
 0x4a3   : > { %v3764_v53 = vadd.f32 %v3763_v21, %v7774_v13  ;;  %v3765_v39 = vpop.f32.mrb[101].mxu0 }
 0x4a4   : > { %5249 = vst [vmem:[%s8097_s16 + $0x158] sm:$0xff] %v6139_v22  ;;  %v3766_v17 = vadd.f32 %v3765_v39, %v7774_v13  ;;  %v3767_v16 = vpop.f32.mrb[102].mxu0  ;;  %5423 = vmatprep.subr.bf16.mxu1 %v4481_v43  ;;  %v6649_v22 = vld [vmem:[%s8703_s5 + $0x330] ss:$8 sps:$4 sm:$0xff]  }
 0x4a5   : > { %v4270_v34 = vmax.f32 %v3764_v53, 0.0  ;;  %v3768_v19 = vadd.f32 %v3767_v16, %v7772_v32  ;;  %v3769_v1 = vpop.f32.mrb[103].mxu0  ;;  %5424 = vmatpush1.bf16.msra.mxu1 %v4480_v62  ;;  %v6650_v53 = vld [vmem:[%s8703_s5 + $0x344] ss:$8 sps:$4 sm:$0xff]  }
 0x4a6   : > { %v4271_v63 = vmax.f32 %v3766_v17, 0.0  ;;  %v3770_v3 = vadd.f32 %v3769_v1, %v7772_v32 }
 0x4a7   : > { %v4272_v6 = vmax.f32 %v3768_v19, 0.0  ;;  %4032 = vmatmul.mubr.bf16.gmra.mrb[208].mxu0 %v6643_v60 }
 0x4a8   : > { %v6140_v44 = vpack.c.bf16 %v4271_v63, %v4270_v34  ;;  %v4273_v13 = vmax.f32 %v3770_v3, 0.0  ;;  %4041 = vmatprep.mubr.bf16.mxu0 %v6644_v31 }
 0x4a9   : > { %v4482_v61 = vpack.c.bf16 %v4272_v6, %v4270_v34 }
 0x4aa   : > { %5250 = vst [vmem:[%s8097_s16 + $0x160] sm:$0xff] %v6140_v44  ;;  %v4483_v29 = vpack.c.bf16 %v4273_v13, %v4271_v63  ;;  %v6141_v51 = vpack.c.bf16 %v4273_v13, %v4272_v6  ;;  %v3773_v25 = vpop.f32.mrb[104].mxu0 }
 0x4ab   : > { %v3774_v35 = vadd.f32 %v3773_v25, %v7790_v2  ;;  %v3775_v23 = vpop.f32.mrb[105].mxu0 }
 0x4ac   : > { %5251 = vst [vmem:[%s8097_s16 + $0x168] sm:$0xff] %v6141_v51  ;;  %v3776_v32 = vadd.f32 %v3775_v23, %v7790_v2  ;;  %v3777_v26 = vpop.f32.mrb[106].mxu0  ;;  %5425 = vmatprep.subr.bf16.mxu1 %v4483_v29  ;;  %v6653_v51 = vld [vmem:[%s8703_s5 + $0x354] ss:$8 sps:$4 sm:$0xff]  }
 0x4ad   : > { %v4274_v10 = vmax.f32 %v3774_v35, 0.0  ;;  %v3778_v49 = vadd.f32 %v3777_v26, %v7788_v12  ;;  %v3779_v52 = vpop.f32.mrb[107].mxu0  ;;  %5426 = vmatpush1.bf16.msra.mxu1 %v4482_v61  ;;  %v6652_v61 = vld [vmem:[%s8703_s5 + $0x340] ss:$8 sps:$4 sm:$0xff]  }
 0x4ae   : > { %v4275_v55 = vmax.f32 %v3776_v32, 0.0  ;;  %v3780_v38 = vadd.f32 %v3779_v52, %v7788_v12 }
 0x4af   : > { %v4276_v48 = vmax.f32 %v3778_v49, 0.0  ;;  %4042 = vmatmul.mubr.bf16.gmra.mrb[212].mxu0 %v6646_v40 }
 0x4b0   : > { %v6142_v24 = vpack.c.bf16 %v4275_v55, %v4274_v10  ;;  %v4277_v2 = vmax.f32 %v3780_v38, 0.0  ;;  %4051 = vmatprep.mubr.bf16.mxu0 %v6647_v42 }
 0x4b1   : > { %v4484_v59 = vpack.c.bf16 %v4276_v48, %v4274_v10 }
 0x4b2   : > { %5252 = vst [vmem:[%s8097_s16 + $0x170] sm:$0xff] %v6142_v24  ;;  %v4485_v7 = vpack.c.bf16 %v4277_v2, %v4275_v55  ;;  %v6143_v11 = vpack.c.bf16 %v4277_v2, %v4276_v48  ;;  %v3783_v58 = vpop.f32.mrb[108].mxu0  ;;  %v6655_v24 = vld [vmem:[%s8703_s5 + $0x350] ss:$8 sps:$4 sm:$0xff]  }
 0x4b3   : > { %v3784_v62 = vadd.f32 %v3783_v58, %v7806_v5  ;;  %v3785_v43 = vpop.f32.mrb[109].mxu0 }
 0x4b4   : > { %5253 = vst [vmem:[%s8097_s16 + $0x178] sm:$0xff] %v6143_v11  ;;  %v3786_v12 = vadd.f32 %v3785_v43, %v7806_v5  ;;  %v3787_v21 = vpop.f32.mrb[110].mxu0  ;;  %5427 = vmatprep.subr.bf16.mxu1 %v4485_v7 }
 0x4b5   : > { %v4278_v39 = vmax.f32 %v3784_v62, 0.0  ;;  %v3788_v60 = vadd.f32 %v3787_v21, %v7804_v54  ;;  %v3789_v17 = vpop.f32.mrb[111].mxu0  ;;  %5428 = vmatpush1.bf16.msra.mxu1 %v4484_v59 }
 0x4b6   : > { %v4279_v16 = vmax.f32 %v3786_v12, 0.0  ;;  %v3790_v31 = vadd.f32 %v3789_v17, %v7804_v54 }
 0x4b7   : > { %v4280_v34 = vmax.f32 %v3788_v60, 0.0  ;;  %4052 = vmatmul.mubr.bf16.gmra.mrb[216].mxu0 %v6649_v22 }
 0x4b8   : > { %v6144_v19 = vpack.c.bf16 %v4279_v16, %v4278_v39  ;;  %v4281_v5 = vmax.f32 %v3790_v31, 0.0  ;;  %4061 = vmatprep.mubr.bf16.mxu0 %v6650_v53 }
 0x4b9   : > { %v4486_v1 = vpack.c.bf16 %v4280_v34, %v4278_v39 }
 0x4ba   : > { %5254 = vst [vmem:[%s8097_s16 + $0x180] sm:$0xff] %v6144_v19  ;;  %v4487_v63 = vpack.c.bf16 %v4281_v5, %v4279_v16  ;;  %v6145_v3 = vpack.c.bf16 %v4281_v5, %v4280_v34  ;;  %v3793_v6 = vpop.f32.mrb[112].mxu0 }
 0x4bb   : > { %v3794_v44 = vadd.f32 %v3793_v6, %v7810_v20  ;;  %v3795_v13 = vpop.f32.mrb[113].mxu0 }
 0x4bc   : > { %5255 = vst [vmem:[%s8097_s16 + $0x188] sm:$0xff] %v6145_v3  ;;  %v3796_v54 = vadd.f32 %v3795_v13, %v7810_v20  ;;  %v3797_v29 = vpop.f32.mrb[114].mxu0  ;;  %5429 = vmatprep.subr.bf16.mxu1 %v4487_v63 }
 0x4bd   : > { %v4282_v25 = vmax.f32 %v3794_v44, 0.0  ;;  %v3798_v35 = vadd.f32 %v3797_v29, %v7808_v36  ;;  %v3799_v23 = vpop.f32.mrb[115].mxu0  ;;  %5430 = vmatpush1.bf16.msra.mxu1 %v4486_v1 }
 0x4be   : > { %v4283_v40 = vmax.f32 %v3796_v54, 0.0  ;;  %v3800_v32 = vadd.f32 %v3799_v23, %v7808_v36 }
 0x4bf   : > { %v4284_v26 = vmax.f32 %v3798_v35, 0.0  ;;  %4062 = vmatmul.mubr.bf16.gmra.mrb[220].mxu0 %v6652_v61 }
 0x4c0   : > { %v6146_v42 = vpack.c.bf16 %v4283_v40, %v4282_v25  ;;  %v4285_v20 = vmax.f32 %v3800_v32, 0.0  ;;  %4071 = vmatprep.mubr.bf16.mxu0 %v6653_v51 }
 0x4c1   : > { %v4488_v10 = vpack.c.bf16 %v4284_v26, %v4282_v25 }
 0x4c2   : > { %5256 = vst [vmem:[%s8097_s16 + $0x190] sm:$0xff] %v6146_v42  ;;  %v4489_v49 = vpack.c.bf16 %v4285_v20, %v4283_v40  ;;  %v6147_v52 = vpack.c.bf16 %v4285_v20, %v4284_v26  ;;  %v3803_v55 = vpop.f32.mrb[116].mxu0 }
 0x4c3   : > { %v3804_v38 = vadd.f32 %v3803_v55, %v7826_v28  ;;  %v3805_v48 = vpop.f32.mrb[117].mxu0 }
 0x4c4   : > { %5257 = vst [vmem:[%s8097_s16 + $0x198] sm:$0xff] %v6147_v52  ;;  %v3806_v36 = vadd.f32 %v3805_v48, %v7826_v28  ;;  %v3807_v2 = vpop.f32.mrb[118].mxu0  ;;  %5431 = vmatprep.subr.bf16.mxu1 %v4489_v49 }
 0x4c5   : > { %v4286_v59 = vmax.f32 %v3804_v38, 0.0  ;;  %v3808_v7 = vadd.f32 %v3807_v2, %v7824_v15  ;;  %v3809_v11 = vpop.f32.mrb[119].mxu0  ;;  %5432 = vmatpush1.bf16.msra.mxu1 %v4488_v10 }
 0x4c6   : > { %v4287_v58 = vmax.f32 %v3806_v36, 0.0  ;;  %v3810_v62 = vadd.f32 %v3809_v11, %v7824_v15 }
 0x4c7   : > { %v4288_v43 = vmax.f32 %v3808_v7, 0.0  ;;  %4072 = vmatmul.mubr.bf16.gmra.mrb[224].mxu0 %v6655_v24 }
 0x4c8   : > { %v6148_v22 = vpack.c.bf16 %v4287_v58, %v4286_v59  ;;  %v4289_v12 = vmax.f32 %v3810_v62, 0.0 }
 0x4c9   : > { %v4490_v21 = vpack.c.bf16 %v4288_v43, %v4286_v59  ;;  %v8871_v59 = vld [vmem:[#allocation18_spill] sm:$0xff] }
 0x4ca   : > { %5258 = vst [vmem:[%s8097_s16 + $0x1a0] sm:$0xff] %v6148_v22  ;;  %v4491_v53 = vpack.c.bf16 %v4289_v12, %v4287_v58  ;;  %v6149_v39 = vpack.c.bf16 %v4289_v12, %v4288_v43  ;;  %v3813_v28 = vpop.f32.mrb[120].mxu0 }
 0x4cb   : > { %v3814_v60 = vadd.f32 %v3813_v28, %v7842_v46  ;;  %v3815_v17 = vpop.f32.mrb[121].mxu0  ;;  %v8872_v28 = vld [vmem:[#allocation21_spill] sm:$0xff] }
 0x4cc   : > { %5259 = vst [vmem:[%s8097_s16 + $0x1a8] sm:$0xff] %v6149_v39  ;;  %v3816_v16 = vadd.f32 %v3815_v17, %v7842_v46  ;;  %v3817_v31 = vpop.f32.mrb[122].mxu0  ;;  %5433 = vmatprep.subr.bf16.mxu1 %v4491_v53 }
 0x4cd   : > { %v4290_v34 = vmax.f32 %v3814_v60, 0.0  ;;  %v3818_v15 = vadd.f32 %v3817_v31, %v7840_v0  ;;  %v3819_v19 = vpop.f32.mrb[123].mxu0  ;;  %5434 = vmatpush1.bf16.msra.mxu1 %v4490_v21 }
 0x4ce   : > { %v4291_v5 = vmax.f32 %v3816_v16, 0.0  ;;  %v3820_v1 = vadd.f32 %v3819_v19, %v7840_v0 }
 0x4cf   : > { %v4292_v63 = vmax.f32 %v3818_v15, 0.0  ;;  %v8873_v15 = vld [vmem:[#allocation20_spill] sm:$0xff] }
 0x4d0   : > { %v6150_v3 = vpack.c.bf16 %v4291_v5, %v4290_v34  ;;  %v4293_v6 = vmax.f32 %v3820_v1, 0.0 }
 0x4d1   : > { %v4492_v44 = vpack.c.bf16 %v4292_v63, %v4290_v34 }
 0x4d2   : > { %5260 = vst [vmem:[%s8097_s16 + $0x1b0] sm:$0xff] %v6150_v3  ;;  %v4493_v13 = vpack.c.bf16 %v4293_v6, %v4291_v5  ;;  %v6151_v61 = vpack.c.bf16 %v4293_v6, %v4292_v63  ;;  %v3823_v54 = vpop.f32.mrb[124].mxu0 }
 0x4d3   : > { %v3824_v46 = vadd.f32 %v3823_v54, %v7858_v8  ;;  %v3825_v29 = vpop.f32.mrb[125].mxu0 }
 0x4d4   : > { %5261 = vst [vmem:[%s8097_s16 + $0x1b8] sm:$0xff] %v6151_v61  ;;  %v3826_v51 = vadd.f32 %v3825_v29, %v7858_v8  ;;  %v3827_v25 = vpop.f32.mrb[126].mxu0  ;;  %5435 = vmatprep.subr.bf16.mxu1 %v4493_v13  ;;  %v8870_v8 = vld [vmem:[#allocation19_spill] sm:$0xff] }
 0x4d5   : > { %v4294_v35 = vmax.f32 %v3824_v46, 0.0  ;;  %v3828_v0 = vadd.f32 %v3827_v25, %v7856_v9  ;;  %v3829_v23 = vpop.f32.mrb[127].mxu0  ;;  %5436 = vmatpush1.bf16.msra.mxu1 %v4492_v44  ;;  %v8874_v29 = vld [vmem:[#allocation23_spill] sm:$0xff] }
 0x4d6   : > { %v4295_v40 = vmax.f32 %v3826_v51, 0.0  ;;  %v3830_v32 = vadd.f32 %v3829_v23, %v7856_v9 }
 0x4d7   : > { %v4296_v26 = vmax.f32 %v3828_v0, 0.0 }
 0x4d8   : > { %v6152_v42 = vpack.c.bf16 %v4295_v40, %v4294_v35  ;;  %v4297_v20 = vmax.f32 %v3830_v32, 0.0 }
 0x4d9   : > { %v4494_v10 = vpack.c.bf16 %v4296_v26, %v4294_v35 }
 0x4da   : > { %5262 = vst [vmem:[%s8097_s16 + $0x1c0] sm:$0xff] %v6152_v42  ;;  %v4495_v49 = vpack.c.bf16 %v4297_v20, %v4295_v40  ;;  %v6153_v52 = vpack.c.bf16 %v4297_v20, %v4296_v26  ;;  %v3833_v55 = vpop.f32.mrb[128].mxu0  ;;  %v8875_v40 = vld [vmem:[#allocation22_spill] sm:$0xff] }
 0x4db   : > { %v3834_v38 = vadd.f32 %v3833_v55, %v8870_v8  ;;  %v3835_v48 = vpop.f32.mrb[129].mxu0 }
 0x4dc   : > { %5263 = vst [vmem:[%s8097_s16 + $0x1c8] sm:$0xff] %v6153_v52  ;;  %v3836_v24 = vadd.f32 %v3835_v48, %v8870_v8  ;;  %v3837_v36 = vpop.f32.mrb[130].mxu0  ;;  %5437 = vmatprep.subr.bf16.mxu1 %v4495_v49 }
 0x4dd   : > { %v4298_v2 = vmax.f32 %v3834_v38, 0.0  ;;  %v3838_v9 = vadd.f32 %v3837_v36, %v8871_v59  ;;  %v3839_v7 = vpop.f32.mrb[131].mxu0  ;;  %5438 = vmatpush1.bf16.msra.mxu1 %v4494_v10 }
 0x4de   : > { %v4299_v11 = vmax.f32 %v3836_v24, 0.0  ;;  %v3840_v58 = vadd.f32 %v3839_v7, %v8871_v59  ;;  %v8876_v24 = vld [vmem:[#allocation25_spill] sm:$0xff]  ;;  %v6084_v7 = vcombine.low %v8360_v45, %v8360_v45 }
 0x4df   : > { %v4300_v62 = vmax.f32 %v3838_v9, 0.0 }
 0x4e0   : > { %v6154_v43 = vpack.c.bf16 %v4299_v11, %v4298_v2  ;;  %v4301_v22 = vmax.f32 %v3840_v58, 0.0  ;;  %v8877_v58 = vld [vmem:[#allocation24_spill] sm:$0xff] }
 0x4e1   : > { %v4496_v12 = vpack.c.bf16 %v4300_v62, %v4298_v2 }
 0x4e2   : > { %5264 = vst [vmem:[%s8097_s16 + $0x1d0] sm:$0xff] %v6154_v43  ;;  %v4497_v21 = vpack.c.bf16 %v4301_v22, %v4299_v11  ;;  %v6155_v53 = vpack.c.bf16 %v4301_v22, %v4300_v62  ;;  %v3843_v39 = vpop.f32.mrb[132].mxu0 }
 0x4e3   : > { %v3844_v60 = vadd.f32 %v3843_v39, %v8872_v28  ;;  %v3845_v17 = vpop.f32.mrb[133].mxu0 }
 0x4e4   : > { %5265 = vst [vmem:[%s8097_s16 + $0x1d8] sm:$0xff] %v6155_v53  ;;  %v3846_v16 = vadd.f32 %v3845_v17, %v8872_v28  ;;  %v3847_v31 = vpop.f32.mrb[134].mxu0  ;;  %5439 = vmatprep.subr.bf16.mxu1 %v4497_v21 }
 0x4e5   : > { %v4302_v34 = vmax.f32 %v3844_v60, 0.0  ;;  %v3848_v19 = vadd.f32 %v3847_v31, %v8873_v15  ;;  %v3849_v5 = vpop.f32.mrb[135].mxu0  ;;  %5440 = vmatpush1.bf16.msra.mxu1 %v4496_v12  ;;  %v8522_v60 = vld [vmem:[%s8704_s6 + $0x10] sm:$0xff] }
 0x4e6   : > { %v4303_v1 = vmax.f32 %v3846_v16, 0.0  ;;  %v3850_v63 = vadd.f32 %v3849_v5, %v8873_v15  ;;  %v6087_v31 = vcombine.high %v8522_v60, %v8522_v60 }
 0x4e7   : > { %v4304_v3 = vmax.f32 %v3848_v19, 0.0 }
 0x4e8   : > { %v6156_v6 = vpack.c.bf16 %v4303_v1, %v4302_v34  ;;  %v4305_v44 = vmax.f32 %v3850_v63, 0.0 }
 0x4e9   : > { %v4498_v13 = vpack.c.bf16 %v4304_v3, %v4302_v34  ;;  %v8878_v34 = vld [vmem:[#allocation27_spill] sm:$0xff] }
 0x4ea   : > { %5266 = vst [vmem:[%s8097_s16 + $0x1e0] sm:$0xff] %v6156_v6  ;;  %v4499_v61 = vpack.c.bf16 %v4305_v44, %v4303_v1  ;;  %v6157_v54 = vpack.c.bf16 %v4305_v44, %v4304_v3  ;;  %v3853_v46 = vpop.f32.mrb[136].mxu0  ;;  %v8879_v3 = vld [vmem:[#allocation26_spill] sm:$0xff] }
 0x4eb   : > { %v3854_v51 = vadd.f32 %v3853_v46, %v8874_v29  ;;  %v3855_v25 = vpop.f32.mrb[137].mxu0 }
 0x4ec   : > { %5267 = vst [vmem:[%s8097_s16 + $0x1e8] sm:$0xff] %v6157_v54  ;;  %v3856_v35 = vadd.f32 %v3855_v25, %v8874_v29  ;;  %v3857_v0 = vpop.f32.mrb[138].mxu0  ;;  %5441 = vmatprep.subr.bf16.mxu1 %v4499_v61 }
 0x4ed   : > { %v4306_v23 = vmax.f32 %v3854_v51, 0.0  ;;  %v3858_v32 = vadd.f32 %v3857_v0, %v8875_v40  ;;  %v3859_v26 = vpop.f32.mrb[139].mxu0  ;;  %5442 = vmatpush1.bf16.msra.mxu1 %v4498_v13 }
 0x4ee   : > { %v4307_v42 = vmax.f32 %v3856_v35, 0.0  ;;  %v3860_v20 = vadd.f32 %v3859_v26, %v8875_v40 }
 0x4ef   : > { %v4308_v10 = vmax.f32 %v3858_v32, 0.0 }
 0x4f0   : > { %v6158_v49 = vpack.c.bf16 %v4307_v42, %v4306_v23  ;;  %v4309_v52 = vmax.f32 %v3860_v20, 0.0 }
 0x4f1   : > { %v4500_v55 = vpack.c.bf16 %v4308_v10, %v4306_v23  ;;  %v8880_v23 = vld [vmem:[#allocation29_spill] sm:$0xff] }
 0x4f2   : > { %5268 = vst [vmem:[%s8097_s16 + $0x1f0] sm:$0xff] %v6158_v49  ;;  %v4501_v8 = vpack.c.bf16 %v4309_v52, %v4307_v42  ;;  %v6159_v38 = vpack.c.bf16 %v4309_v52, %v4308_v10  ;;  %v3863_v48 = vpop.f32.mrb[140].mxu0  ;;  %v8881_v10 = vld [vmem:[#allocation28_spill] sm:$0xff] }
 0x4f3   : > { %v3864_v36 = vadd.f32 %v3863_v48, %v8876_v24  ;;  %v3865_v2 = vpop.f32.mrb[141].mxu0 }
 0x4f4   : > { %5269 = vst [vmem:[%s8097_s16 + $0x1f8] sm:$0xff] %v6159_v38  ;;  %v3866_v59 = vadd.f32 %v3865_v2, %v8876_v24  ;;  %v3867_v9 = vpop.f32.mrb[142].mxu0  ;;  %5443 = vmatprep.subr.bf16.mxu1 %v4501_v8 }
 0x4f5   : > { %v4310_v11 = vmax.f32 %v3864_v36, 0.0  ;;  %v3868_v62 = vadd.f32 %v3867_v9, %v8877_v58  ;;  %v3869_v43 = vpop.f32.mrb[143].mxu0  ;;  %5444 = vmatpush1.bf16.msra.mxu1 %v4500_v55 }
 0x4f6   : > { %v4311_v22 = vmax.f32 %v3866_v59, 0.0  ;;  %v3870_v12 = vadd.f32 %v3869_v43, %v8877_v58 }
 0x4f7   : > { %v4312_v21 = vmax.f32 %v3868_v62, 0.0 }
 0x4f8   : > { %v6160_v53 = vpack.c.bf16 %v4311_v22, %v4310_v11  ;;  %v4313_v39 = vmax.f32 %v3870_v12, 0.0  ;;  %5446 = vmatmul.mubr.bf16.vlgmr.msra.gmra.mrb[104].mxu1 %v6084_v7  ;;  %v8882_v7 = vld [vmem:[#allocation31_spill] sm:$0xff]  ;;  %v8883_v12 = vld [vmem:[#allocation30_spill] sm:$0xff] }
 0x4f9   : > { %v4502_v28 = vpack.c.bf16 %v4312_v21, %v4310_v11  ;;  %5486 = vmatprep.mubr.bf16.mxu1 %v6087_v31 }
 0x4fa   : > { %5270 = vst [vmem:[%s8097_s16 + $0x200] sm:$0xff] %v6160_v53  ;;  %v4503_v45 = vpack.c.bf16 %v4313_v39, %v4311_v22  ;;  %v6161_v17 = vpack.c.bf16 %v4313_v39, %v4312_v21  ;;  %v3873_v16 = vpop.f32.mrb[144].mxu0 }
 0x4fb   : > { %v3874_v15 = vadd.f32 %v3873_v16, %v8878_v34  ;;  %v3875_v19 = vpop.f32.mrb[145].mxu0 }
 0x4fc   : > { %5271 = vst [vmem:[%s8097_s16 + $0x208] sm:$0xff] %v6161_v17  ;;  %v3876_v5 = vadd.f32 %v3875_v19, %v8878_v34  ;;  %v3877_v1 = vpop.f32.mrb[146].mxu0  ;;  %5454 = vmatprep.subr.bf16.mxu1 %v4503_v45 }
 0x4fd   : > { %v4314_v63 = vmax.f32 %v3874_v15, 0.0  ;;  %v3878_v6 = vadd.f32 %v3877_v1, %v8879_v3  ;;  %v3879_v44 = vpop.f32.mrb[147].mxu0  ;;  %5455 = vmatpush1.bf16.msra.mxu1 %v4502_v28 }
 0x4fe   : > { %v4315_v13 = vmax.f32 %v3876_v5, 0.0  ;;  %v3880_v61 = vadd.f32 %v3879_v44, %v8879_v3  ;;  %v8884_v5 = vld [vmem:[#allocation33_spill] sm:$0xff] }
 0x4ff   : > { %v4316_v54 = vmax.f32 %v3878_v6, 0.0 }
 0x500   : > { %v6162_v46 = vpack.c.bf16 %v4315_v13, %v4314_v63  ;;  %v4317_v29 = vmax.f32 %v3880_v61, 0.0 }
 0x501   : > { %v4504_v51 = vpack.c.bf16 %v4316_v54, %v4314_v63 }
 0x502   : > { %5272 = vst [vmem:[%s8097_s16 + $0x210] sm:$0xff] %v6162_v46  ;;  %v4505_v25 = vpack.c.bf16 %v4317_v29, %v4315_v13  ;;  %v6163_v35 = vpack.c.bf16 %v4317_v29, %v4316_v54  ;;  %v3883_v0 = vpop.f32.mrb[148].mxu0  ;;  %v8885_v13 = vld [vmem:[#allocation32_spill] sm:$0xff] }
 0x503   : > { %v3884_v40 = vadd.f32 %v3883_v0, %v8880_v23  ;;  %v3885_v32 = vpop.f32.mrb[149].mxu0 }
 0x504   : > { %5273 = vst [vmem:[%s8097_s16 + $0x218] sm:$0xff] %v6163_v35  ;;  %v3886_v26 = vadd.f32 %v3885_v32, %v8880_v23  ;;  %v3887_v42 = vpop.f32.mrb[150].mxu0  ;;  %5456 = vmatprep.subr.bf16.mxu1 %v4505_v25 }
 0x505   : > { %v4318_v20 = vmax.f32 %v3884_v40, 0.0  ;;  %v3888_v49 = vadd.f32 %v3887_v42, %v8881_v10  ;;  %v3889_v52 = vpop.f32.mrb[151].mxu0  ;;  %5457 = vmatpush1.bf16.msra.mxu1 %v4504_v51 }
 0x506   : > { %v4319_v55 = vmax.f32 %v3886_v26, 0.0  ;;  %v3890_v8 = vadd.f32 %v3889_v52, %v8881_v10  ;;  %v8886_v26 = vld [vmem:[#allocation35_spill] sm:$0xff] }
 0x507   : > { %v4320_v38 = vmax.f32 %v3888_v49, 0.0 }
 0x508   : > { %v6164_v48 = vpack.c.bf16 %v4319_v55, %v4318_v20  ;;  %v4321_v24 = vmax.f32 %v3890_v8, 0.0 }
 0x509   : > { %v4506_v36 = vpack.c.bf16 %v4320_v38, %v4318_v20 }
 0x50a   : > { %5274 = vst [vmem:[%s8097_s16 + $0x220] sm:$0xff] %v6164_v48  ;;  %v4507_v2 = vpack.c.bf16 %v4321_v24, %v4319_v55  ;;  %v6165_v59 = vpack.c.bf16 %v4321_v24, %v4320_v38  ;;  %v3893_v9 = vpop.f32.mrb[152].mxu0  ;;  %v8887_v55 = vld [vmem:[#allocation34_spill] sm:$0xff] }
 0x50b   : > { %v3894_v11 = vadd.f32 %v3893_v9, %v8882_v7  ;;  %v3895_v58 = vpop.f32.mrb[153].mxu0 }
 0x50c   : > { %5275 = vst [vmem:[%s8097_s16 + $0x228] sm:$0xff] %v6165_v59  ;;  %v3896_v62 = vadd.f32 %v3895_v58, %v8882_v7  ;;  %v3897_v43 = vpop.f32.mrb[154].mxu0  ;;  %5458 = vmatprep.subr.bf16.mxu1 %v4507_v2 }
 0x50d   : > { %v4322_v22 = vmax.f32 %v3894_v11, 0.0  ;;  %v3898_v21 = vadd.f32 %v3897_v43, %v8883_v12  ;;  %v3899_v53 = vpop.f32.mrb[155].mxu0  ;;  %5459 = vmatpush1.bf16.msra.mxu1 %v4506_v36 }
 0x50e   : > { %v4323_v39 = vmax.f32 %v3896_v62, 0.0  ;;  %v3900_v28 = vadd.f32 %v3899_v53, %v8883_v12  ;;  %v8888_v62 = vld [vmem:[#allocation37_spill] sm:$0xff] }
 0x50f   : > { %v4324_v45 = vmax.f32 %v3898_v21, 0.0 }
 0x510   : > { %v6166_v17 = vpack.c.bf16 %v4323_v39, %v4322_v22  ;;  %v4325_v16 = vmax.f32 %v3900_v28, 0.0 }
 0x511   : > { %v4508_v31 = vpack.c.bf16 %v4324_v45, %v4322_v22 }
 0x512   : > { %5276 = vst [vmem:[%s8097_s16 + $0x230] sm:$0xff] %v6166_v17  ;;  %v4509_v34 = vpack.c.bf16 %v4325_v16, %v4323_v39  ;;  %v6167_v15 = vpack.c.bf16 %v4325_v16, %v4324_v45  ;;  %v3903_v19 = vpop.f32.mrb[156].mxu0  ;;  %v8889_v39 = vld [vmem:[#allocation36_spill] sm:$0xff] }
 0x513   : > { %v3904_v1 = vadd.f32 %v3903_v19, %v8884_v5  ;;  %v3905_v63 = vpop.f32.mrb[157].mxu0 }
 0x514   : > { %5277 = vst [vmem:[%s8097_s16 + $0x238] sm:$0xff] %v6167_v15  ;;  %v3906_v3 = vadd.f32 %v3905_v63, %v8884_v5  ;;  %v3907_v6 = vpop.f32.mrb[158].mxu0  ;;  %5460 = vmatprep.subr.bf16.mxu1 %v4509_v34 }
 0x515   : > { %v4326_v44 = vmax.f32 %v3904_v1, 0.0  ;;  %v3908_v61 = vadd.f32 %v3907_v6, %v8885_v13  ;;  %v3909_v54 = vpop.f32.mrb[159].mxu0  ;;  %5461 = vmatpush1.bf16.msra.mxu1 %v4508_v31 }
 0x516   : > { %v4327_v46 = vmax.f32 %v3906_v3, 0.0  ;;  %v3910_v29 = vadd.f32 %v3909_v54, %v8885_v13  ;;  %v8890_v3 = vld [vmem:[#allocation39_spill] sm:$0xff] }
 0x517   : > { %v4328_v51 = vmax.f32 %v3908_v61, 0.0 }
 0x518   : > { %v6168_v25 = vpack.c.bf16 %v4327_v46, %v4326_v44  ;;  %v4329_v35 = vmax.f32 %v3910_v29, 0.0 }
 0x519   : > { %v4510_v0 = vpack.c.bf16 %v4328_v51, %v4326_v44 }
 0x51a   : > { %5278 = vst [vmem:[%s8097_s16 + $0x240] sm:$0xff] %v6168_v25  ;;  %v4511_v23 = vpack.c.bf16 %v4329_v35, %v4327_v46  ;;  %v6169_v40 = vpack.c.bf16 %v4329_v35, %v4328_v51  ;;  %v3913_v32 = vpop.f32.mrb[160].mxu0  ;;  %v8891_v46 = vld [vmem:[#allocation38_spill] sm:$0xff] }
 0x51b   : > { %v3914_v42 = vadd.f32 %v3913_v32, %v8886_v26  ;;  %v3915_v20 = vpop.f32.mrb[161].mxu0 }
 0x51c   : > { %5279 = vst [vmem:[%s8097_s16 + $0x248] sm:$0xff] %v6169_v40  ;;  %v3916_v10 = vadd.f32 %v3915_v20, %v8886_v26  ;;  %v3917_v49 = vpop.f32.mrb[162].mxu0  ;;  %5462 = vmatprep.subr.bf16.mxu1 %v4511_v23 }
 0x51d   : > { %v4330_v52 = vmax.f32 %v3914_v42, 0.0  ;;  %v3918_v8 = vadd.f32 %v3917_v49, %v8887_v55  ;;  %v3919_v38 = vpop.f32.mrb[163].mxu0  ;;  %5463 = vmatpush1.bf16.msra.mxu1 %v4510_v0 }
 0x51e   : > { %v4331_v48 = vmax.f32 %v3916_v10, 0.0  ;;  %v3920_v24 = vadd.f32 %v3919_v38, %v8887_v55  ;;  %v8892_v10 = vld [vmem:[#allocation41_spill] sm:$0xff] }
 0x51f   : > { %v4332_v36 = vmax.f32 %v3918_v8, 0.0 }
 0x520   : > { %v6170_v2 = vpack.c.bf16 %v4331_v48, %v4330_v52  ;;  %v4333_v59 = vmax.f32 %v3920_v24, 0.0 }
 0x521   : > { %v4512_v9 = vpack.c.bf16 %v4332_v36, %v4330_v52 }
 0x522   : > { %5280 = vst [vmem:[%s8097_s16 + $0x250] sm:$0xff] %v6170_v2  ;;  %v4513_v7 = vpack.c.bf16 %v4333_v59, %v4331_v48  ;;  %v6171_v11 = vpack.c.bf16 %v4333_v59, %v4332_v36  ;;  %v3923_v58 = vpop.f32.mrb[164].mxu0  ;;  %v8893_v48 = vld [vmem:[#allocation40_spill] sm:$0xff] }
 0x523   : > { %v3924_v43 = vadd.f32 %v3923_v58, %v8888_v62  ;;  %v3925_v22 = vpop.f32.mrb[165].mxu0 }
 0x524   : > { %5281 = vst [vmem:[%s8097_s16 + $0x258] sm:$0xff] %v6171_v11  ;;  %v3926_v12 = vadd.f32 %v3925_v22, %v8888_v62  ;;  %v3927_v21 = vpop.f32.mrb[166].mxu0  ;;  %5464 = vmatprep.subr.bf16.mxu1 %v4513_v7 }
 0x525   : > { %v4334_v53 = vmax.f32 %v3924_v43, 0.0  ;;  %v3928_v28 = vadd.f32 %v3927_v21, %v8889_v39  ;;  %v3929_v45 = vpop.f32.mrb[167].mxu0  ;;  %5465 = vmatpush1.bf16.msra.mxu1 %v4512_v9 }
 0x526   : > { %v4335_v17 = vmax.f32 %v3926_v12, 0.0  ;;  %v3930_v16 = vadd.f32 %v3929_v45, %v8889_v39  ;;  %v8894_v12 = vld [vmem:[#allocation43_spill] sm:$0xff] }
 0x527   : > { %v4336_v31 = vmax.f32 %v3928_v28, 0.0 }
 0x528   : > { %v6172_v34 = vpack.c.bf16 %v4335_v17, %v4334_v53  ;;  %v4337_v15 = vmax.f32 %v3930_v16, 0.0 }
 0x529   : > { %v4514_v19 = vpack.c.bf16 %v4336_v31, %v4334_v53 }
 0x52a   : > { %5282 = vst [vmem:[%s8097_s16 + $0x260] sm:$0xff] %v6172_v34  ;;  %v4515_v5 = vpack.c.bf16 %v4337_v15, %v4335_v17  ;;  %v6173_v1 = vpack.c.bf16 %v4337_v15, %v4336_v31  ;;  %v3933_v63 = vpop.f32.mrb[168].mxu0  ;;  %v8895_v17 = vld [vmem:[#allocation42_spill] sm:$0xff] }
 0x52b   : > { %v3934_v6 = vadd.f32 %v3933_v63, %v8890_v3  ;;  %v3935_v44 = vpop.f32.mrb[169].mxu0 }
 0x52c   : > { %5283 = vst [vmem:[%s8097_s16 + $0x268] sm:$0xff] %v6173_v1  ;;  %v3936_v13 = vadd.f32 %v3935_v44, %v8890_v3  ;;  %v3937_v61 = vpop.f32.mrb[170].mxu0  ;;  %5466 = vmatprep.subr.bf16.mxu1 %v4515_v5 }
 0x52d   : > { %v4338_v54 = vmax.f32 %v3934_v6, 0.0  ;;  %v3938_v29 = vadd.f32 %v3937_v61, %v8891_v46  ;;  %v3939_v51 = vpop.f32.mrb[171].mxu0  ;;  %5467 = vmatpush1.bf16.msra.mxu1 %v4514_v19 }
 0x52e   : > { %v4339_v25 = vmax.f32 %v3936_v13, 0.0  ;;  %v3940_v35 = vadd.f32 %v3939_v51, %v8891_v46  ;;  %v8896_v13 = vld [vmem:[#allocation45_spill] sm:$0xff] }
 0x52f   : > { %v4340_v0 = vmax.f32 %v3938_v29, 0.0 }
 0x530   : > { %v6174_v23 = vpack.c.bf16 %v4339_v25, %v4338_v54  ;;  %v4341_v40 = vmax.f32 %v3940_v35, 0.0 }
 0x531   : > { %v4516_v32 = vpack.c.bf16 %v4340_v0, %v4338_v54 }
 0x532   : > { %5284 = vst [vmem:[%s8097_s16 + $0x270] sm:$0xff] %v6174_v23  ;;  %v4517_v26 = vpack.c.bf16 %v4341_v40, %v4339_v25  ;;  %v6175_v42 = vpack.c.bf16 %v4341_v40, %v4340_v0  ;;  %v3943_v20 = vpop.f32.mrb[172].mxu0  ;;  %v8897_v25 = vld [vmem:[#allocation44_spill] sm:$0xff] }
 0x533   : > { %v3944_v49 = vadd.f32 %v3943_v20, %v8892_v10  ;;  %v3945_v52 = vpop.f32.mrb[173].mxu0 }
 0x534   : > { %5285 = vst [vmem:[%s8097_s16 + $0x278] sm:$0xff] %v6175_v42  ;;  %v3946_v55 = vadd.f32 %v3945_v52, %v8892_v10  ;;  %v3947_v8 = vpop.f32.mrb[174].mxu0  ;;  %5468 = vmatprep.subr.bf16.mxu1 %v4517_v26 }
 0x535   : > { %v4342_v38 = vmax.f32 %v3944_v49, 0.0  ;;  %v3948_v24 = vadd.f32 %v3947_v8, %v8893_v48  ;;  %v3949_v36 = vpop.f32.mrb[175].mxu0  ;;  %5469 = vmatpush1.bf16.msra.mxu1 %v4516_v32 }
 0x536   : > { %v4343_v2 = vmax.f32 %v3946_v55, 0.0  ;;  %v3950_v59 = vadd.f32 %v3949_v36, %v8893_v48  ;;  %v8898_v55 = vld [vmem:[#allocation47_spill] sm:$0xff] }
 0x537   : > { %v4344_v9 = vmax.f32 %v3948_v24, 0.0 }
 0x538   : > { %v6176_v7 = vpack.c.bf16 %v4343_v2, %v4342_v38  ;;  %v4345_v11 = vmax.f32 %v3950_v59, 0.0 }
 0x539   : > { %v4518_v58 = vpack.c.bf16 %v4344_v9, %v4342_v38 }
 0x53a   : > { %5286 = vst [vmem:[%s8097_s16 + $0x280] sm:$0xff] %v6176_v7  ;;  %v4519_v62 = vpack.c.bf16 %v4345_v11, %v4343_v2  ;;  %v6177_v43 = vpack.c.bf16 %v4345_v11, %v4344_v9  ;;  %v3953_v22 = vpop.f32.mrb[176].mxu0  ;;  %v8899_v2 = vld [vmem:[#allocation46_spill] sm:$0xff] }
 0x53b   : > { %v3954_v21 = vadd.f32 %v3953_v22, %v8894_v12  ;;  %v3955_v53 = vpop.f32.mrb[177].mxu0 }
 0x53c   : > { %5287 = vst [vmem:[%s8097_s16 + $0x288] sm:$0xff] %v6177_v43  ;;  %v3956_v39 = vadd.f32 %v3955_v53, %v8894_v12  ;;  %v3957_v28 = vpop.f32.mrb[178].mxu0  ;;  %5470 = vmatprep.subr.bf16.mxu1 %v4519_v62 }
 0x53d   : > { %v4346_v45 = vmax.f32 %v3954_v21, 0.0  ;;  %v3958_v16 = vadd.f32 %v3957_v28, %v8895_v17  ;;  %v3959_v31 = vpop.f32.mrb[179].mxu0  ;;  %5471 = vmatpush1.bf16.msra.mxu1 %v4518_v58 }
 0x53e   : > { %v4347_v34 = vmax.f32 %v3956_v39, 0.0  ;;  %v3960_v15 = vadd.f32 %v3959_v31, %v8895_v17  ;;  %v8900_v39 = vld [vmem:[#allocation49_spill] sm:$0xff] }
 0x53f   : > { %v4348_v19 = vmax.f32 %v3958_v16, 0.0 }
 0x540   : > { %v6178_v5 = vpack.c.bf16 %v4347_v34, %v4346_v45  ;;  %v4349_v1 = vmax.f32 %v3960_v15, 0.0 }
 0x541   : > { %v4520_v63 = vpack.c.bf16 %v4348_v19, %v4346_v45 }
 0x542   : > { %5288 = vst [vmem:[%s8097_s16 + $0x290] sm:$0xff] %v6178_v5  ;;  %v4521_v3 = vpack.c.bf16 %v4349_v1, %v4347_v34  ;;  %v6179_v6 = vpack.c.bf16 %v4349_v1, %v4348_v19  ;;  %v3963_v44 = vpop.f32.mrb[180].mxu0  ;;  %v8901_v34 = vld [vmem:[#allocation48_spill] sm:$0xff] }
 0x543   : > { %v3964_v61 = vadd.f32 %v3963_v44, %v8896_v13  ;;  %v3965_v54 = vpop.f32.mrb[181].mxu0 }
 0x544   : > { %5289 = vst [vmem:[%s8097_s16 + $0x298] sm:$0xff] %v6179_v6  ;;  %v3966_v46 = vadd.f32 %v3965_v54, %v8896_v13  ;;  %v3967_v29 = vpop.f32.mrb[182].mxu0  ;;  %5472 = vmatprep.subr.bf16.mxu1 %v4521_v3 }
 0x545   : > { %v4350_v51 = vmax.f32 %v3964_v61, 0.0  ;;  %v3968_v35 = vadd.f32 %v3967_v29, %v8897_v25  ;;  %v3969_v0 = vpop.f32.mrb[183].mxu0  ;;  %5473 = vmatpush1.bf16.msra.mxu1 %v4520_v63 }
 0x546   : > { %v4351_v23 = vmax.f32 %v3966_v46, 0.0  ;;  %v3970_v40 = vadd.f32 %v3969_v0, %v8897_v25  ;;  %v8902_v46 = vld [vmem:[#allocation51_spill] sm:$0xff] }
 0x547   : > { %v4352_v32 = vmax.f32 %v3968_v35, 0.0 }
 0x548   : > { %v6180_v26 = vpack.c.bf16 %v4351_v23, %v4350_v51  ;;  %v4353_v42 = vmax.f32 %v3970_v40, 0.0 }
 0x549   : > { %v4522_v20 = vpack.c.bf16 %v4352_v32, %v4350_v51 }
 0x54a   : > { %5290 = vst [vmem:[%s8097_s16 + $0x2a0] sm:$0xff] %v6180_v26  ;;  %v4523_v10 = vpack.c.bf16 %v4353_v42, %v4351_v23  ;;  %v6181_v49 = vpack.c.bf16 %v4353_v42, %v4352_v32  ;;  %v3973_v52 = vpop.f32.mrb[184].mxu0  ;;  %v8903_v23 = vld [vmem:[#allocation50_spill] sm:$0xff] }
 0x54b   : > { %v3974_v8 = vadd.f32 %v3973_v52, %v8898_v55  ;;  %v3975_v38 = vpop.f32.mrb[185].mxu0 }
 0x54c   : > { %5291 = vst [vmem:[%s8097_s16 + $0x2a8] sm:$0xff] %v6181_v49  ;;  %v3976_v48 = vadd.f32 %v3975_v38, %v8898_v55  ;;  %v3977_v24 = vpop.f32.mrb[186].mxu0  ;;  %5474 = vmatprep.subr.bf16.mxu1 %v4523_v10 }
 0x54d   : > { %v4354_v36 = vmax.f32 %v3974_v8, 0.0  ;;  %v3978_v59 = vadd.f32 %v3977_v24, %v8899_v2  ;;  %v3979_v9 = vpop.f32.mrb[187].mxu0  ;;  %5475 = vmatpush1.bf16.msra.mxu1 %v4522_v20 }
 0x54e   : > { %v4355_v7 = vmax.f32 %v3976_v48, 0.0  ;;  %v3980_v11 = vadd.f32 %v3979_v9, %v8899_v2  ;;  %v8904_v48 = vld [vmem:[#allocation53_spill] sm:$0xff] }
 0x54f   : > { %v4356_v58 = vmax.f32 %v3978_v59, 0.0 }
 0x550   : > { %v6182_v62 = vpack.c.bf16 %v4355_v7, %v4354_v36  ;;  %v4357_v43 = vmax.f32 %v3980_v11, 0.0 }
 0x551   : > { %v4524_v22 = vpack.c.bf16 %v4356_v58, %v4354_v36 }
 0x552   : > { %5292 = vst [vmem:[%s8097_s16 + $0x2b0] sm:$0xff] %v6182_v62  ;;  %v4525_v12 = vpack.c.bf16 %v4357_v43, %v4355_v7  ;;  %v6183_v21 = vpack.c.bf16 %v4357_v43, %v4356_v58  ;;  %v3983_v53 = vpop.f32.mrb[188].mxu0  ;;  %v8905_v7 = vld [vmem:[#allocation52_spill] sm:$0xff] }
 0x553   : > { %v3984_v28 = vadd.f32 %v3983_v53, %v8900_v39  ;;  %v3985_v45 = vpop.f32.mrb[189].mxu0 }
 0x554   : > { %5293 = vst [vmem:[%s8097_s16 + $0x2b8] sm:$0xff] %v6183_v21  ;;  %v3986_v17 = vadd.f32 %v3985_v45, %v8900_v39  ;;  %v3987_v16 = vpop.f32.mrb[190].mxu0  ;;  %5476 = vmatprep.subr.bf16.mxu1 %v4525_v12 }
 0x555   : > { %v4358_v31 = vmax.f32 %v3984_v28, 0.0  ;;  %v3988_v15 = vadd.f32 %v3987_v16, %v8901_v34  ;;  %v3989_v19 = vpop.f32.mrb[191].mxu0  ;;  %5477 = vmatpush1.bf16.msra.mxu1 %v4524_v22 }
 0x556   : > { %v4359_v5 = vmax.f32 %v3986_v17, 0.0  ;;  %v3990_v1 = vadd.f32 %v3989_v19, %v8901_v34  ;;  %v8906_v17 = vld [vmem:[#allocation55_spill] sm:$0xff] }
 0x557   : > { %v4360_v63 = vmax.f32 %v3988_v15, 0.0 }
 0x558   : > { %v6184_v3 = vpack.c.bf16 %v4359_v5, %v4358_v31  ;;  %v4361_v6 = vmax.f32 %v3990_v1, 0.0 }
 0x559   : > { %v4526_v44 = vpack.c.bf16 %v4360_v63, %v4358_v31 }
 0x55a   : > { %5294 = vst [vmem:[%s8097_s16 + $0x2c0] sm:$0xff] %v6184_v3  ;;  %v4527_v13 = vpack.c.bf16 %v4361_v6, %v4359_v5  ;;  %v6185_v61 = vpack.c.bf16 %v4361_v6, %v4360_v63  ;;  %v3993_v54 = vpop.f32.mrb[192].mxu0  ;;  %v8907_v5 = vld [vmem:[#allocation54_spill] sm:$0xff] }
 0x55b   : > { %v3994_v29 = vadd.f32 %v3993_v54, %v8902_v46  ;;  %v3995_v51 = vpop.f32.mrb[193].mxu0 }
 0x55c   : > { %5295 = vst [vmem:[%s8097_s16 + $0x2c8] sm:$0xff] %v6185_v61  ;;  %v3996_v25 = vadd.f32 %v3995_v51, %v8902_v46  ;;  %v3997_v35 = vpop.f32.mrb[194].mxu0  ;;  %5478 = vmatprep.subr.bf16.mxu1 %v4527_v13 }
 0x55d   : > { %v4362_v0 = vmax.f32 %v3994_v29, 0.0  ;;  %v3998_v40 = vadd.f32 %v3997_v35, %v8903_v23  ;;  %v3999_v32 = vpop.f32.mrb[195].mxu0  ;;  %5479 = vmatpush1.bf16.msra.mxu1 %v4526_v44  ;;  %v8908_v35 = vld [vmem:[#allocation57_spill] sm:$0xff] }
 0x55e   : > { %v4363_v26 = vmax.f32 %v3996_v25, 0.0  ;;  %v4000_v42 = vadd.f32 %v3999_v32, %v8903_v23  ;;  %v8620_v25 = vld [vmem:[%s8704_s6 + $0x18] sm:$0xff] }
 0x55f   : > { %v4364_v20 = vmax.f32 %v3998_v40, 0.0 }
 0x560   : > { %v6186_v10 = vpack.c.bf16 %v4363_v26, %v4362_v0  ;;  %v4365_v49 = vmax.f32 %v4000_v42, 0.0 }
 0x561   : > { %v4528_v52 = vpack.c.bf16 %v4364_v20, %v4362_v0 }
 0x562   : > { %5296 = vst [vmem:[%s8097_s16 + $0x2d0] sm:$0xff] %v6186_v10  ;;  %v4529_v55 = vpack.c.bf16 %v4365_v49, %v4363_v26  ;;  %v6187_v8 = vpack.c.bf16 %v4365_v49, %v4364_v20  ;;  %v4003_v38 = vpop.f32.mrb[196].mxu0  ;;  %v6086_v26 = vcombine.low %v8522_v60, %v8522_v60  ;;  %v8909_v20 = vld [vmem:[#allocation56_spill] sm:$0xff] }
 0x563   : > { %v4004_v24 = vadd.f32 %v4003_v38, %v8904_v48  ;;  %v4005_v36 = vpop.f32.mrb[197].mxu0 }
 0x564   : > { %5297 = vst [vmem:[%s8097_s16 + $0x2d8] sm:$0xff] %v6187_v8  ;;  %v4006_v2 = vadd.f32 %v4005_v36, %v8904_v48  ;;  %v4007_v59 = vpop.f32.mrb[198].mxu0  ;;  %5480 = vmatprep.subr.bf16.mxu1 %v4529_v55 }
 0x565   : > { %v4366_v9 = vmax.f32 %v4004_v24, 0.0  ;;  %v4008_v11 = vadd.f32 %v4007_v59, %v8905_v7  ;;  %v4009_v58 = vpop.f32.mrb[199].mxu0  ;;  %5481 = vmatpush1.bf16.msra.mxu1 %v4528_v52  ;;  %v6089_v52 = vcombine.high %v8620_v25, %v8620_v25 }
 0x566   : > { %v4367_v62 = vmax.f32 %v4006_v2, 0.0  ;;  %v4010_v43 = vadd.f32 %v4009_v58, %v8905_v7 }
 0x567   : > { %v4368_v22 = vmax.f32 %v4008_v11, 0.0 }
 0x568   : > { %v6188_v12 = vpack.c.bf16 %v4367_v62, %v4366_v9  ;;  %v4369_v21 = vmax.f32 %v4010_v43, 0.0 }
 0x569   : > { %v4530_v53 = vpack.c.bf16 %v4368_v22, %v4366_v9  ;;  %v8910_v9 = vld [vmem:[#allocation59_spill] sm:$0xff] }
 0x56a   : > { %5298 = vst [vmem:[%s8097_s16 + $0x2e0] sm:$0xff] %v6188_v12  ;;  %v4531_v39 = vpack.c.bf16 %v4369_v21, %v4367_v62  ;;  %v6189_v28 = vpack.c.bf16 %v4369_v21, %v4368_v22  ;;  %v4013_v45 = vpop.f32.mrb[200].mxu0  ;;  %v8911_v22 = vld [vmem:[#allocation58_spill] sm:$0xff] }
 0x56b   : > { %v4014_v16 = vadd.f32 %v4013_v45, %v8906_v17  ;;  %v4015_v31 = vpop.f32.mrb[201].mxu0 }
 0x56c   : > { %5299 = vst [vmem:[%s8097_s16 + $0x2e8] sm:$0xff] %v6189_v28  ;;  %v4016_v34 = vadd.f32 %v4015_v31, %v8906_v17  ;;  %v4017_v15 = vpop.f32.mrb[202].mxu0  ;;  %5482 = vmatprep.subr.bf16.mxu1 %v4531_v39 }
 0x56d   : > { %v4370_v19 = vmax.f32 %v4014_v16, 0.0  ;;  %v4018_v1 = vadd.f32 %v4017_v15, %v8907_v5  ;;  %v4019_v63 = vpop.f32.mrb[203].mxu0  ;;  %5483 = vmatpush1.bf16.msra.mxu1 %v4530_v53 }
 0x56e   : > { %v4371_v3 = vmax.f32 %v4016_v34, 0.0  ;;  %v4020_v6 = vadd.f32 %v4019_v63, %v8907_v5 }
 0x56f   : > { %v4372_v44 = vmax.f32 %v4018_v1, 0.0 }
 0x570   : > { %v6190_v13 = vpack.c.bf16 %v4371_v3, %v4370_v19  ;;  %v4373_v61 = vmax.f32 %v4020_v6, 0.0 }
 0x571   : > { %v4532_v54 = vpack.c.bf16 %v4372_v44, %v4370_v19  ;;  %v8912_v19 = vld [vmem:[#allocation61_spill] sm:$0xff] }
 0x572   : > { %5300 = vst [vmem:[%s8097_s16 + $0x2f0] sm:$0xff] %v6190_v13  ;;  %v4533_v46 = vpack.c.bf16 %v4373_v61, %v4371_v3  ;;  %v6191_v29 = vpack.c.bf16 %v4373_v61, %v4372_v44  ;;  %v4023_v51 = vpop.f32.mrb[204].mxu0  ;;  %v8913_v44 = vld [vmem:[#allocation60_spill] sm:$0xff] }
 0x573   : > { %v4024_v0 = vadd.f32 %v4023_v51, %v8908_v35  ;;  %v4025_v23 = vpop.f32.mrb[205].mxu0 }
 0x574   : > { %5301 = vst [vmem:[%s8097_s16 + $0x2f8] sm:$0xff] %v6191_v29  ;;  %v4026_v40 = vadd.f32 %v4025_v23, %v8908_v35  ;;  %v4027_v32 = vpop.f32.mrb[206].mxu0  ;;  %5484 = vmatprep.subr.bf16.mxu1 %v4533_v46 }
 0x575   : > { %v4374_v42 = vmax.f32 %v4024_v0, 0.0  ;;  %v4028_v10 = vadd.f32 %v4027_v32, %v8909_v20  ;;  %v4029_v49 = vpop.f32.mrb[207].mxu0  ;;  %5485 = vmatpush1.bf16.msra.mxu1 %v4532_v54 }
 0x576   : > { %v4375_v55 = vmax.f32 %v4026_v40, 0.0  ;;  %v4030_v8 = vadd.f32 %v4029_v49, %v8909_v20 }
 0x577   : > { %v4376_v38 = vmax.f32 %v4028_v10, 0.0 }
 0x578   : > { %v6192_v48 = vpack.c.bf16 %v4375_v55, %v4374_v42  ;;  %v4377_v24 = vmax.f32 %v4030_v8, 0.0  ;;  %5487 = vmatmul.mubr.bf16.vlgmr.msra.gmra.mrb[104].mxu1 %v6086_v26  ;;  %v8914_v26 = vld [vmem:[#allocation63_spill] sm:$0xff] }
 0x579   : > { %v4534_v36 = vpack.c.bf16 %v4376_v38, %v4374_v42  ;;  %5527 = vmatprep.mubr.bf16.mxu1 %v6089_v52 }
 0x57a   : > { %5302 = vst [vmem:[%s8097_s16 + $0x300] sm:$0xff] %v6192_v48  ;;  %v4535_v60 = vpack.c.bf16 %v4377_v24, %v4375_v55  ;;  %v6193_v2 = vpack.c.bf16 %v4377_v24, %v4376_v38  ;;  %v4033_v59 = vpop.f32.mrb[208].mxu0  ;;  %v8915_v55 = vld [vmem:[#allocation62_spill] sm:$0xff] }
 0x57b   : > { %v4034_v7 = vadd.f32 %v4033_v59, %v8910_v9  ;;  %v4035_v11 = vpop.f32.mrb[209].mxu0 }
 0x57c   : > { %5303 = vst [vmem:[%s8097_s16 + $0x308] sm:$0xff] %v6193_v2  ;;  %v4036_v58 = vadd.f32 %v4035_v11, %v8910_v9  ;;  %v4037_v62 = vpop.f32.mrb[210].mxu0  ;;  %5495 = vmatprep.subr.bf16.mxu1 %v4535_v60 }
 0x57d   : > { %v4378_v43 = vmax.f32 %v4034_v7, 0.0  ;;  %v4038_v12 = vadd.f32 %v4037_v62, %v8911_v22  ;;  %v4039_v21 = vpop.f32.mrb[211].mxu0  ;;  %5496 = vmatpush1.bf16.msra.mxu1 %v4534_v36 }
 0x57e   : > { %v4379_v53 = vmax.f32 %v4036_v58, 0.0  ;;  %v4040_v39 = vadd.f32 %v4039_v21, %v8911_v22  ;;  %v8916_v58 = vld [vmem:[#allocation65_spill] sm:$0xff] }
 0x57f   : > { %v4380_v28 = vmax.f32 %v4038_v12, 0.0 }
 0x580   : > { %v6194_v45 = vpack.c.bf16 %v4379_v53, %v4378_v43  ;;  %v4381_v17 = vmax.f32 %v4040_v39, 0.0 }
 0x581   : > { %v4536_v16 = vpack.c.bf16 %v4380_v28, %v4378_v43 }
 0x582   : > { %5304 = vst [vmem:[%s8097_s16 + $0x310] sm:$0xff] %v6194_v45  ;;  %v4537_v31 = vpack.c.bf16 %v4381_v17, %v4379_v53  ;;  %v6195_v34 = vpack.c.bf16 %v4381_v17, %v4380_v28  ;;  %v4043_v15 = vpop.f32.mrb[212].mxu0  ;;  %v8917_v53 = vld [vmem:[#allocation64_spill] sm:$0xff] }
 0x583   : > { %v4044_v5 = vadd.f32 %v4043_v15, %v8912_v19  ;;  %v4045_v1 = vpop.f32.mrb[213].mxu0 }
 0x584   : > { %5305 = vst [vmem:[%s8097_s16 + $0x318] sm:$0xff] %v6195_v34  ;;  %v4046_v63 = vadd.f32 %v4045_v1, %v8912_v19  ;;  %v4047_v3 = vpop.f32.mrb[214].mxu0  ;;  %5497 = vmatprep.subr.bf16.mxu1 %v4537_v31 }
 0x585   : > { %v4382_v6 = vmax.f32 %v4044_v5, 0.0  ;;  %v4048_v13 = vadd.f32 %v4047_v3, %v8913_v44  ;;  %v4049_v61 = vpop.f32.mrb[215].mxu0  ;;  %5498 = vmatpush1.bf16.msra.mxu1 %v4536_v16 }
 0x586   : > { %v4383_v54 = vmax.f32 %v4046_v63, 0.0  ;;  %v4050_v46 = vadd.f32 %v4049_v61, %v8913_v44  ;;  %v8918_v63 = vld [vmem:[#allocation67_spill] sm:$0xff] }
 0x587   : > { %v4384_v29 = vmax.f32 %v4048_v13, 0.0 }
 0x588   : > { %v6196_v51 = vpack.c.bf16 %v4383_v54, %v4382_v6  ;;  %v4385_v35 = vmax.f32 %v4050_v46, 0.0 }
 0x589   : > { %v4538_v0 = vpack.c.bf16 %v4384_v29, %v4382_v6 }
 0x58a   : > { %5306 = vst [vmem:[%s8097_s16 + $0x320] sm:$0xff] %v6196_v51  ;;  %v4539_v23 = vpack.c.bf16 %v4385_v35, %v4383_v54  ;;  %v6197_v40 = vpack.c.bf16 %v4385_v35, %v4384_v29  ;;  %v4053_v32 = vpop.f32.mrb[216].mxu0  ;;  %v8919_v54 = vld [vmem:[#allocation66_spill] sm:$0xff] }
 0x58b   : > { %v4054_v42 = vadd.f32 %v4053_v32, %v8914_v26  ;;  %v4055_v20 = vpop.f32.mrb[217].mxu0 }
 0x58c   : > { %5307 = vst [vmem:[%s8097_s16 + $0x328] sm:$0xff] %v6197_v40  ;;  %v4056_v10 = vadd.f32 %v4055_v20, %v8914_v26  ;;  %v4057_v49 = vpop.f32.mrb[218].mxu0  ;;  %5499 = vmatprep.subr.bf16.mxu1 %v4539_v23  ;;  %v8920_v20 = vld [vmem:[#allocation69_spill] sm:$0xff] }
 0x58d   : > { %v4386_v52 = vmax.f32 %v4054_v42, 0.0  ;;  %v4058_v8 = vadd.f32 %v4057_v49, %v8915_v55  ;;  %v4059_v38 = vpop.f32.mrb[219].mxu0  ;;  %5500 = vmatpush1.bf16.msra.mxu1 %v4538_v0  ;;  %v8922_v49 = vld [vmem:[#allocation71_spill] sm:$0xff] }
 0x58e   : > { %v4387_v48 = vmax.f32 %v4056_v10, 0.0  ;;  %v4060_v24 = vadd.f32 %v4059_v38, %v8915_v55  ;;  %v8921_v10 = vld [vmem:[#allocation68_spill] sm:$0xff]  ;;  %v8924_v55 = vld [vmem:[#allocation3_spill] sm:$0xff] }
 0x58f   : > { %v4388_v36 = vmax.f32 %v4058_v8, 0.0  ;;  %v8925_v8 = vld [vmem:[#allocation2_spill] sm:$0xff] }
 0x590   : > { %v6198_v60 = vpack.c.bf16 %v4387_v48, %v4386_v52  ;;  %v4389_v2 = vmax.f32 %v4060_v24, 0.0 }
 0x591   : > { %v4540_v59 = vpack.c.bf16 %v4388_v36, %v4386_v52  ;;  %v8923_v52 = vld [vmem:[#allocation70_spill] sm:$0xff] }
 0x592   : > { %5308 = vst [vmem:[%s8097_s16 + $0x330] sm:$0xff] %v6198_v60  ;;  %v4541_v9 = vpack.c.bf16 %v4389_v2, %v4387_v48  ;;  %v6199_v7 = vpack.c.bf16 %v4389_v2, %v4388_v36  ;;  %v4063_v11 = vpop.f32.mrb[220].mxu0 }
 0x593   : > { %v4064_v62 = vadd.f32 %v4063_v11, %v8916_v58  ;;  %v4065_v43 = vpop.f32.mrb[221].mxu0 }
 0x594   : > { %5309 = vst [vmem:[%s8097_s16 + $0x338] sm:$0xff] %v6199_v7  ;;  %v4066_v22 = vadd.f32 %v4065_v43, %v8916_v58  ;;  %v4067_v12 = vpop.f32.mrb[222].mxu0  ;;  %5501 = vmatprep.subr.bf16.mxu1 %v4541_v9 }
 0x595   : > { %v4390_v21 = vmax.f32 %v4064_v62, 0.0  ;;  %v4068_v39 = vadd.f32 %v4067_v12, %v8917_v53  ;;  %v4069_v28 = vpop.f32.mrb[223].mxu0  ;;  %5502 = vmatpush1.bf16.msra.mxu1 %v4540_v59 }
 0x596   : > { %v4391_v45 = vmax.f32 %v4066_v22, 0.0  ;;  %v4070_v17 = vadd.f32 %v4069_v28, %v8917_v53 }
 0x597   : > { %v4392_v16 = vmax.f32 %v4068_v39, 0.0 }
 0x598   : > { %v6200_v31 = vpack.c.bf16 %v4391_v45, %v4390_v21  ;;  %v4393_v34 = vmax.f32 %v4070_v17, 0.0 }
 0x599   : > { %v4542_v15 = vpack.c.bf16 %v4392_v16, %v4390_v21 }
 0x59a   : > { %5310 = vst [vmem:[%s8097_s16 + $0x340] sm:$0xff] %v6200_v31  ;;  %v4543_v19 = vpack.c.bf16 %v4393_v34, %v4391_v45  ;;  %v6201_v5 = vpack.c.bf16 %v4393_v34, %v4392_v16  ;;  %v4073_v1 = vpop.f32.mrb[224].mxu0 }
 0x59b   : > { %v4074_v3 = vadd.f32 %v4073_v1, %v8918_v63  ;;  %v4075_v6 = vpop.f32.mrb[225].mxu0 }
 0x59c   : > { %5311 = vst [vmem:[%s8097_s16 + $0x348] sm:$0xff] %v6201_v5  ;;  %v4076_v44 = vadd.f32 %v4075_v6, %v8918_v63  ;;  %v4077_v13 = vpop.f32.mrb[226].mxu0  ;;  %5503 = vmatprep.subr.bf16.mxu1 %v4543_v19 }
 0x59d   : > { %v4394_v61 = vmax.f32 %v4074_v3, 0.0  ;;  %v4078_v46 = vadd.f32 %v4077_v13, %v8919_v54  ;;  %v4079_v29 = vpop.f32.mrb[227].mxu0  ;;  %5504 = vmatpush1.bf16.msra.mxu1 %v4542_v15 }
 0x59e   : > { %v4395_v51 = vmax.f32 %v4076_v44, 0.0  ;;  %v4080_v35 = vadd.f32 %v4079_v29, %v8919_v54 }
 0x59f   : > { %v4396_v0 = vmax.f32 %v4078_v46, 0.0 }
 0x5a0   : > { %v6202_v23 = vpack.c.bf16 %v4395_v51, %v4394_v61  ;;  %v4397_v40 = vmax.f32 %v4080_v35, 0.0 }
 0x5a1   : > { %v4544_v32 = vpack.c.bf16 %v4396_v0, %v4394_v61 }
 0x5a2   : > { %5312 = vst [vmem:[%s8097_s16 + $0x350] sm:$0xff] %v6202_v23  ;;  %v4545_v26 = vpack.c.bf16 %v4397_v40, %v4395_v51  ;;  %v6203_v42 = vpack.c.bf16 %v4397_v40, %v4396_v0 }
 0x5a4   : > { %5313 = vst [vmem:[%s8097_s16 + $0x358] sm:$0xff] %v6203_v42  ;;  %5505 = vmatprep.subr.bf16.mxu1 %v4545_v26  ;;  %s6095_s16 = sshll.u32 %s8933_s21, 4 }
 0x5a5   : > { %5506 = vmatpush1.bf16.msra.mxu1 %v4544_v32  ;;  %s517_s17 = scalar_lea.vmem %s8710_s12, %s6095_s16 }
 0x5a6   : > { %5507 = vmatprep.subr.bf16.mxu1 %v8920_v20 }
 0x5a9   : > { %5508 = vmatpush1.bf16.msra.mxu1 %v8921_v10 }
 0x5aa   : > { %5509 = vmatprep.subr.bf16.mxu1 %v8124_v4  ;;  %v8926_v4 = vld [vmem:[#allocation5_spill] sm:$0xff] }
 0x5ad   : > { %5510 = vmatpush1.bf16.msra.mxu1 %v8120_v37  ;;  %v8927_v37 = vld [vmem:[#allocation4_spill] sm:$0xff] }
 0x5ae   : > { %5511 = vmatprep.subr.bf16.mxu1 %v8142_v18  ;;  %v5342_v18 = vpop.permute.xlu0 %5341 }
 0x5b1   : > { %5512 = vmatpush1.bf16.msra.mxu1 %v8138_v56  ;;  %v6088_v56 = vcombine.low %v8620_v25, %v8620_v25 }
 0x5b2   : > { %5513 = vmatprep.subr.bf16.mxu1 %v8160_v50 }
 0x5b5   : > { %5514 = vmatpush1.bf16.msra.mxu1 %v8156_v41 }
 0x5b6   : > { %5515 = vmatprep.subr.bf16.mxu1 %v8922_v49 }
 0x5b9   : > { %5516 = vmatpush1.bf16.msra.mxu1 %v8923_v52 }
 0x5ba   : > { %5517 = vmatprep.subr.bf16.mxu1 %v8924_v55 }
 0x5bd   : > { %5518 = vmatpush1.bf16.msra.mxu1 %v8925_v8 }
 0x5be   : > { %5519 = vmatprep.subr.bf16.mxu1 %v8926_v4 }
 0x5c1   : > { %5520 = vmatpush1.bf16.msra.mxu1 %v8927_v37 }
 0x5c2   : > { %5521 = vmatprep.subr.bf16.mxu1 %v8232_v27 }
 0x5c5   : > { %5522 = vmatpush1.bf16.msra.mxu1 %v8228_v47 }
 0x5c6   : > { %5523 = vmatprep.subr.bf16.mxu1 %v8250_v14 }
 0x5c9   : > { %5524 = vmatpush1.bf16.msra.mxu1 %v8246_v57 }
 0x5ca   : > { %5525 = vmatprep.subr.bf16.mxu1 %v8268_v30 }
 0x5cd   : > { %5526 = vmatpush1.bf16.msra.mxu1 %v8264_v33 }
 0x5d0   : > { %5528 = vmatmul.mubr.bf16.vlgmr.msra.gmra.mrb[104].mxu1 %v6088_v56 }
 0x6a3   : > { %v5529_v41 = vpop.f32.mrb[104].mxu1 }
 0x6a4   : > { %v6256_v50 = vadd.f32 %v5529_v41, %v5342_v18  ;;  %v5531_v47 = vpop.f32.mrb[105].mxu1 }
 0x6a5   : > { %v6257_v27 = vadd.f32 %v5531_v47, %v5342_v18  ;;  %v5533_v14 = vpop.f32.mrb[106].mxu1 }
 0x6a6   : > { %5536 = vst [vmem:[%s517_s17] sm:$0xff] %v6256_v50  ;;  %v5534_v57 = vpop.f32.mrb[107].mxu1 }
 0x6a7   : > { %5537 = vst [vmem:[%s517_s17 + $0x8] sm:$0xff] %v6257_v27 }
 0x6a8 PF: > { %s23_s23 = sadd.s32 1, %s6685_s23   ;;  %s8928_s21 = smov %s6681_s22 }
 0x6a9   : > { %p20_p5 = scmp.ge.s32.totalorder %s23_s23, 4   ;;  %s8929_s22 = smov %s8931_s24 }
 0x6ab   :  { %22 = sbr.rel (!%p20_p5) target bundleno = 2 (0x2), region = 112 }

</bundles_post_ra>
